<compile_context>
chip_gen: v7x
topology: tpu7x:2x2x1
jax: 0.10.0
libtpu: 0.0.40
codegen_flags: <defaults>
</compile_context>

<pallas_src>
import jax
import jax.numpy as jnp
from jax.experimental import pallas as pl
from jax.experimental.pallas import tpu as pltpu


# ----------------------------------------------------------------------------- utils
def _round_up(x, m):
    return ((x + m - 1) // m) * m


def _zero_pad(x, shape):
    out = jnp.zeros(shape, x.dtype)
    return out.at[tuple(slice(0, s) for s in x.shape)].set(x)


# ----------------------------------------------------------------------------- fused kernel
def _make_kernel(n_nodes, n_edges, hid, h2p):
    two_n = 2 * n_nodes
    off_a = n_nodes                      # gather-matrix rows in the core slab
    off_w = n_nodes + n_edges            # first weight block in the core slab
    inv_n = 1.0 / n_nodes
    n_chunk = 8                          # sublane-sized node chunks for max-agg

    def kernel(core_ref, neg_ref, bm_ref, hw1_ref, hw2_ref, hs_ref, o_ref):
        # ---- hoisted graph operands (shared by all three layers) -----------
        a_sdm = core_ref[off_a:off_a + n_edges, 0:two_n]    # [E, 2N] bf16, mask-folded
        neg = neg_ref[...]                                   # [N, E] f32: 0 / -1e30

        def aggregate(msg):                                  # [E, H] -> [N, H]
            # Masked max over incoming edges. Node axis in chunks of 8 so the
            # [8, E, H] temporary stays inside the vreg file (full [N, E, H]
            # would spill past 64 vregs). Additive bias replaces the old
            # per-layer compare+select (selector hoisted, built host-side).
            chunks = []
            for c in range(0, n_nodes, n_chunk):
                bias = neg[c:c + n_chunk, :]                                  # [8, E]
                chunks.append(
                    jnp.max(bias[:, :, None] + msg[None, :, :], axis=1))      # [8, H]
            return jnp.concatenate(chunks, axis=0)                            # [N, H] f32

        def edge_conv(h_bf16, layer):
            o0 = off_w + 2 * layer * hid
            wt = core_ref[o0:o0 + hid, 0:hid]                 # bf16 [hid, hid]
            wf = core_ref[o0 + hid:o0 + 2 * hid, 0:hid]       # bf16 [hid, hid]
            bm = bm_ref[layer * n_edges:(layer + 1) * n_edges, :]   # f32 [E, H]
            # Node-level transform (E = 3N -> fewer MACs than per-edge), then
            # both endpoint gathers + the src/dst combine as ONE MXU matmul.
            u = jnp.dot(h_bf16, wt, preferred_element_type=jnp.float32)       # [N, H]
            v = jnp.dot(h_bf16, wf, preferred_element_type=jnp.float32)       # [N, H]
            uv = jnp.concatenate([u, v], axis=0).astype(jnp.bfloat16)         # [2N, H]
            msg = jnp.dot(a_sdm, uv, preferred_element_type=jnp.float32) + bm  # [E, H]
            return aggregate(msg)

        h = edge_conv(core_ref[0:n_nodes, 0:hid], 0)          # coords (feature-padded)
        h = edge_conv(h.astype(jnp.bfloat16), 1)
        h = edge_conv(h.astype(jnp.bfloat16), 2)

        # ---- MLP head (hidden dims zero-padded to lane multiples) ----------
        h1 = jnp.maximum(
            jnp.dot(h.astype(jnp.bfloat16), hw1_ref[...],
                    preferred_element_type=jnp.float32) + hs_ref[0:1, :], 0.0)
        h2 = jnp.maximum(
            jnp.dot(h1.astype(jnp.bfloat16), hw2_ref[...],
                    preferred_element_type=jnp.float32) + hs_ref[1:2, 0:h2p], 0.0)
        # dgl.mean_nodes folded THROUGH the final linear: reduce nodes first,
        # then dot the [1, h2p] mean with the final weight row.
        hm = jnp.sum(h2, axis=0, keepdims=True) * inv_n                        # [1, h2p]
        y = jnp.sum(hm * hs_ref[2:3, 0:h2p], axis=1, keepdims=True) \
            + hs_ref[3:4, 0:1]                                                 # [1, 1]
        o_ref[...] = y

    return kernel


# ----------------------------------------------------------------------------- wrapper
def lattice_gnn_masked_forward(raw_params, coords, src, dst, mask, hid):
    n_nodes, f_in = coords.shape
    n_edges = src.shape[0]
    two_n = 2 * n_nodes
    slab_w = max(hid, two_n)

    # ---- fold the two edge linears per layer -------------------------------
    def fold(wt, bt, wp, bp):
        return wt, wp - wt, bt + bp            # Theta, (Phi - Theta), summed bias

    gnn = [fold(*raw_params[k]) for k in ("gnn1", "gnn2", "gnn3")]

    # ---- graph -> dense operands (one-hot exact in bf16) -------------------
    asrc = jax.nn.one_hot(src, n_nodes, dtype=jnp.float32)          # [E, N]
    adst = jax.nn.one_hot(dst, n_nodes, dtype=jnp.float32)          # [E, N]
    a_sd = jnp.concatenate([asrc, adst], axis=1) * mask             # [E, 2N] mask-folded

    # bf16 core slab: padded coords, gather matrix, 6 GNN weight blocks
    rows = n_nodes + n_edges + 6 * hid
    core = jnp.zeros((rows, slab_w), jnp.float32)
    core = core.at[0:n_nodes, 0:f_in].set(coords)
    core = core.at[n_nodes:n_nodes + n_edges, 0:two_n].set(a_sd)
    off = n_nodes + n_edges
    for wt, wf, _ in gnn:
        core = core.at[off:off + wt.shape[0], 0:hid].set(wt); off += hid
        core = core.at[off:off + wf.shape[0], 0:hid].set(wf); off += hid
    core = core.astype(jnp.bfloat16)

    # f32 aggregation bias (0 if edge e ends at node n, else -1e30)
    neg = (adst.T - 1.0) * 1e30                                     # [N, E]
    # f32 masked per-layer edge biases mask*(bt+bp)
    bm = jnp.concatenate([mask * b for _, _, b in gnn], axis=0)     # [3E, hid]

    # head weights, zero-padded to lane multiples (exact)
    w1, b1, w2, b2, w3, b3 = raw_params["head"]
    h1p = _round_up(w1.shape[1], 128)            # 400 -> 512
    h2p = _round_up(w2.shape[1], 128)            # 200 -> 256
    hw1 = _zero_pad(w1, (hid, h1p)).astype(jnp.bfloat16)
    hw2 = _zero_pad(w2, (h1p, h2p)).astype(jnp.bfloat16)
    hs = jnp.zeros((4, h1p), jnp.float32)
    hs = hs.at[0, 0:w1.shape[1]].set(b1[0])
    hs = hs.at[1, 0:w2.shape[1]].set(b2[0])
    hs = hs.at[2, 0:w3.shape[0]].set(w3[:, 0])
    hs = hs.at[3, 0].set(b3[0, 0])

    args = (core, neg, bm, hw1, hw2, hs)
    kernel = _make_kernel(n_nodes, n_edges, hid, h2p)

    flops = 0
    for _ in range(3):
        flops += 2 * 2 * n_nodes * hid * hid        # node-level u, v transforms
        flops += 2 * n_edges * two_n * hid          # fused gather + src/dst sum
        flops += 2 * n_nodes * n_edges * hid        # masked max aggregation
    flops += 2 * n_nodes * (hid * h1p + h1p * h2p) + 2 * h2p
    bytes_accessed = sum(int(a.size) * a.dtype.itemsize for a in args) + 4

    out = pl.pallas_call(
        kernel,
        out_shape=jax.ShapeDtypeStruct((1, 1), jnp.float32),
        in_specs=[pl.BlockSpec(memory_space=pltpu.MemorySpace.VMEM)] * len(args),
        out_specs=pl.BlockSpec(memory_space=pltpu.MemorySpace.VMEM),
        cost_estimate=pl.CostEstimate(flops=int(flops), transcendentals=0,
                                      bytes_accessed=int(bytes_accessed)),
    )(*args)
    # TODO(synk): multi-graph batching (dgl batched graphs / segment means) not
    #             implemented; with a batch, add a leading "parallel" grid axis
    #             (block-diagonal per-graph slabs) so v7x's 2nd TensorCore and
    #             the 256-wide MXU on v6e/v7x get used.
    # TODO(synk): dense one-hot formulation is O(E*N); for large lattices switch
    #             to PrefetchScalarGridSpec index tables in SMEM with dst-sorted
    #             edge tiles and a segment-max accumulator.
    return out.reshape(-1)


# ----------------------------------------------------------------------------- params
def linear_params(key, fan_in, fan_out):
    kw, kb = jax.random.split(key)
    bound = 1.0 / (fan_in ** 0.5)
    w = jax.random.uniform(kw, (fan_in, fan_out), jnp.float32, -bound, bound)
    b = jax.random.uniform(kb, (1, fan_out), jnp.float32, -bound, bound)
    return w, b


def init_params(key, hid=32):
    """Raw (PyTorch-layout) parameters: per GNN layer (Wt, bt, Wp, bp)."""
    ks = jax.random.split(key, 9)
    gnn1 = linear_params(ks[0], 2, hid) + linear_params(ks[1], 2, hid)
    gnn2 = linear_params(ks[2], hid, hid) + linear_params(ks[3], hid, hid)
    gnn3 = linear_params(ks[4], hid, hid) + linear_params(ks[5], hid, hid)
    head = (linear_params(ks[6], hid, 400)
            + linear_params(ks[7], 400, 200)
            + linear_params(ks[8], 200, 1))
    return {"gnn1": gnn1, "gnn2": gnn2, "gnn3": gnn3, "head": head}


# ----------------------------------------------------------------------------- graph data
def build_grid_graph(nx=4, ny=4):
    """Bidirected 2D grid lattice: every node has >=2 incoming edges."""
    def idx(i, j):
        return i * ny + j
    src, dst = [], []
    for i in range(nx):
        for j in range(ny):
            for di, dj in ((1, 0), (0, 1)):
                ii, jj = i + di, j + dj
                if ii < nx and jj < ny:
                    a, b = idx(i, j), idx(ii, jj)
                    src += [a, b]
                    dst += [b, a]
    coords = jnp.array([[i / (nx - 1), j / (ny - 1)] for i in range(nx) for j in range(ny)],
                       jnp.float32)
    return coords, jnp.array(src, jnp.int32), jnp.array(dst, jnp.int32)


# ----------------------------------------------------------------------------- pure-JAX reference
def edgeconv_ref(x, src, dst, wt, bt, wp, bp, mask):
    xs, xd = x[src], x[dst]
    msg = ((xs - xd) @ wt + bt + xd @ wp + bp) * mask
    out = jnp.full((x.shape[0], wt.shape[1]), -1e30, jnp.float32)
    return out.at[dst].max(msg)


def forward_ref(params, coords, src, dst, mask):
    h = edgeconv_ref(coords, src, dst, *params["gnn1"], mask)
    h = edgeconv_ref(h, src, dst, *params["gnn2"], mask)
    h = edgeconv_ref(h, src, dst, *params["gnn3"], mask)
    w1, b1, w2, b2, w3, b3 = params["head"]
    h = jax.nn.relu(h @ w1 + b1)
    h = jax.nn.relu(h @ w2 + b2)
    y = h @ w3 + b3
    return jnp.mean(y, axis=0)   # [1]


# ----------------------------------------------------------------------------- main
if __name__ == "__main__":
    key = jax.random.PRNGKey(0)
    hid_nfeat = 32

    coords, src, dst = build_grid_graph(4, 4)          # N=16 nodes, E=48 directed edges
    n_edges = src.shape[0]
    mask = ((jnp.arange(n_edges) % 5) != 0).astype(jnp.float32)[:, None]   # [E, 1]

    raw_params = init_params(key, hid_nfeat)

    out = lattice_gnn_masked_forward(raw_params, coords, src, dst, mask, hid_nfeat)
    out = jax.block_until_ready(out)

    ref = forward_ref(raw_params, coords, src, dst, mask)
    assert out.shape == (1,), out.shape
    # bf16 MXU operands (f32 accumulation) -> slightly looser tolerance than f32.
    assert jnp.allclose(out, ref, atol=5e-2, rtol=5e-2), (out, ref)

    print("KERNEL_OK")
</pallas_src>

<mosaic_0001>
module attributes {stable_mosaic.version = 11 : i64} {
  func.func @kernel(%arg0: memref<256x32xbf16, #tpu.memory_space<vmem>>, %arg1: memref<16x48xf32, #tpu.memory_space<vmem>>, %arg2: memref<144x32xf32, #tpu.memory_space<vmem>>, %arg3: memref<32x512xbf16, #tpu.memory_space<vmem>>, %arg4: memref<512x256xbf16, #tpu.memory_space<vmem>>, %arg5: memref<4x512xf32, #tpu.memory_space<vmem>>, %arg6: memref<1x1xf32, #tpu.memory_space<vmem>>) attributes {dimension_semantics = [], scalar_prefetch = 0 : i64, scratch_operands = 0 : i64, tpu.core_type = #tpu.core_type<tc>} {
    %c16 = arith.constant 16 : index
    %c0 = arith.constant 0 : index
    %0 = vector.load %arg0[%c16, %c0] : memref<256x32xbf16, #tpu.memory_space<vmem>>, vector<48x32xbf16>
    %c0_0 = arith.constant 0 : index
    %c0_1 = arith.constant 0 : index
    %1 = vector.load %arg1[%c0_0, %c0_1] : memref<16x48xf32, #tpu.memory_space<vmem>>, vector<16x48xf32>
    %c0_2 = arith.constant 0 : index
    %c0_3 = arith.constant 0 : index
    %2 = vector.load %arg0[%c0_2, %c0_3] : memref<256x32xbf16, #tpu.memory_space<vmem>>, vector<16x32xbf16>
    %c64 = arith.constant 64 : index
    %c0_4 = arith.constant 0 : index
    %3 = vector.load %arg0[%c64, %c0_4] : memref<256x32xbf16, #tpu.memory_space<vmem>>, vector<32x32xbf16>
    %c96 = arith.constant 96 : index
    %c0_5 = arith.constant 0 : index
    %4 = vector.load %arg0[%c96, %c0_5] : memref<256x32xbf16, #tpu.memory_space<vmem>>, vector<32x32xbf16>
    %c0_6 = arith.constant 0 : index
    %c0_7 = arith.constant 0 : index
    %5 = vector.load %arg2[%c0_6, %c0_7] : memref<144x32xf32, #tpu.memory_space<vmem>>, vector<48x32xf32>
    %cst = arith.constant dense<0.000000e+00> : vector<16x32xf32>
    %6 = tpu.matmul %2, %3, %cst {dimension_numbers = #tpu.dot_dimension_numbers<[1], [0], [0], [1], [0, 0, 1, 1], [], []>} : vector<16x32xbf16>, vector<32x32xbf16>, vector<16x32xf32> -> vector<16x32xf32>
    %cst_8 = arith.constant dense<0.000000e+00> : vector<16x32xf32>
    %7 = tpu.matmul %2, %4, %cst_8 {dimension_numbers = #tpu.dot_dimension_numbers<[1], [0], [0], [1], [0, 0, 1, 1], [], []>} : vector<16x32xbf16>, vector<32x32xbf16>, vector<16x32xf32> -> vector<16x32xf32>
    %8 = tpu.concatenate %6, %7 in 0 : vector<16x32xf32>, vector<16x32xf32> -> vector<32x32xf32>
    %9 = arith.truncf %8 : vector<32x32xf32> to vector<32x32xbf16>
    %cst_9 = arith.constant dense<0.000000e+00> : vector<48x32xf32>
    %10 = tpu.matmul %0, %9, %cst_9 {dimension_numbers = #tpu.dot_dimension_numbers<[1], [0], [0], [1], [0, 0, 1, 1], [], []>} : vector<48x32xbf16>, vector<32x32xbf16>, vector<48x32xf32> -> vector<48x32xf32>
    %11 = arith.addf %10, %5 : vector<48x32xf32>
    %12 = vector.extract_strided_slice %1 {offsets = [0, 0], sizes = [8, 48], strides = [1, 1]} : vector<16x48xf32> to vector<8x48xf32>
    %13 = vector.shape_cast %12 : vector<8x48xf32> to vector<8x48x1xf32>
    %14 = vector.shape_cast %11 : vector<48x32xf32> to vector<1x48x32xf32>
    %15 = vector.broadcast %13 : vector<8x48x1xf32> to vector<8x48x32xf32>
    %16 = vector.broadcast %14 : vector<1x48x32xf32> to vector<8x48x32xf32>
    %17 = arith.addf %15, %16 : vector<8x48x32xf32>
    %cst_10 = arith.constant dense<0xFF800000> : vector<8x32xf32>
    %18 = vector.multi_reduction <maximumf>, %17, %cst_10 [1] : vector<8x48x32xf32> to vector<8x32xf32>
    %19 = vector.extract_strided_slice %1 {offsets = [8, 0], sizes = [8, 48], strides = [1, 1]} : vector<16x48xf32> to vector<8x48xf32>
    %20 = vector.shape_cast %19 : vector<8x48xf32> to vector<8x48x1xf32>
    %21 = vector.shape_cast %11 : vector<48x32xf32> to vector<1x48x32xf32>
    %22 = vector.broadcast %20 : vector<8x48x1xf32> to vector<8x48x32xf32>
    %23 = vector.broadcast %21 : vector<1x48x32xf32> to vector<8x48x32xf32>
    %24 = arith.addf %22, %23 : vector<8x48x32xf32>
    %cst_11 = arith.constant dense<0xFF800000> : vector<8x32xf32>
    %25 = vector.multi_reduction <maximumf>, %24, %cst_11 [1] : vector<8x48x32xf32> to vector<8x32xf32>
    %26 = tpu.concatenate %18, %25 in 0 : vector<8x32xf32>, vector<8x32xf32> -> vector<16x32xf32>
    %27 = arith.truncf %26 : vector<16x32xf32> to vector<16x32xbf16>
    %c128 = arith.constant 128 : index
    %c0_12 = arith.constant 0 : index
    %28 = vector.load %arg0[%c128, %c0_12] : memref<256x32xbf16, #tpu.memory_space<vmem>>, vector<32x32xbf16>
    %c160 = arith.constant 160 : index
    %c0_13 = arith.constant 0 : index
    %29 = vector.load %arg0[%c160, %c0_13] : memref<256x32xbf16, #tpu.memory_space<vmem>>, vector<32x32xbf16>
    %c48 = arith.constant 48 : index
    %c0_14 = arith.constant 0 : index
    %30 = vector.load %arg2[%c48, %c0_14] : memref<144x32xf32, #tpu.memory_space<vmem>>, vector<48x32xf32>
    %cst_15 = arith.constant dense<0.000000e+00> : vector<16x32xf32>
    %31 = tpu.matmul %27, %28, %cst_15 {dimension_numbers = #tpu.dot_dimension_numbers<[1], [0], [0], [1], [0, 0, 1, 1], [], []>} : vector<16x32xbf16>, vector<32x32xbf16>, vector<16x32xf32> -> vector<16x32xf32>
    %cst_16 = arith.constant dense<0.000000e+00> : vector<16x32xf32>
    %32 = tpu.matmul %27, %29, %cst_16 {dimension_numbers = #tpu.dot_dimension_numbers<[1], [0], [0], [1], [0, 0, 1, 1], [], []>} : vector<16x32xbf16>, vector<32x32xbf16>, vector<16x32xf32> -> vector<16x32xf32>
    %33 = tpu.concatenate %31, %32 in 0 : vector<16x32xf32>, vector<16x32xf32> -> vector<32x32xf32>
    %34 = arith.truncf %33 : vector<32x32xf32> to vector<32x32xbf16>
    %cst_17 = arith.constant dense<0.000000e+00> : vector<48x32xf32>
    %35 = tpu.matmul %0, %34, %cst_17 {dimension_numbers = #tpu.dot_dimension_numbers<[1], [0], [0], [1], [0, 0, 1, 1], [], []>} : vector<48x32xbf16>, vector<32x32xbf16>, vector<48x32xf32> -> vector<48x32xf32>
    %36 = arith.addf %35, %30 : vector<48x32xf32>
    %37 = vector.extract_strided_slice %1 {offsets = [0, 0], sizes = [8, 48], strides = [1, 1]} : vector<16x48xf32> to vector<8x48xf32>
    %38 = vector.shape_cast %37 : vector<8x48xf32> to vector<8x48x1xf32>
    %39 = vector.shape_cast %36 : vector<48x32xf32> to vector<1x48x32xf32>
    %40 = vector.broadcast %38 : vector<8x48x1xf32> to vector<8x48x32xf32>
    %41 = vector.broadcast %39 : vector<1x48x32xf32> to vector<8x48x32xf32>
    %42 = arith.addf %40, %41 : vector<8x48x32xf32>
    %cst_18 = arith.constant dense<0xFF800000> : vector<8x32xf32>
    %43 = vector.multi_reduction <maximumf>, %42, %cst_18 [1] : vector<8x48x32xf32> to vector<8x32xf32>
    %44 = vector.extract_strided_slice %1 {offsets = [8, 0], sizes = [8, 48], strides = [1, 1]} : vector<16x48xf32> to vector<8x48xf32>
    %45 = vector.shape_cast %44 : vector<8x48xf32> to vector<8x48x1xf32>
    %46 = vector.shape_cast %36 : vector<48x32xf32> to vector<1x48x32xf32>
    %47 = vector.broadcast %45 : vector<8x48x1xf32> to vector<8x48x32xf32>
    %48 = vector.broadcast %46 : vector<1x48x32xf32> to vector<8x48x32xf32>
    %49 = arith.addf %47, %48 : vector<8x48x32xf32>
    %cst_19 = arith.constant dense<0xFF800000> : vector<8x32xf32>
    %50 = vector.multi_reduction <maximumf>, %49, %cst_19 [1] : vector<8x48x32xf32> to vector<8x32xf32>
    %51 = tpu.concatenate %43, %50 in 0 : vector<8x32xf32>, vector<8x32xf32> -> vector<16x32xf32>
    %52 = arith.truncf %51 : vector<16x32xf32> to vector<16x32xbf16>
    %c192 = arith.constant 192 : index
    %c0_20 = arith.constant 0 : index
    %53 = vector.load %arg0[%c192, %c0_20] : memref<256x32xbf16, #tpu.memory_space<vmem>>, vector<32x32xbf16>
    %c224 = arith.constant 224 : index
    %c0_21 = arith.constant 0 : index
    %54 = vector.load %arg0[%c224, %c0_21] : memref<256x32xbf16, #tpu.memory_space<vmem>>, vector<32x32xbf16>
    %c96_22 = arith.constant 96 : index
    %c0_23 = arith.constant 0 : index
    %55 = vector.load %arg2[%c96_22, %c0_23] : memref<144x32xf32, #tpu.memory_space<vmem>>, vector<48x32xf32>
    %cst_24 = arith.constant dense<0.000000e+00> : vector<16x32xf32>
    %56 = tpu.matmul %52, %53, %cst_24 {dimension_numbers = #tpu.dot_dimension_numbers<[1], [0], [0], [1], [0, 0, 1, 1], [], []>} : vector<16x32xbf16>, vector<32x32xbf16>, vector<16x32xf32> -> vector<16x32xf32>
    %cst_25 = arith.constant dense<0.000000e+00> : vector<16x32xf32>
    %57 = tpu.matmul %52, %54, %cst_25 {dimension_numbers = #tpu.dot_dimension_numbers<[1], [0], [0], [1], [0, 0, 1, 1], [], []>} : vector<16x32xbf16>, vector<32x32xbf16>, vector<16x32xf32> -> vector<16x32xf32>
    %58 = tpu.concatenate %56, %57 in 0 : vector<16x32xf32>, vector<16x32xf32> -> vector<32x32xf32>
    %59 = arith.truncf %58 : vector<32x32xf32> to vector<32x32xbf16>
    %cst_26 = arith.constant dense<0.000000e+00> : vector<48x32xf32>
    %60 = tpu.matmul %0, %59, %cst_26 {dimension_numbers = #tpu.dot_dimension_numbers<[1], [0], [0], [1], [0, 0, 1, 1], [], []>} : vector<48x32xbf16>, vector<32x32xbf16>, vector<48x32xf32> -> vector<48x32xf32>
    %61 = arith.addf %60, %55 : vector<48x32xf32>
    %62 = vector.extract_strided_slice %1 {offsets = [0, 0], sizes = [8, 48], strides = [1, 1]} : vector<16x48xf32> to vector<8x48xf32>
    %63 = vector.shape_cast %62 : vector<8x48xf32> to vector<8x48x1xf32>
    %64 = vector.shape_cast %61 : vector<48x32xf32> to vector<1x48x32xf32>
    %65 = vector.broadcast %63 : vector<8x48x1xf32> to vector<8x48x32xf32>
    %66 = vector.broadcast %64 : vector<1x48x32xf32> to vector<8x48x32xf32>
    %67 = arith.addf %65, %66 : vector<8x48x32xf32>
    %cst_27 = arith.constant dense<0xFF800000> : vector<8x32xf32>
    %68 = vector.multi_reduction <maximumf>, %67, %cst_27 [1] : vector<8x48x32xf32> to vector<8x32xf32>
    %69 = vector.extract_strided_slice %1 {offsets = [8, 0], sizes = [8, 48], strides = [1, 1]} : vector<16x48xf32> to vector<8x48xf32>
    %70 = vector.shape_cast %69 : vector<8x48xf32> to vector<8x48x1xf32>
    %71 = vector.shape_cast %61 : vector<48x32xf32> to vector<1x48x32xf32>
    %72 = vector.broadcast %70 : vector<8x48x1xf32> to vector<8x48x32xf32>
    %73 = vector.broadcast %71 : vector<1x48x32xf32> to vector<8x48x32xf32>
    %74 = arith.addf %72, %73 : vector<8x48x32xf32>
    %cst_28 = arith.constant dense<0xFF800000> : vector<8x32xf32>
    %75 = vector.multi_reduction <maximumf>, %74, %cst_28 [1] : vector<8x48x32xf32> to vector<8x32xf32>
    %76 = tpu.concatenate %68, %75 in 0 : vector<8x32xf32>, vector<8x32xf32> -> vector<16x32xf32>
    %77 = arith.truncf %76 : vector<16x32xf32> to vector<16x32xbf16>
    %c0_29 = arith.constant 0 : index
    %c0_30 = arith.constant 0 : index
    %78 = vector.load %arg3[%c0_29, %c0_30] : memref<32x512xbf16, #tpu.memory_space<vmem>>, vector<32x512xbf16>
    %cst_31 = arith.constant dense<0.000000e+00> : vector<16x512xf32>
    %79 = tpu.matmul %77, %78, %cst_31 {dimension_numbers = #tpu.dot_dimension_numbers<[1], [0], [0], [1], [0, 0, 1, 1], [], []>} : vector<16x32xbf16>, vector<32x512xbf16>, vector<16x512xf32> -> vector<16x512xf32>
    %c0_32 = arith.constant 0 : index
    %c0_33 = arith.constant 0 : index
    %80 = vector.load %arg5[%c0_32, %c0_33] : memref<4x512xf32, #tpu.memory_space<vmem>>, vector<1x512xf32>
    %81 = vector.broadcast %80 : vector<1x512xf32> to vector<16x512xf32>
    %82 = arith.addf %79, %81 : vector<16x512xf32>
    %cst_34 = arith.constant 0.000000e+00 : f32
    %83 = vector.broadcast %cst_34 : f32 to vector<16x512xf32>
    %84 = arith.maximumf %82, %83 : vector<16x512xf32>
    %85 = arith.truncf %84 : vector<16x512xf32> to vector<16x512xbf16>
    %c0_35 = arith.constant 0 : index
    %c0_36 = arith.constant 0 : index
    %86 = vector.load %arg4[%c0_35, %c0_36] : memref<512x256xbf16, #tpu.memory_space<vmem>>, vector<512x256xbf16>
    %cst_37 = arith.constant dense<0.000000e+00> : vector<16x256xf32>
    %87 = tpu.matmul %85, %86, %cst_37 {dimension_numbers = #tpu.dot_dimension_numbers<[1], [0], [0], [1], [0, 0, 1, 1], [], []>} : vector<16x512xbf16>, vector<512x256xbf16>, vector<16x256xf32> -> vector<16x256xf32>
    %c1 = arith.constant 1 : index
    %c0_38 = arith.constant 0 : index
    %88 = vector.load %arg5[%c1, %c0_38] : memref<4x512xf32, #tpu.memory_space<vmem>>, vector<1x256xf32>
    %89 = vector.broadcast %88 : vector<1x256xf32> to vector<16x256xf32>
    %90 = arith.addf %87, %89 : vector<16x256xf32>
    %cst_39 = arith.constant 0.000000e+00 : f32
    %91 = vector.broadcast %cst_39 : f32 to vector<16x256xf32>
    %92 = arith.maximumf %90, %91 : vector<16x256xf32>
    %cst_40 = arith.constant dense<0.000000e+00> : vector<256xf32>
    %93 = vector.multi_reduction <add>, %92, %cst_40 [0] : vector<16x256xf32> to vector<256xf32>
    %94 = vector.shape_cast %93 : vector<256xf32> to vector<1x256xf32>
    %cst_41 = arith.constant 6.250000e-02 : f32
    %95 = vector.broadcast %cst_41 : f32 to vector<1x256xf32>
    %96 = arith.mulf %94, %95 : vector<1x256xf32>
    %c2 = arith.constant 2 : index
    %c0_42 = arith.constant 0 : index
    %97 = vector.load %arg5[%c2, %c0_42] : memref<4x512xf32, #tpu.memory_space<vmem>>, vector<1x256xf32>
    %98 = arith.mulf %96, %97 : vector<1x256xf32>
    %cst_43 = arith.constant dense<0.000000e+00> : vector<1xf32>
    %99 = vector.multi_reduction <add>, %98, %cst_43 [1] : vector<1x256xf32> to vector<1xf32>
    %100 = vector.shape_cast %99 : vector<1xf32> to vector<1x1xf32>
    %c3 = arith.constant 3 : index
    %c0_44 = arith.constant 0 : index
    %101 = vector.load %arg5[%c3, %c0_44] : memref<4x512xf32, #tpu.memory_space<vmem>>, vector<1x1xf32>
    %102 = arith.addf %100, %101 : vector<1x1xf32>
    %c0_45 = arith.constant 0 : index
    %c0_46 = arith.constant 0 : index
    %103 = vector.load %arg6[%c0_45, %c0_46] : memref<1x1xf32, #tpu.memory_space<vmem>>, vector<1x1xf32>
    tpu.vector_store %arg6[%c0_45, %c0_46], %102 {strides = array<i32>} : memref<1x1xf32, #tpu.memory_space<vmem>>, vector<1x1xf32>,
    return
  }
}

</mosaic_0001>

<bundles_post_ra>
// kernel: tpu_custom_call.1
= control target key start
LH: loop header
LB: loop body
LE: loop exit
PB: predicated region body
PF: predicated region fallthrough
CT: control target
= control target key end

     0   :  { %11 = vsyncpa [#allocation3], 0  ;;  %s5421_s0 = inlined_call_operand.vmem [shape: bf16[256,32], index: 0, kind: input, shape index: {}]   ;;  %s5422_s1 = inlined_call_operand.vmem [shape: f32[16,48], index: 1, kind: input, shape index: {}]   ;;  %s5423_s2 = inlined_call_operand.vmem [shape: f32[144,32], index: 2, kind: input, shape index: {}]   ;;  %s5424_s3 = inlined_call_operand.vmem [shape: bf16[32,512], index: 3, kind: input, shape index: {}]   ;;  %s5425_s4 = inlined_call_operand.hbm [shape: bf16[512,256], index: 4, kind: input, shape index: {}]   ;;  %s5426_s5 = inlined_call_operand.vmem [shape: f32[4,512], index: 5, kind: input, shape index: {}]   ;;  %s5427_s6 = inlined_call_operand.hbm [shape: f32[1,1], index: 6, kind: output, shape index: {}]  }
   0x1   :  { %12 = vsyncpa [#allocation4], 0  ;;  %s3407_s21 = smov [#allocation2]   ;;  %s3359_s25 = scalar_lea.hbm %s5425_s4, 8192 }
   0x2   :  { %s26_s22 = sshll.u32 %s3407_s21, 4  ;;  %p3360_p0 = scmp.ne.s32.totalorder %s5425_s4, %s3359_s25  ;;  %s27_s22 = int_to_ptr.vmem [resolvable:$true] %s26_s22 }
   0x3   :  { %p3363_p1 = scmp.lt.u32.totalorder %s3359_s25, %s5425_s4 }
   0x5   :  { %p3365_p2 = pnand %p3363_p1, %p3360_p0 }
   0x7   :  { %3368 = shalt.err (!%p3365_p2)
}
   0x8   :  { %s3369_s30 = scalar_lea.vmem %s27_s22, 8192  ;;  %p3374_p4 = scmp.lt.s32.totalorder %s27_s22, %s27_s22 }
   0x9   :  { %p3370_p3 = scmp.ne.s32.totalorder %s27_s22, %s3369_s30  ;;  %p3375_p5 = scmp.lt.s32.totalorder %s3369_s30, %s3369_s30 }
   0xb   :  { %p3376_p6 = por %p3375_p5, %p3374_p4 }
   0xd   :  { %p3377_p7 = pnand %p3376_p6, %p3370_p3 }
   0xf   :  { %3380 = shalt.err (!%p3377_p7)
}
  0x10   :  { %s3408_s7 = smov 128   ;;  %s3409_s8 = smov 8  }
  0x11   :  { %32 = dma.hbm_to_vmem [thread:$0]  %s5425_s4, 8192, %s27_s22, [#allocation3], %s3408_s7, %s3408_s7, %s3409_s8  }
  0x12   :  { %3403 = dma.done.wait [#allocation3], 8192  }
  0x13   :  { %3404 = vsyncadd [#allocation3], 4294959104  ;;  %v261_v0 = vlaneseq  ;;  %v5428_v1 = vmov 0.0   ;;  %vm3411_vm0 = vmmov 0   ;;  %v3232_v3 = vld [vmem:[%s5421_s0 + $0x20] sm:$0xff]   ;;  %v3233_v4 = vld [vmem:[%s5421_s0 + $0x30] sm:$0xff]  }
  0x14   :  { %3121 = vmatprep.subr.bf16.mxu0 %v5428_v1  ;;  %3129 = vmatprep.subr.bf16.mxu1 %v5428_v1  ;;  %v3234_v6 = vld [vmem:[%s5421_s0 + $0x28] sm:$0xff]   ;;  %v3235_v8 = vld [vmem:[%s5421_s0 + $0x38] sm:$0xff]   ;;  %v3236_v9 = vld [vmem:[%s5421_s0] sm:$0xff]   ;;  %vm80_vm1 = vcmask 261120   ;;  %vm1069_vm2 = vcmask 1041409   ;;  %vm1071_vm3 = vcmask 1042434  }
  0x15   :  { %3125 = vmatprep.mubr.msk.bf16.mxu0 %vm3411_vm0, %v5428_v1  ;;  %3133 = vmatprep.mubr.msk.bf16.mxu1 %vm3411_vm0, %v5428_v1  ;;  %v3467_v2 = vshrl.u32 %v261_v0, 7  ;;  %v3495_v10 = vld [vmem:[%s5422_s1] sm:$0xff]  ;;  %v3508_v13 = vld [vmem:[%s5422_s1 + $0x8] sm:$0xff]  ;;  %vm1073_vm4 = vcmask 1043459   ;;  %vm1075_vm5 = vcmask 1044484   ;;  %vm1077_vm6 = vcmask 1045509  }
  0x16   :  { %3122 = vmatpush3.bf16.msra.mxu0 %v3232_v3  ;;  %3130 = vmatpush3.bf16.msra.mxu1 %v3233_v4  ;;  %v3237_v62 = vld [vmem:[%s5421_s0 + $0x8] sm:$0xff]   ;;  %vm1079_vm7 = vcmask 1046534   ;;  %vm1081_vm8 = vcmask 1047559   ;;  %vm2956_vm9 = vcmask 1040384   ;;  %s3413_s29 = smov [#allocation5]   ;;  %vm2964_vm10 = vcmask 0  }
  0x17   :  { %v3476_v5 = vsub.s32 1, %v3467_v2  ;;  %v3482_v7 = vsub.s32 0, %v3467_v2  ;;  %3123 = vmatprep.subr.bf16.mxu0 %v5428_v1  ;;  %3131 = vmatprep.subr.bf16.mxu1 %v5428_v1  ;;  %v3533_v16 = vsub.s32 2, %v3467_v2  ;;  %v3550_v19 = vsub.s32 3, %v3467_v2  ;;  %s2972_s30 = sshll.u32 %s3413_s29, 4  ;;  %s2973_s30 = int_to_ptr.vmem [resolvable:$true] %s2972_s30 }
  0x18   :  { %v371_v22 = vsub.s32 4, %v3467_v2  ;;  %v398_v25 = vsub.s32 5, %v3467_v2  ;;  %v425_v28 = vsub.s32 6, %v3467_v2  ;;  %v452_v31 = vsub.s32 7, %v3467_v2  ;;  %v3238_v2 = vld [vmem:[%s5421_s0 + $0x10] sm:$0xff]   ;;  %s3381_s7 = scalar_lea.vmem %s2973_s30, 16  ;;  %p3386_p9 = scmp.lt.s32.totalorder %s2973_s30, %s2973_s30 }
  0x19   :  { %5599 = vst [vmem:[#allocation8_spill] sm:$0xff] %v3476_v5  ;;  %5600 = vst [vmem:[#allocation9_spill] sm:$0xff] %v3482_v7  ;;  %v3499_v11 = vrot.slane %v3495_v10, %v3476_v5  ;;  %v3503_v12 = vrot.slane %v3495_v10, %v3482_v7  ;;  %v3524_v14 = vrot.slane %v3508_v13, %v3482_v7  ;;  %p3382_p8 = scmp.ne.s32.totalorder %s2973_s30, %s3381_s7  ;;  %s3385_s8 = scalar_lea.vmem %s2973_s30, 32 }
  0x1a   :  { %3124 = vmatpush3.bf16.msra.mxu0 %v3234_v6  ;;  %3132 = vmatpush3.bf16.msra.mxu1 %v3235_v8  ;;  %v3530_v15 = vrot.slane %v3508_v13, %v3476_v5  ;;  %5601 = vst [vmem:[#allocation10_spill] sm:$0xff] %v3533_v16  ;;  %v3539_v17 = vrot.slane %v3495_v10, %v3533_v16  ;;  %5602 = vst [vmem:[#allocation11_spill] sm:$0xff] %v3550_v19  ;;  %v3239_v6 = vld [vmem:[%s5421_s0 + $0x18] sm:$0xff]   ;;  %v5663_v5 = vmov 0.0   ;;  %p3387_p10 = scmp.lt.s32.totalorder %s3385_s8, %s3381_s7 }
  0x1b   :  { %293 = vbcast.lane.b32.xlu1 %v3499_v11, 256  ;;  %266 = vbcast.lane.b32.xlu0 %v3503_v12, 256  ;;  %v3545_v18 = vrot.slane %v3508_v13, %v3533_v16  ;;  %v3556_v20 = vrot.slane %v3495_v10, %v3550_v19  ;;  %v3564_v21 = vrot.slane %v3508_v13, %v3550_v19  ;;  %v3241_v16 = vld [vmem:[%s5421_s0 + $0x48] sm:$0xff]  }
  0x1c   :  { %3137 = vmatprep.subr.bf16.mxu0 %v5428_v1  ;;  %3153 = vmatprep.subr.bf16.mxu1 %v5428_v1  ;;  %v3570_v23 = vrot.slane %v3495_v10, %v371_v22  ;;  %v3577_v24 = vrot.slane %v3508_v13, %v371_v22  ;;  %v3585_v26 = vrot.slane %v3495_v10, %v398_v25  ;;  %p3388_p11 = por %p3387_p10, %p3386_p9 }
  0x1d   :  { %3126 = vmatmul.mubr.msk.bf16.vlgmr.msra.gmra.mrb[0].mxu0 %vm80_vm1, %v3236_v9  ;;  %3134 = vmatmul.mubr.msk.bf16.vlgmr.msra.gmra.mrb[0].mxu1 %vm80_vm1, %v3236_v9  ;;  %v3594_v27 = vrot.slane %v3508_v13, %v398_v25  ;;  %v3602_v29 = vrot.slane %v3495_v10, %v425_v28  ;;  %v3609_v30 = vrot.slane %v3508_v13, %v425_v28 }
  0x1e   :  { %3141 = vmatprep.mubr.msk.bf16.mxu0 %vm3411_vm0, %v5428_v1  ;;  %3157 = vmatprep.mubr.msk.bf16.mxu1 %vm3411_vm0, %v5428_v1  ;;  %v3619_v32 = vrot.slane %v3495_v10, %v452_v31  ;;  %v853_v33 = vrot.slane %v3508_v13, %v452_v31  ;;  %p3389_p12 = pnand %p3388_p11, %p3382_p8 }
  0x1f   :  { %297 = vbcast.lane.b32.xlu1 %v3499_v11, 264  ;;  %270 = vbcast.lane.b32.xlu0 %v3503_v12, 264 }
  0x23   :  { %670 = vbcast.lane.b32.xlu1 %v3524_v14, 264  ;;  %666 = vbcast.lane.b32.xlu0 %v3524_v14, 256 }
  0x27   :  { %697 = vbcast.lane.b32.xlu1 %v3530_v15, 264  ;;  %693 = vbcast.lane.b32.xlu0 %v3530_v15, 256 }
  0x2b   :  { %324 = vbcast.lane.b32.xlu1 %v3539_v17, 264  ;;  %320 = vbcast.lane.b32.xlu0 %v3539_v17, 256 }
  0x2f   :  { %724 = vbcast.lane.b32.xlu1 %v3545_v18, 264  ;;  %720 = vbcast.lane.b32.xlu0 %v3545_v18, 256 }
  0x33   :  { %301 = vbcast.lane.b32.xlu1 %v3499_v11, 272  ;;  %274 = vbcast.lane.b32.xlu0 %v3503_v12, 272 }
  0x37   :  { %351 = vbcast.lane.b32.xlu1 %v3556_v20, 264  ;;  %347 = vbcast.lane.b32.xlu0 %v3556_v20, 256 }
  0x3b   :  { %701 = vbcast.lane.b32.xlu1 %v3530_v15, 272  ;;  %674 = vbcast.lane.b32.xlu0 %v3524_v14, 272 }
  0x3f   :  { %751 = vbcast.lane.b32.xlu1 %v3564_v21, 264  ;;  %747 = vbcast.lane.b32.xlu0 %v3564_v21, 256 }
  0x43   :  { %374 = vbcast.lane.b32.xlu1 %v3570_v23, 256  ;;  %328 = vbcast.lane.b32.xlu0 %v3539_v17, 272 }
  0x47   :  { %728 = vbcast.lane.b32.xlu1 %v3545_v18, 272  ;;  %378 = vbcast.lane.b32.xlu0 %v3570_v23, 264 }
  0x4b   :  { %778 = vbcast.lane.b32.xlu1 %v3577_v24, 264  ;;  %774 = vbcast.lane.b32.xlu0 %v3577_v24, 256 }
  0x4f   :  { %305 = vbcast.lane.b32.xlu1 %v3499_v11, 280  ;;  %278 = vbcast.lane.b32.xlu0 %v3503_v12, 280 }
  0x53   :  { %401 = vbcast.lane.b32.xlu1 %v3585_v26, 256  ;;  %355 = vbcast.lane.b32.xlu0 %v3556_v20, 272 }
  0x57   :  { %678 = vbcast.lane.b32.xlu1 %v3524_v14, 280  ;;  %405 = vbcast.lane.b32.xlu0 %v3585_v26, 264 }
  0x5b   :  { %755 = vbcast.lane.b32.xlu1 %v3564_v21, 272  ;;  %705 = vbcast.lane.b32.xlu0 %v3530_v15, 280 }
  0x5f   :  { %805 = vbcast.lane.b32.xlu1 %v3594_v27, 264  ;;  %801 = vbcast.lane.b32.xlu0 %v3594_v27, 256 }
  0x63   :  { %382 = vbcast.lane.b32.xlu1 %v3570_v23, 272  ;;  %332 = vbcast.lane.b32.xlu0 %v3539_v17, 280 }
  0x67   :  { %432 = vbcast.lane.b32.xlu1 %v3602_v29, 264  ;;  %428 = vbcast.lane.b32.xlu0 %v3602_v29, 256 }
  0x6b   :  { %782 = vbcast.lane.b32.xlu1 %v3577_v24, 272  ;;  %732 = vbcast.lane.b32.xlu0 %v3545_v18, 280 }
  0x6f   :  { %832 = vbcast.lane.b32.xlu1 %v3609_v30, 264  ;;  %828 = vbcast.lane.b32.xlu0 %v3609_v30, 256 }
  0x73   :  { %309 = vbcast.lane.b32.xlu1 %v3499_v11, 288  ;;  %282 = vbcast.lane.b32.xlu0 %v3503_v12, 288 }
  0x77   :  { %409 = vbcast.lane.b32.xlu1 %v3585_v26, 272  ;;  %359 = vbcast.lane.b32.xlu0 %v3556_v20, 280 }
  0x7b   :  { %459 = vbcast.lane.b32.xlu1 %v3619_v32, 264  ;;  %455 = vbcast.lane.b32.xlu0 %v3619_v32, 256 }
  0x7f   :  { %709 = vbcast.lane.b32.xlu1 %v3530_v15, 288  ;;  %682 = vbcast.lane.b32.xlu0 %v3524_v14, 288 }
  0x83   :  { %809 = vbcast.lane.b32.xlu1 %v3594_v27, 272  ;;  %759 = vbcast.lane.b32.xlu0 %v3564_v21, 280 }
  0x87   :  { %859 = vbcast.lane.b32.xlu1 %v853_v33, 264  ;;  %855 = vbcast.lane.b32.xlu0 %v853_v33, 256 }
  0x8b   :  { %386 = vbcast.lane.b32.xlu1 %v3570_v23, 280  ;;  %336 = vbcast.lane.b32.xlu0 %v3539_v17, 288 }
  0x8d   :  { %v3643_v34 = vpop.permute.xlu1 %293  ;;  %v3647_v35 = vpop.permute.xlu0 %266 }
  0x8e   :  { %5603 = vst [vmem:[#allocation12_spill] sm:$0xff] %v3643_v34  ;;  %5604 = vst [vmem:[#allocation13_spill] sm:$0xff] %v3647_v35 }
  0x8f   :  { %736 = vbcast.lane.b32.xlu1 %v3545_v18, 288  ;;  %436 = vbcast.lane.b32.xlu0 %v3602_v29, 272 }
  0x91   :  { %v3651_v36 = vpop.permute.xlu1 %297  ;;  %v3653_v37 = vpop.permute.xlu0 %270 }
  0x92   :  { %5605 = vst [vmem:[#allocation14_spill] sm:$0xff] %v3651_v36  ;;  %5606 = vst [vmem:[#allocation15_spill] sm:$0xff] %v3653_v37 }
  0x93   :  { %836 = vbcast.lane.b32.xlu1 %v3609_v30, 272  ;;  %786 = vbcast.lane.b32.xlu0 %v3577_v24, 280 }
  0x95   :  { %v3657_v38 = vpop.permute.xlu1 %670  ;;  %v3661_v39 = vpop.permute.xlu0 %666 }
  0x96   :  { %5607 = vst [vmem:[#allocation16_spill] sm:$0xff] %v3657_v38  ;;  %5608 = vst [vmem:[#allocation17_spill] sm:$0xff] %v3661_v39 }
  0x97   :  { %313 = vbcast.lane.b32.xlu1 %v3499_v11, 296  ;;  %286 = vbcast.lane.b32.xlu0 %v3503_v12, 296 }
  0x99   :  { %v3665_v40 = vpop.permute.xlu1 %697  ;;  %v3667_v41 = vpop.permute.xlu0 %693 }
  0x9a   :  { %5609 = vst [vmem:[#allocation18_spill] sm:$0xff] %v3665_v40  ;;  %5610 = vst [vmem:[#allocation19_spill] sm:$0xff] %v3667_v41 }
  0x9b   :  { %413 = vbcast.lane.b32.xlu1 %v3585_v26, 280  ;;  %363 = vbcast.lane.b32.xlu0 %v3556_v20, 288 }
  0x9d   :  { %v3670_v42 = vpop.permute.xlu1 %324  ;;  %v3674_v43 = vpop.permute.xlu0 %320 }
  0x9e   :  { %5611 = vst [vmem:[#allocation20_spill] sm:$0xff] %v3670_v42  ;;  %5612 = vst [vmem:[#allocation21_spill] sm:$0xff] %v3674_v43 }
  0x9f   :  { %686 = vbcast.lane.b32.xlu1 %v3524_v14, 296  ;;  %463 = vbcast.lane.b32.xlu0 %v3619_v32, 272 }
  0xa1   :  { %v3678_v44 = vpop.permute.xlu1 %724  ;;  %v3680_v45 = vpop.permute.xlu0 %720 }
  0xa2   :  { %5613 = vst [vmem:[#allocation22_spill] sm:$0xff] %v3678_v44  ;;  %5614 = vst [vmem:[#allocation23_spill] sm:$0xff] %v3680_v45 }
  0xa3   :  { %763 = vbcast.lane.b32.xlu1 %v3564_v21, 288  ;;  %713 = vbcast.lane.b32.xlu0 %v3530_v15, 296 }
  0xa5   :  { %v3684_v46 = vpop.permute.xlu1 %301  ;;  %v3687_v47 = vpop.permute.xlu0 %274 }
  0xa6   :  { %5615 = vst [vmem:[#allocation24_spill] sm:$0xff] %v3684_v46  ;;  %5616 = vst [vmem:[#allocation25_spill] sm:$0xff] %v3687_v47 }
  0xa7   :  { %863 = vbcast.lane.b32.xlu1 %v853_v33, 272  ;;  %813 = vbcast.lane.b32.xlu0 %v3594_v27, 280 }
  0xa9   :  { %v3691_v48 = vpop.permute.xlu1 %351  ;;  %v3693_v50 = vpop.permute.xlu0 %347 }
  0xaa   :  { %5617 = vst [vmem:[#allocation26_spill] sm:$0xff] %v3691_v48  ;;  %5618 = vst [vmem:[#allocation27_spill] sm:$0xff] %v3693_v50 }
  0xab   :  { %390 = vbcast.lane.b32.xlu1 %v3570_v23, 288  ;;  %340 = vbcast.lane.b32.xlu0 %v3539_v17, 296 }
  0xad   :  { %v3697_v60 = vpop.permute.xlu1 %701  ;;  %v3699_v61 = vpop.permute.xlu0 %674 }
  0xae   :  { %5619 = vst [vmem:[#allocation28_spill] sm:$0xff] %v3697_v60  ;;  %5620 = vst [vmem:[#allocation29_spill] sm:$0xff] %v3699_v61 }
  0xaf   :  { %740 = vbcast.lane.b32.xlu1 %v3545_v18, 296  ;;  %440 = vbcast.lane.b32.xlu0 %v3602_v29, 280 }
  0xb1   :  { %v3706_v63 = vpop.permute.xlu1 %751  ;;  %v3710_v0 = vpop.permute.xlu0 %747 }
  0xb2   :  { %5621 = vst [vmem:[#allocation30_spill] sm:$0xff] %v3706_v63  ;;  %5622 = vst [vmem:[#allocation31_spill] sm:$0xff] %v3710_v0 }
  0xb3   :  { %840 = vbcast.lane.b32.xlu1 %v3609_v30, 280  ;;  %790 = vbcast.lane.b32.xlu0 %v3577_v24, 288 }
  0xb5   :  { %v3715_v3 = vpop.permute.xlu1 %374  ;;  %v3717_v4 = vpop.permute.xlu0 %328 }
  0xb6   :  { %5623 = vst [vmem:[#allocation32_spill] sm:$0xff] %v3715_v3  ;;  %5624 = vst [vmem:[#allocation33_spill] sm:$0xff] %v3717_v4 }
  0xb7   :  { %417 = vbcast.lane.b32.xlu1 %v3585_v26, 288  ;;  %367 = vbcast.lane.b32.xlu0 %v3556_v20, 296 }
  0xb9   :  { %v3725_v8 = vpop.permute.xlu1 %728  ;;  %v3727_v9 = vpop.permute.xlu0 %378 }
  0xba   :  { %5625 = vst [vmem:[#allocation34_spill] sm:$0xff] %v3725_v8  ;;  %5626 = vst [vmem:[#allocation35_spill] sm:$0xff] %v3727_v9 }
  0xbb   :  { %767 = vbcast.lane.b32.xlu1 %v3564_v21, 296  ;;  %467 = vbcast.lane.b32.xlu0 %v3619_v32, 280 }
  0xbd   :  { %v3732_v10 = vpop.permute.xlu1 %778  ;;  %v3734_v11 = vpop.permute.xlu0 %774 }
  0xbe   :  { %5627 = vst [vmem:[#allocation36_spill] sm:$0xff] %v3732_v10  ;;  %5628 = vst [vmem:[#allocation37_spill] sm:$0xff] %v3734_v11 }
  0xbf   :  { %867 = vbcast.lane.b32.xlu1 %v853_v33, 280  ;;  %817 = vbcast.lane.b32.xlu0 %v3594_v27, 288 }
  0xc1   :  { %v3736_v12 = vpop.permute.xlu1 %305  ;;  %v3738_v13 = vpop.permute.xlu0 %278 }
  0xc2   :  { %5629 = vst [vmem:[#allocation38_spill] sm:$0xff] %v3736_v12  ;;  %5630 = vst [vmem:[#allocation39_spill] sm:$0xff] %v3738_v13 }
  0xc3   :  { %444 = vbcast.lane.b32.xlu1 %v3602_v29, 288  ;;  %394 = vbcast.lane.b32.xlu0 %v3570_v23, 296 }
  0xc5   :  { %v3740_v14 = vpop.permute.xlu1 %401  ;;  %v3742_v15 = vpop.permute.xlu0 %355 }
  0xc6   :  { %5631 = vst [vmem:[#allocation40_spill] sm:$0xff] %v3740_v14  ;;  %5632 = vst [vmem:[#allocation41_spill] sm:$0xff] %v3742_v15 }
  0xc7   :  { %844 = vbcast.lane.b32.xlu1 %v3609_v30, 288  ;;  %794 = vbcast.lane.b32.xlu0 %v3577_v24, 296 }
  0xc9   :  { %v3744_v17 = vpop.permute.xlu1 %678  ;;  %v3746_v18 = vpop.permute.xlu0 %405 }
  0xca   :  { %5633 = vst [vmem:[#allocation42_spill] sm:$0xff] %v3744_v17  ;;  %5634 = vst [vmem:[#allocation43_spill] sm:$0xff] %v3746_v18 }
  0xcb   :  { %471 = vbcast.lane.b32.xlu1 %v3619_v32, 288  ;;  %421 = vbcast.lane.b32.xlu0 %v3585_v26, 296 }
  0xcd   :  { %v3748_v20 = vpop.permute.xlu1 %755  ;;  %v3750_v21 = vpop.permute.xlu0 %705 }
  0xce   :  { %5635 = vst [vmem:[#allocation44_spill] sm:$0xff] %v3748_v20  ;;  %5636 = vst [vmem:[#allocation45_spill] sm:$0xff] %v3750_v21  ;;  %v58_v21 = vld [vmem:[%s5423_s2 + $0x8] sm:$0xff] }
  0xcf   :  { %871 = vbcast.lane.b32.xlu1 %v853_v33, 288  ;;  %821 = vbcast.lane.b32.xlu0 %v3594_v27, 296 }
  0xd1   :  { %v3752_v22 = vpop.permute.xlu1 %805  ;;  %v3754_v23 = vpop.permute.xlu0 %801 }
  0xd2   :  { %5637 = vst [vmem:[#allocation46_spill] sm:$0xff] %v3752_v22  ;;  %5638 = vst [vmem:[#allocation47_spill] sm:$0xff] %v3754_v23 }
  0xd3   :  { %848 = vbcast.lane.b32.xlu1 %v3609_v30, 296  ;;  %448 = vbcast.lane.b32.xlu0 %v3602_v29, 296 }
  0xd5   :  { %v3756_v24 = vpop.permute.xlu1 %382  ;;  %v3758_v25 = vpop.permute.xlu0 %332 }
  0xd6   :  { %5639 = vst [vmem:[#allocation48_spill] sm:$0xff] %v3756_v24  ;;  %5640 = vst [vmem:[#allocation49_spill] sm:$0xff] %v3758_v25 }
  0xd7   :  { %875 = vbcast.lane.b32.xlu1 %v853_v33, 296  ;;  %475 = vbcast.lane.b32.xlu0 %v3619_v32, 296 }
  0xd9   :  { %v3760_v26 = vpop.permute.xlu1 %432  ;;  %v3762_v27 = vpop.permute.xlu0 %428 }
  0xda   :  { %5641 = vst [vmem:[#allocation50_spill] sm:$0xff] %v3760_v26  ;;  %5642 = vst [vmem:[#allocation51_spill] sm:$0xff] %v3762_v27 }
  0xdd   :  { %v3764_v28 = vpop.permute.xlu1 %782  ;;  %v3766_v29 = vpop.permute.xlu0 %732 }
  0xde   :  { %5643 = vst [vmem:[#allocation52_spill] sm:$0xff] %v3764_v28  ;;  %5644 = vst [vmem:[#allocation53_spill] sm:$0xff] %v3766_v29 }
  0xe1   :  { %v3768_v30 = vpop.permute.xlu1 %832  ;;  %v3770_v31 = vpop.permute.xlu0 %828 }
  0xe2   :  { %5645 = vst [vmem:[#allocation54_spill] sm:$0xff] %v3768_v30  ;;  %5646 = vst [vmem:[#allocation55_spill] sm:$0xff] %v3770_v31 }
  0xe5   :  { %v3772_v32 = vpop.permute.xlu1 %309  ;;  %v3774_v33 = vpop.permute.xlu0 %282 }
  0xe6   :  { %5647 = vst [vmem:[#allocation56_spill] sm:$0xff] %v3772_v32  ;;  %5648 = vst [vmem:[#allocation57_spill] sm:$0xff] %v3774_v33 }
  0xf0   :  { %v118_v49 = vpop.f32.mrb[0].mxu0  ;;  %v171_v52 = vpop.f32.mrb[0].mxu1 }
  0xf1   :  { %v3127_v51 = vpop.f32.mrb[1].mxu0  ;;  %v3135_v54 = vpop.f32.mrb[1].mxu1 }
  0xf2   :  { %v121_v53 = vpop.f32.mrb[2].mxu0  ;;  %v174_v57 = vpop.f32.mrb[2].mxu1 }
  0xf3   :  { %v178_v55 = vpack.c.bf16 %v121_v53, %v118_v49  ;;  %v3128_v56 = vpop.f32.mrb[3].mxu0  ;;  %v179_v58 = vpack.c.bf16 %v174_v57, %v171_v52  ;;  %v3136_v59 = vpop.f32.mrb[3].mxu1 }
  0xf4   :  { %v3776_v49 = vpop.permute.xlu1 %409  ;;  %v3778_v51 = vpop.permute.xlu0 %359 }
  0xf5   :  { %3138 = vmatpush3.bf16.msra.mxu0 %v178_v55  ;;  %5649 = vst [vmem:[#allocation58_spill] sm:$0xff] %v3776_v49  ;;  %5650 = vst [vmem:[#allocation59_spill] sm:$0xff] %v3778_v51 }
  0xf6   :  { %3139 = vmatprep.subr.bf16.mxu0 %v5428_v1 }
  0xf8   :  { %v3780_v52 = vpop.permute.xlu1 %459  ;;  %v3782_v53 = vpop.permute.xlu0 %455 }
  0xf9   :  { %3140 = vmatpush3.bf16.msra.mxu0 %v179_v58  ;;  %5651 = vst [vmem:[#allocation60_spill] sm:$0xff] %v3780_v52  ;;  %5652 = vst [vmem:[#allocation61_spill] sm:$0xff] %v3782_v53 }
  0xfa   :  { %3185 = vmatprep.subr.bf16.mxu0 %v5428_v1 }
  0xfc   :  { %3142 = vmatmul.mubr.msk.bf16.vlgmr.msra.gmra.mrb[4].mxu0 %vm80_vm1, %v3237_v62  ;;  %v3784_v54 = vpop.permute.xlu1 %709  ;;  %v3786_v55 = vpop.permute.xlu0 %682 }
  0xfd   :  { %3145 = vmatprep.mubr.msk.bf16.mxu0 %vm3411_vm0, %v5428_v1  ;;  %5653 = vst [vmem:[#allocation62_spill] sm:$0xff] %v3784_v54  ;;  %5654 = vst [vmem:[#allocation63_spill] sm:$0xff] %v3786_v55 }
 0x100   :  { %v3788_v56 = vpop.permute.xlu1 %809  ;;  %v3790_v57 = vpop.permute.xlu0 %759 }
 0x101   :  { %5655 = vst [vmem:[#allocation64_spill] sm:$0xff] %v3788_v56  ;;  %5656 = vst [vmem:[#allocation65_spill] sm:$0xff] %v3790_v57 }
 0x104   :  { %3146 = vmatmul.mubr.msk.bf16.gmra.mrb[8].mxu0 %vm80_vm1, %v3238_v2  ;;  %v3792_v58 = vpop.permute.xlu1 %859  ;;  %v3794_v59 = vpop.permute.xlu0 %855 }
 0x105   :  { %3149 = vmatprep.mubr.msk.bf16.mxu0 %vm3411_vm0, %v5428_v1  ;;  %5657 = vst [vmem:[#allocation66_spill] sm:$0xff] %v3792_v58  ;;  %5658 = vst [vmem:[#allocation67_spill] sm:$0xff] %v3794_v59 }
 0x108   :  { %v3796_v62 = vpop.permute.xlu1 %386  ;;  %v3798_v2 = vpop.permute.xlu0 %336 }
 0x109   :  { %5659 = vst [vmem:[#allocation68_spill] sm:$0xff] %v3796_v62  ;;  %5660 = vst [vmem:[#allocation69_spill] sm:$0xff] %v3798_v2 }
 0x10c   :  { %3150 = vmatmul.mubr.msk.bf16.gmra.mrb[12].mxu0 %vm80_vm1, %v3239_v6  ;;  %v3240_v6 = vld [vmem:[%s5421_s0 + $0x40] sm:$0xff]   ;;  %v3805_v19 = vpop.permute.xlu0 %436 }
 0x10d   :  { %3189 = vmatprep.mubr.msk.bf16.mxu0 %vm3411_vm0, %v5428_v1  ;;  %v3803_v1 = vpop.permute.xlu1 %736  ;;  %5662 = vst [vmem:[#allocation71_spill] sm:$0xff] %v3805_v19  ;;  %3154 = vmatpush3.bf16.msra.mxu1 %v3240_v6 }
 0x10e   :  { %5661 = vst [vmem:[#allocation70_spill] sm:$0xff] %v3803_v1  ;;  %3155 = vmatprep.subr.bf16.mxu1 %v5663_v5 }
 0x110   :  { %v3814_v30 = vpop.permute.xlu0 %786 }
 0x111   :  { %3156 = vmatpush3.bf16.msra.mxu1 %v3241_v16  ;;  %v3811_v7 = vpop.permute.xlu1 %836  ;;  %5665 = vst [vmem:[#allocation73_spill] sm:$0xff] %v3814_v30 }
 0x112   :  { %5664 = vst [vmem:[#allocation72_spill] sm:$0xff] %v3811_v7  ;;  %3161 = vmatprep.subr.bf16.mxu1 %v5663_v5 }
 0x114   :  { %v3818_v56 = vpop.permute.xlu0 %286 }
 0x115   :  { %v3816_v31 = vpop.permute.xlu1 %313  ;;  %5667 = vst [vmem:[#allocation75_spill] sm:$0xff] %v3818_v56 }
 0x116   :  { %5666 = vst [vmem:[#allocation74_spill] sm:$0xff] %v3816_v31 }
 0x118   :  { %v3822_v6 = vpop.permute.xlu0 %363 }
 0x119   :  { %v3820_v22 = vpop.permute.xlu1 %413  ;;  %5669 = vst [vmem:[#allocation77_spill] sm:$0xff] %v3822_v6 }
 0x11a   :  { %5668 = vst [vmem:[#allocation76_spill] sm:$0xff] %v3820_v22 }
 0x11c   :  { %v3826_v28 = vpop.permute.xlu0 %463 }
 0x11d   :  { %v3824_v23 = vpop.permute.xlu1 %686  ;;  %5671 = vst [vmem:[#allocation79_spill] sm:$0xff] %v3826_v28 }
 0x11e   :  { %5670 = vst [vmem:[#allocation78_spill] sm:$0xff] %v3824_v23 }
 0x120   :  { %v3830_v16 = vpop.permute.xlu0 %713 }
 0x121   :  { %v3828_v10 = vpop.permute.xlu1 %763  ;;  %5673 = vst [vmem:[#allocation81_spill] sm:$0xff] %v3830_v16 }
 0x122   :  { %5672 = vst [vmem:[#allocation80_spill] sm:$0xff] %v3828_v10 }
 0x124   :  { %v3834_v5 = vpop.permute.xlu0 %813 }
 0x125   :  { %v3832_v7 = vpop.permute.xlu1 %863  ;;  %5675 = vst [vmem:[#allocation83_spill] sm:$0xff] %v3834_v5 }
 0x126   :  { %5674 = vst [vmem:[#allocation82_spill] sm:$0xff] %v3832_v7 }
 0x128   :  { %v3838_v11 = vpop.permute.xlu0 %340 }
 0x129   :  { %v3836_v30 = vpop.permute.xlu1 %390  ;;  %5677 = vst [vmem:[#allocation85_spill] sm:$0xff] %v3838_v11 }
 0x12a   :  { %5676 = vst [vmem:[#allocation84_spill] sm:$0xff] %v3836_v30 }
 0x12c   :  { %v3842_v20 = vpop.permute.xlu0 %440 }
 0x12d   :  { %v3840_v57 = vpop.permute.xlu1 %740  ;;  %5679 = vst [vmem:[#allocation87_spill] sm:$0xff] %v3842_v20 }
 0x12e   :  { %5678 = vst [vmem:[#allocation86_spill] sm:$0xff] %v3840_v57 }
 0x130   :  { %v3846_v0 = vpop.permute.xlu0 %790 }
 0x131   :  { %v3844_v63 = vpop.permute.xlu1 %840  ;;  %5681 = vst [vmem:[#allocation89_spill] sm:$0xff] %v3846_v0  ;;  %v57_v0 = vld [vmem:[%s5423_s2] sm:$0xff] }
 0x132   :  { %5680 = vst [vmem:[#allocation88_spill] sm:$0xff] %v3844_v63 }
 0x134   :  { %v3850_v10 = vpop.permute.xlu0 %367 }
 0x135   :  { %v3848_v1 = vpop.permute.xlu1 %417  ;;  %5683 = vst [vmem:[#allocation91_spill] sm:$0xff] %v3850_v10 }
 0x136   :  { %5682 = vst [vmem:[#allocation90_spill] sm:$0xff] %v3848_v1 }
 0x138   :  { %v3854_v8 = vpop.permute.xlu0 %467 }
 0x139   :  { %v3852_v29 = vpop.permute.xlu1 %767  ;;  %5685 = vst [vmem:[#allocation93_spill] sm:$0xff] %v3854_v8 }
 0x13a   :  { %5684 = vst [vmem:[#allocation92_spill] sm:$0xff] %v3852_v29 }
 0x13c   :  { %v3858_v44 = vpop.permute.xlu0 %817 }
 0x13d   :  { %v3856_v5 = vpop.permute.xlu1 %867  ;;  %5687 = vst [vmem:[#allocation95_spill] sm:$0xff] %v3858_v44 }
 0x13e   :  { %5686 = vst [vmem:[#allocation94_spill] sm:$0xff] %v3856_v5 }
 0x140   :  { %v3862_v57 = vpop.permute.xlu0 %394 }
 0x141   :  { %v3860_v45 = vpop.permute.xlu1 %444  ;;  %5689 = vst [vmem:[#allocation97_spill] sm:$0xff] %v3862_v57 }
 0x142   :  { %5688 = vst [vmem:[#allocation96_spill] sm:$0xff] %v3860_v45 }
 0x144   :  { %v3866_v63 = vpop.permute.xlu0 %794 }
 0x145   :  { %v3864_v16 = vpop.permute.xlu1 %844  ;;  %5691 = vst [vmem:[#allocation99_spill] sm:$0xff] %v3866_v63 }
 0x146   :  { %5690 = vst [vmem:[#allocation98_spill] sm:$0xff] %v3864_v16 }
 0x148   :  { %v3876_v44 = vpop.permute.xlu0 %421 }
 0x149   :  { %v3871_v54 = vpop.permute.xlu1 %471  ;;  %5693 = vst [vmem:[#allocation101_spill] sm:$0xff] %v3876_v44 }
 0x14a   :  { %5692 = vst [vmem:[#allocation100_spill] sm:$0xff] %v3871_v54 }
 0x14d   :  { %v3886_v17 = vpop.permute.xlu1 %871 }
 0x14e   :  { %5694 = vst [vmem:[#allocation102_spill] sm:$0xff] %v3886_v17 }
 0x1cf   :  { %v238_v29 = vpop.f32.mrb[4].mxu0 }
 0x1d0   :  { %v3878_v60 = vadd.f32 %v238_v29, %v57_v0  ;;  %v3143_v40 = vpop.f32.mrb[5].mxu0 }
 0x1d1   :  { %v241_v41 = vpop.f32.mrb[6].mxu0 }
 0x1d2   :  { %v3880_v16 = vadd.f32 %v241_v41, %v58_v21  ;;  %v3144_v63 = vpop.f32.mrb[7].mxu0  ;;  %v919_v23 = vadd.f32 %v3794_v59, %v3878_v60  ;;  %v519_v55 = vadd.f32 %v3782_v53, %v3878_v60  ;;  %v477_v40 = vadd.f32 %v3647_v35, %v3878_v60  ;;  %v59_v41 = vld [vmem:[%s5423_s2 + $0x10] sm:$0xff] }
 0x1d3   :  { %v3897_v63 = vpop.permute.xlu0 %821  ;;  %v483_v29 = vadd.f32 %v3643_v34, %v3878_v60  ;;  %v3907_v59 = vadd.f32 %v3693_v50, %v3878_v60  ;;  %v3920_v50 = vadd.f32 %v3715_v3, %v3878_v60 }
 0x1d4   :  { %v920_v61 = vadd.f32 %v3792_v58, %v3880_v16  ;;  %v520_v0 = vadd.f32 %v3780_v52, %v3880_v16  ;;  %5695 = vst [vmem:[#allocation103_spill] sm:$0xff] %v3897_v63  ;;  %v478_v21 = vadd.f32 %v3653_v37, %v3880_v16  ;;  %v489_v58 = vadd.f32 %v3674_v43, %v3878_v60  ;;  %v60_v37 = vld [vmem:[%s5423_s2 + $0x18] sm:$0xff] }
 0x1d5   :  { %v1044_v52 = vsel %vm80_vm1, %v919_v23, -inf  ;;  %v644_v35 = vsel %vm80_vm1, %v519_v55, -inf  ;;  %v484_v43 = vadd.f32 %v3651_v36, %v3880_v16  ;;  %v3926_v55 = vadd.f32 %v3670_v42, %v3880_v16 }
 0x1d6   :  { %v1045_v53 = vsel %vm80_vm1, %v920_v61, -inf  ;;  %v645_v63 = vsel %vm80_vm1, %v520_v0, -inf  ;;  %v3929_v0 = vsel %vm80_vm1, %v477_v40, -inf  ;;  %v3964_v40 = vadd.f32 %v3762_v27, %v3878_v60 }
 0x1d7   :  { %v246_v38 = vpop.f32.mrb[8].mxu0  ;;  %v1046_v34 = vmax.f32 %v1044_v52, %v1045_v53  ;;  %v646_v39 = vmax.f32 %v644_v35, %v645_v63  ;;  %v3932_v52 = vsel %vm80_vm1, %v478_v21, -inf  ;;  %v3936_v53 = vadd.f32 %v3691_v48, %v3880_v16 }
 0x1d8   :  { %v3922_v23 = vadd.f32 %v246_v38, %v59_v41  ;;  %v3147_v61 = vpop.f32.mrb[9].mxu0  ;;  %v3940_v38 = vadd.f32 %v3727_v9, %v3880_v16  ;;  %v3944_v41 = vadd.f32 %v3740_v14, %v3878_v60  ;;  %v3958_v9 = vadd.f32 %v3746_v18, %v3880_v16  ;;  %v3960_v14 = vpop.permute.xlu0 %448 }
 0x1d9   :  { %v249_v35 = vpop.f32.mrb[10].mxu0  ;;  %v3950_v61 = vpop.permute.xlu1 %848  ;;  %5697 = vst [vmem:[#allocation105_spill] sm:$0xff] %v3960_v14  ;;  %v3988_v36 = vsel %vm80_vm1, %v489_v58, -inf }
 0x1da   :  { %v3948_v63 = vadd.f32 %v249_v35, %v60_v37  ;;  %v3148_v21 = vpop.f32.mrb[11].mxu0  ;;  %5696 = vst [vmem:[#allocation104_spill] sm:$0xff] %v3950_v61  ;;  %v921_v3 = vadd.f32 %v3832_v7, %v3922_v23  ;;  %v521_v48 = vadd.f32 %v3826_v28, %v3922_v23  ;;  %v3968_v37 = vadd.f32 %v3760_v26, %v3880_v16  ;;  %v61_v26 = vld [vmem:[%s5423_s2 + $0x20] sm:$0xff] }
 0x1db   :  { %v3971_v35 = vsel %vm80_vm1, %v483_v29, -inf  ;;  %v3974_v21 = vsel %vm80_vm1, %v484_v43, -inf  ;;  %v479_v43 = vadd.f32 %v3687_v47, %v3922_v23 }
 0x1dc   :  { %v922_v7 = vadd.f32 %v3856_v5, %v3948_v63  ;;  %v1047_v28 = vsel %vm80_vm1, %v921_v3, -inf  ;;  %v522_v18 = vadd.f32 %v3854_v8, %v3948_v63  ;;  %v647_v27 = vsel %vm80_vm1, %v521_v48, -inf }
 0x1dd   :  { %v1048_v42 = vmax.f32 %v1046_v34, %v1047_v28  ;;  %v648_v29 = vmax.f32 %v646_v39, %v647_v27  ;;  %v485_v8 = vadd.f32 %v3684_v46, %v3922_v23  ;;  %v3996_v48 = vadd.f32 %v3717_v4, %v3922_v23  ;;  %v62_v34 = vld [vmem:[%s5423_s2 + $0x28] sm:$0xff]  ;;  %v4009_v46 = vpop.permute.xlu1 %875 }
 0x1de   :  { %v1049_v5 = vsel %vm80_vm1, %v922_v7, -inf  ;;  %v649_v3 = vsel %vm80_vm1, %v522_v18, -inf  ;;  %v480_v28 = vadd.f32 %v3738_v13, %v3948_v63  ;;  %v4005_v7 = vadd.f32 %v3742_v15, %v3922_v23  ;;  %5698 = vst [vmem:[#allocation106_spill] sm:$0xff] %v4009_v46 }
 0x1df   :  { %v254_v61 = vpop.f32.mrb[12].mxu0  ;;  %v1050_v39 = vmax.f32 %v1048_v42, %v1049_v5  ;;  %v650_v27 = vmax.f32 %v648_v29, %v649_v3  ;;  %v486_v4 = vadd.f32 %v3736_v12, %v3948_v63  ;;  %v492_v47 = vadd.f32 %v3758_v25, %v3948_v63  ;;  %v4019_v29 = vpop.permute.xlu0 %475 }
 0x1e0   :  { %v4007_v18 = vadd.f32 %v254_v61, %v61_v26  ;;  %v3151_v58 = vpop.f32.mrb[13].mxu0  ;;  %v4017_v5 = vadd.f32 %v3756_v24, %v3922_v23  ;;  %5699 = vst [vmem:[#allocation107_spill] sm:$0xff] %v4019_v29  ;;  %v4023_v26 = vadd.f32 %v3778_v51, %v3948_v63  ;;  %v4027_v61 = vadd.f32 %v3796_v62, %v3948_v63 }
 0x1e1   :  { %v257_v42 = vpop.f32.mrb[14].mxu0  ;;  %v4031_v3 = vadd.f32 %v3776_v49, %v3922_v23  ;;  %v544_v58 = vmax.f32 %v3971_v35, %v3974_v21  ;;  %v4043_v62 = vadd.f32 %v3820_v22, %v3948_v63  ;;  %v4047_v49 = vadd.f32 %v3805_v19, %v3922_v23 }
 0x1e2   :  { %v4035_v24 = vadd.f32 %v257_v42, %v62_v34  ;;  %v3152_v25 = vpop.f32.mrb[15].mxu0  ;;  %v923_v15 = vadd.f32 %v3886_v17, %v4007_v18  ;;  %v523_v51 = vadd.f32 %v3871_v54, %v4007_v18  ;;  %v4051_v35 = vadd.f32 %v3842_v20, %v3948_v63 }
 0x1e3   :  { %v528_v25 = vsel %vm80_vm1, %v479_v43, -inf  ;;  %v530_v21 = vsel %vm80_vm1, %v480_v28, -inf  ;;  %v481_v20 = vadd.f32 %v3774_v33, %v4007_v18  ;;  %v545_v12 = vsel %vm80_vm1, %v485_v8, -inf }
 0x1e4   :  { %v924_v34 = vadd.f32 %v4009_v46, %v4035_v24  ;;  %v1051_v42 = vsel %vm80_vm1, %v923_v15, -inf  ;;  %v524_v17 = vadd.f32 %v4019_v29, %v4035_v24  ;;  %v651_v54 = vsel %vm80_vm1, %v523_v51, -inf }
 0x1e5   :  { %v1052_v22 = vmax.f32 %v1050_v39, %v1051_v42  ;;  %v652_v19 = vmax.f32 %v650_v27, %v651_v54  ;;  %v487_v46 = vadd.f32 %v3772_v32, %v4007_v18  ;;  %v493_v15 = vadd.f32 %v3798_v2, %v4007_v18 }
 0x1e6   :  { %v1053_v43 = vsel %vm80_vm1, %v924_v34, -inf  ;;  %v653_v28 = vsel %vm80_vm1, %v524_v17, -inf  ;;  %v482_v51 = vadd.f32 %v3818_v56, %v4035_v24  ;;  %v499_v54 = vadd.f32 %v3822_v6, %v4007_v18 }
 0x1e7   :  { %v1054_v29 = vmax.f32 %v1052_v22, %v1053_v43  ;;  %v654_v13 = vmax.f32 %v652_v19, %v653_v28  ;;  %v488_v8 = vadd.f32 %v3816_v31, %v4035_v24  ;;  %v494_v17 = vadd.f32 %v3838_v11, %v4035_v24 }
 0x1e8   :  { %v505_v39 = vadd.f32 %v3836_v30, %v4007_v18  ;;  %v5700_v27 = vmax.f32 %v3929_v0, %v3932_v52  ;;  %v500_v34 = vadd.f32 %v3850_v10, %v4035_v24  ;;  %v506_v42 = vadd.f32 %v3862_v57, %v4035_v24 }
 0x1e9   :  { %v655_v19 = vrot.slane %v654_v13, 4  ;;  %v532_v43 = vsel %vm80_vm1, %v481_v20, -inf  ;;  %v4090_v28 = vadd.f32 %v3848_v1, %v4007_v18  ;;  %v546_v11 = vmax.f32 %v544_v58, %v545_v12 }
 0x1ea   :  { %v529_v22 = vmax.f32 %v5700_v27, %v528_v25  ;;  %v547_v30 = vsel %vm80_vm1, %v486_v4, -inf  ;;  %v534_v0 = vsel %vm80_vm1, %v482_v51, -inf  ;;  %v549_v52 = vsel %vm80_vm1, %v487_v46, -inf }
 0x1eb   :  { %v656_v31 = vmax.f32 %v654_v13, %v655_v19  ;;  %v560_v25 = vsel %vm80_vm1, %v3926_v55, -inf  ;;  %v548_v57 = vmax.f32 %v546_v11, %v547_v30  ;;  %v562_v1 = vsel %vm80_vm1, %v3996_v48, -inf }
 0x1ec   :  { %v531_v6 = vmax.f32 %v529_v22, %v530_v21  ;;  %v561_v20 = vmax.f32 %v3988_v36, %v560_v25  ;;  %v512_v12 = vadd.f32 %v3876_v44, %v4035_v24  ;;  %v551_v4 = vsel %vm80_vm1, %v488_v8, -inf  ;;  %v5738_v44 = vld [vmem:[#allocation54_spill] sm:$0xff] }
 0x1ed   :  { %v657_v10 = vrot.slane %v656_v31, 2  ;;  %v564_v13 = vsel %vm80_vm1, %v492_v47, -inf  ;;  %v1055_v58 = vrot.slane %v1054_v29, 4  ;;  %v550_v21 = vmax.f32 %v548_v57, %v549_v52 }
 0x1ee   :  { %v533_v27 = vmax.f32 %v531_v6, %v532_v43  ;;  %v563_v51 = vmax.f32 %v561_v20, %v562_v1  ;;  %v566_v11 = vsel %vm80_vm1, %v493_v15, -inf  ;;  %v576_v36 = vsel %vm80_vm1, %v3907_v59, -inf }
 0x1ef   :  { %v4104_v55 = vmax.f32 %v656_v31, %v657_v10  ;;  %v577_v30 = vsel %vm80_vm1, %v3936_v53, -inf  ;;  %v552_v48 = vmax.f32 %v550_v21, %v551_v4  ;;  %v517_v47 = vadd.f32 %v3860_v45, %v4007_v18 }
 0x1f0   :  { %v535_v46 = vmax.f32 %v533_v27, %v534_v0  ;;  %v565_v22 = vmax.f32 %v563_v51, %v564_v13  ;;  %v578_v8 = vmax.f32 %v576_v36, %v577_v30  ;;  %v568_v57 = vsel %vm80_vm1, %v494_v17, -inf }
 0x1f1   :  { %v579_v1 = vsel %vm80_vm1, %v4005_v7, -inf  ;;  %v581_v10 = vsel %vm80_vm1, %v4023_v26, -inf  ;;  %v553_v59 = vrot.slane %v552_v48, 4  ;;  %v4118_v53 = vmax.f32 %v1054_v29, %v1055_v58 }
 0x1f2   :  { %v536_v6 = vrot.slane %v535_v46, 4  ;;  %v567_v15 = vmax.f32 %v565_v22, %v566_v11  ;;  %v580_v19 = vmax.f32 %v578_v8, %v579_v1  ;;  %v518_v0 = vadd.f32 %v3960_v14, %v4035_v24  ;;  %v5735_v14 = vld [vmem:[#allocation95_spill] sm:$0xff] }
 0x1f3   :  { %v583_v52 = vsel %vm80_vm1, %v499_v54, -inf  ;;  %v554_v25 = vmax.f32 %v552_v48, %v553_v59  ;;  %v585_v20 = vsel %vm80_vm1, %v500_v34, -inf  ;;  %v593_v26 = vsel %vm80_vm1, %v3920_v50, -inf }
 0x1f4   :  { %v537_v31 = vmax.f32 %v535_v46, %v536_v6  ;;  %v569_v27 = vmax.f32 %v567_v15, %v568_v57  ;;  %v582_v7 = vmax.f32 %v580_v19, %v581_v10  ;;  %v594_v29 = vsel %vm80_vm1, %v3940_v38, -inf }
 0x1f5   :  { %v596_v4 = vsel %vm80_vm1, %v4017_v5, -inf  ;;  %v555_v58 = vrot.slane %v554_v25, 2  ;;  %v595_v54 = vmax.f32 %v593_v26, %v594_v29  ;;  %v598_v51 = vsel %vm80_vm1, %v4027_v61, -inf }
 0x1f6   :  { %v538_v17 = vrot.slane %v537_v31, 2  ;;  %v570_v46 = vrot.slane %v569_v27, 4  ;;  %v584_v21 = vmax.f32 %v582_v7, %v583_v52  ;;  %v600_v11 = vsel %vm80_vm1, %v505_v39, -inf }
 0x1f7   :  { %v602_v34 = vsel %vm80_vm1, %v506_v42, -inf  ;;  %v556_v50 = vmax.f32 %v554_v25, %v555_v58  ;;  %v597_v38 = vmax.f32 %v595_v54, %v596_v4  ;;  %v610_v5 = vsel %vm80_vm1, %v3944_v41, -inf  ;;  %v5701_v58 = vld [vmem:[#allocation17_spill] sm:$0xff] }
 0x1f8   :  { %v539_v13 = vmax.f32 %v537_v31, %v538_v17  ;;  %v571_v30 = vmax.f32 %v569_v27, %v570_v46  ;;  %v586_v6 = vmax.f32 %v584_v21, %v585_v20  ;;  %v611_v48 = vsel %vm80_vm1, %v3958_v9, -inf  ;;  %v5702_v21 = vld [vmem:[#allocation16_spill] sm:$0xff] }
 0x1f9   :  { %v613_v22 = vsel %vm80_vm1, %v4031_v3, -inf  ;;  %v557_v8 = vrot.slane %v556_v50, 1  ;;  %v615_v39 = vsel %vm80_vm1, %v4043_v62, -inf  ;;  %v599_v1 = vmax.f32 %v597_v38, %v598_v51  ;;  %v5706_v38 = vld [vmem:[#allocation78_spill] sm:$0xff] }
 0x1fa   :  { %v540_v36 = vrot.slane %v539_v13, 1  ;;  %v572_v61 = vrot.slane %v571_v30, 2  ;;  %v587_v57 = vrot.slane %v586_v6, 4  ;;  %v612_v10 = vmax.f32 %v610_v5, %v611_v48 }
 0x1fb   :  { %v617_v31 = vsel %vm80_vm1, %v4090_v28, -inf  ;;  %v619_v9 = vsel %vm80_vm1, %v512_v12, -inf  ;;  %v627_v3 = vsel %vm80_vm1, %v3964_v40, -inf  ;;  %v601_v15 = vmax.f32 %v599_v1, %v600_v11 }
 0x1fc   :  { %v4143_v42 = vmax.f32 %v539_v13, %v540_v36  ;;  %v573_v41 = vmax.f32 %v571_v30, %v572_v61  ;;  %v588_v59 = vmax.f32 %v586_v6, %v587_v57  ;;  %v614_v19 = vmax.f32 %v612_v10, %v613_v22  ;;  %v5705_v30 = vld [vmem:[#allocation63_spill] sm:$0xff]  ;;  %v5708_v57 = vld [vmem:[#allocation18_spill] sm:$0xff] }
 0x1fd   :  { %v628_v52 = vsel %vm80_vm1, %v3968_v37, -inf  ;;  %v630_v62 = vsel %vm80_vm1, %v4047_v49, -inf  ;;  %v4154_v17 = vmax.f32 %v556_v50, %v557_v8  ;;  %v603_v7 = vmax.f32 %v601_v15, %v602_v34  ;;  %v5704_v34 = vld [vmem:[#allocation42_spill] sm:$0xff]  ;;  %v5707_v8 = vld [vmem:[#allocation19_spill] sm:$0xff] }
 0x1fe   :  { %v574_v25 = vrot.slane %v573_v41, 1  ;;  %v589_v27 = vrot.slane %v588_v59, 2  ;;  %v629_v28 = vmax.f32 %v627_v3, %v628_v52  ;;  %v616_v20 = vmax.f32 %v614_v19, %v615_v39  ;;  %v5711_v15 = vld [vmem:[#allocation62_spill] sm:$0xff]  ;;  %v5712_v52 = vld [vmem:[#allocation81_spill] sm:$0xff] }
 0x1ff   :  { %v632_v12 = vsel %vm80_vm1, %v4051_v35, -inf  ;;  %v634_v40 = vsel %vm80_vm1, %v517_v47, -inf  ;;  %v636_v37 = vsel %vm80_vm1, %v518_v0, -inf  ;;  %v604_v13 = vrot.slane %v603_v7, 4  ;;  %v5703_v47 = vld [vmem:[#allocation29_spill] sm:$0xff] }
 0x200   :  { %v4159_v26 = vmax.f32 %v573_v41, %v574_v25  ;;  %v590_v29 = vmax.f32 %v588_v59, %v589_v27  ;;  %v631_v4 = vmax.f32 %v629_v28, %v630_v62  ;;  %v618_v49 = vmax.f32 %v616_v20, %v617_v31  ;;  %v5709_v31 = vld [vmem:[#allocation28_spill] sm:$0xff]  ;;  %v5710_v59 = vld [vmem:[#allocation45_spill] sm:$0xff]  ;;  %v5713_v25 = vld [vmem:[#allocation23_spill] sm:$0xff] }
 0x201   :  { %v4164_v46 = vadd.f32 %v5701_v58, %v3878_v60  ;;  %v4168_v54 = vadd.f32 %v5702_v21, %v3880_v16  ;;  %v879_v11 = vadd.f32 %v5703_v47, %v3922_v23  ;;  %v4174_v36 = vadd.f32 %v5704_v34, %v3948_v63  ;;  %v5714_v20 = vld [vmem:[#allocation22_spill] sm:$0xff] }
 0x202   :  { %v591_v51 = vrot.slane %v590_v29, 1  ;;  %v633_v35 = vmax.f32 %v631_v4, %v632_v12  ;;  %v605_v0 = vmax.f32 %v603_v7, %v604_v13  ;;  %v620_v50 = vmax.f32 %v618_v49, %v619_v9  ;;  %v5717_v49 = vld [vmem:[#allocation70_spill] sm:$0xff] }
 0x203   :  { %v881_v6 = vadd.f32 %v5705_v30, %v4007_v18  ;;  %v882_v5 = vadd.f32 %v5706_v38, %v4035_v24  ;;  %v883_v61 = vadd.f32 %v5707_v8, %v3878_v60  ;;  %v884_v39 = vadd.f32 %v5708_v57, %v3880_v16  ;;  %v5724_v57 = vld [vmem:[#allocation92_spill] sm:$0xff] }
 0x204   :  { %v4180_v48 = vmax.f32 %v590_v29, %v591_v51  ;;  %v635_v22 = vmax.f32 %v633_v35, %v634_v40  ;;  %v606_v1 = vrot.slane %v605_v0, 2  ;;  %v621_v10 = vrot.slane %v620_v50, 4  ;;  %v5715_v40 = vld [vmem:[#allocation34_spill] sm:$0xff] }
 0x205   :  { %v885_v41 = vadd.f32 %v5709_v31, %v3922_v23  ;;  %v886_v9 = vadd.f32 %v5710_v59, %v3948_v63  ;;  %v887_v19 = vadd.f32 %v5711_v15, %v4007_v18  ;;  %v888_v62 = vadd.f32 %v5712_v52, %v4035_v24  ;;  %v5718_v35 = vld [vmem:[#allocation86_spill] sm:$0xff] }
 0x206   :  { %v637_v3 = vmax.f32 %v635_v22, %v636_v37  ;;  %v889_v27 = vadd.f32 %v5713_v25, %v3878_v60  ;;  %v607_v28 = vmax.f32 %v605_v0, %v606_v1  ;;  %v622_v7 = vmax.f32 %v620_v50, %v621_v10  ;;  %v5716_v37 = vld [vmem:[#allocation53_spill] sm:$0xff]  ;;  %v5719_v0 = vld [vmem:[#allocation31_spill] sm:$0xff]  ;;  %v5720_v1 = vld [vmem:[#allocation30_spill] sm:$0xff] }
 0x207   :  { %v890_v12 = vadd.f32 %v5714_v20, %v3880_v16  ;;  %v891_v29 = vadd.f32 %v5715_v40, %v3922_v23  ;;  %v892_v13 = vadd.f32 %v5716_v37, %v3948_v63  ;;  %v893_v51 = vadd.f32 %v5717_v49, %v4007_v18  ;;  %v5721_v40 = vld [vmem:[#allocation44_spill] sm:$0xff]  ;;  %v5722_v37 = vld [vmem:[#allocation65_spill] sm:$0xff] }
 0x208   :  { %v638_v4 = vrot.slane %v637_v3, 4  ;;  %v894_v22 = vadd.f32 %v5718_v35, %v4035_v24  ;;  %v608_v43 = vrot.slane %v607_v28, 1  ;;  %v623_v25 = vrot.slane %v622_v7, 2  ;;  %v5723_v49 = vld [vmem:[#allocation80_spill] sm:$0xff] }
 0x209   :  { %v895_v50 = vadd.f32 %v5719_v0, %v3878_v60  ;;  %v896_v10 = vadd.f32 %v5720_v1, %v3880_v16  ;;  %v897_v52 = vadd.f32 %v5721_v40, %v3922_v23  ;;  %v898_v15 = vadd.f32 %v5722_v37, %v3948_v63  ;;  %v5725_v0 = vld [vmem:[#allocation37_spill] sm:$0xff]  ;;  %v5727_v40 = vld [vmem:[#allocation52_spill] sm:$0xff] }
 0x20a   :  { %v639_v20 = vmax.f32 %v637_v3, %v638_v4  ;;  %v899_v59 = vadd.f32 %v5723_v49, %v4007_v18  ;;  %v4216_v31 = vmax.f32 %v607_v28, %v608_v43  ;;  %v624_v35 = vmax.f32 %v622_v7, %v623_v25  ;;  %v5726_v3 = vld [vmem:[#allocation36_spill] sm:$0xff]  ;;  %v5728_v37 = vld [vmem:[#allocation73_spill] sm:$0xff]  ;;  %v5730_v28 = vld [vmem:[#allocation99_spill] sm:$0xff] }
 0x20b   :  { %v900_v8 = vadd.f32 %v5724_v57, %v4035_v24  ;;  %v901_v38 = vadd.f32 %v5725_v0, %v3878_v60  ;;  %v902_v4 = vadd.f32 %v5726_v3, %v3880_v16  ;;  %v903_v30 = vadd.f32 %v5727_v40, %v3922_v23  ;;  %v5729_v43 = vld [vmem:[#allocation89_spill] sm:$0xff]  ;;  %v5731_v0 = vld [vmem:[#allocation47_spill] sm:$0xff]  ;;  %v5732_v40 = vld [vmem:[#allocation46_spill] sm:$0xff] }
 0x20c   :  { %v640_v1 = vrot.slane %v639_v20, 2  ;;  %v904_v34 = vadd.f32 %v5728_v37, %v3948_v63  ;;  %v625_v49 = vrot.slane %v624_v35, 1  ;;  %v4230_v25 = vadd.f32 %v5729_v43, %v4007_v18  ;;  %v5733_v37 = vld [vmem:[#allocation64_spill] sm:$0xff]  ;;  %v5734_v43 = vld [vmem:[#allocation83_spill] sm:$0xff] }
 0x20d   :  { %v4234_v7 = vadd.f32 %v5730_v28, %v4035_v24  ;;  %v4238_v57 = vadd.f32 %v5731_v0, %v3878_v60  ;;  %v4244_v47 = vadd.f32 %v5732_v40, %v3880_v16  ;;  %v4248_v21 = vadd.f32 %v5733_v37, %v3922_v23  ;;  %v5737_v40 = vld [vmem:[#allocation55_spill] sm:$0xff] }
 0x20e   :  { %v4240_v3 = vmax.f32 %v639_v20, %v640_v1  ;;  %v4252_v58 = vadd.f32 %v5734_v43, %v3948_v63  ;;  %v4254_v28 = vmax.f32 %v624_v35, %v625_v49  ;;  %v4258_v0 = vadd.f32 %v5735_v14, %v4007_v18  ;;  %v5736_v20 = vld [vmem:[#allocation103_spill] sm:$0xff]  ;;  %v5739_v49 = vld [vmem:[#allocation72_spill] sm:$0xff] }
 0x20f   :  { %v4262_v1 = vadd.f32 %v5736_v20, %v4035_v24  ;;  %v4266_v45 = vadd.f32 %v5737_v40, %v3878_v60  ;;  %v4271_v43 = vadd.f32 %v5738_v44, %v3880_v16  ;;  %v4275_v35 = vadd.f32 %v5739_v49, %v3922_v23  ;;  %v5740_v14 = vld [vmem:[#allocation88_spill] sm:$0xff]  ;;  %v5741_v20 = vld [vmem:[#allocation98_spill] sm:$0xff] }
 0x210   :  { %v4279_v56 = vadd.f32 %v5740_v14, %v3948_v63  ;;  %v4283_v2 = vadd.f32 %v5741_v20, %v4007_v18  ;;  %v925_v60 = vsel %vm80_vm1, %v4164_v46, -inf  ;;  %v926_v37 = vsel %vm80_vm1, %v4168_v54, -inf  ;;  %v5742_v44 = vld [vmem:[#allocation104_spill] sm:$0xff] }
 0x211   :  { %v928_v16 = vsel %vm80_vm1, %v879_v11, -inf  ;;  %v4292_v23 = vadd.f32 %v5742_v44, %v4035_v24  ;;  %v927_v49 = vmax.f32 %v925_v60, %v926_v37  ;;  %v930_v63 = vsel %vm80_vm1, %v4174_v36, -inf }
 0x212   :  { %v932_v14 = vsel %vm80_vm1, %v881_v6, -inf  ;;  %v934_v18 = vsel %vm80_vm1, %v882_v5, -inf  ;;  %v942_v20 = vsel %vm80_vm1, %v883_v61, -inf  ;;  %v943_v46 = vsel %vm80_vm1, %v884_v39, -inf }
 0x213   :  { %v945_v54 = vsel %vm80_vm1, %v885_v41, -inf  ;;  %v929_v40 = vmax.f32 %v927_v49, %v928_v16  ;;  %v944_v11 = vmax.f32 %v942_v20, %v943_v46  ;;  %v947_v32 = vsel %vm80_vm1, %v886_v9, -inf }
 0x214   :  { %v949_v24 = vsel %vm80_vm1, %v887_v19, -inf  ;;  %v951_v37 = vsel %vm80_vm1, %v888_v62, -inf  ;;  %v959_v36 = vsel %vm80_vm1, %v889_v27, -inf  ;;  %v960_v6 = vsel %vm80_vm1, %v890_v12, -inf }
 0x215   :  { %v962_v5 = vsel %vm80_vm1, %v891_v29, -inf  ;;  %v931_v60 = vmax.f32 %v929_v40, %v930_v63  ;;  %v946_v61 = vmax.f32 %v944_v11, %v945_v54  ;;  %v961_v44 = vmax.f32 %v959_v36, %v960_v6 }
 0x216   :  { %v964_v39 = vsel %vm80_vm1, %v892_v13, -inf  ;;  %v966_v41 = vsel %vm80_vm1, %v893_v51, -inf  ;;  %v968_v20 = vsel %vm80_vm1, %v894_v22, -inf  ;;  %v976_v9 = vsel %vm80_vm1, %v895_v50, -inf }
 0x217   :  { %v977_v19 = vsel %vm80_vm1, %v896_v10, -inf  ;;  %v933_v62 = vmax.f32 %v931_v60, %v932_v14  ;;  %v948_v49 = vmax.f32 %v946_v61, %v947_v32  ;;  %v963_v27 = vmax.f32 %v961_v44, %v962_v5 }
 0x218   :  { %v978_v16 = vmax.f32 %v976_v9, %v977_v19  ;;  %v979_v12 = vsel %vm80_vm1, %v897_v52, -inf  ;;  %v981_v40 = vsel %vm80_vm1, %v898_v15, -inf  ;;  %v983_v29 = vsel %vm80_vm1, %v899_v59, -inf }
 0x219   :  { %v985_v13 = vsel %vm80_vm1, %v900_v8, -inf  ;;  %v935_v63 = vmax.f32 %v933_v62, %v934_v18  ;;  %v950_v51 = vmax.f32 %v948_v49, %v949_v24  ;;  %v965_v46 = vmax.f32 %v963_v27, %v964_v39 }
 0x21a   :  { %v980_v22 = vmax.f32 %v978_v16, %v979_v12  ;;  %v993_v50 = vsel %vm80_vm1, %v901_v38, -inf  ;;  %v994_v10 = vsel %vm80_vm1, %v902_v4, -inf  ;;  %v996_v14 = vsel %vm80_vm1, %v903_v30, -inf }
 0x21b   :  { %v998_v44 = vsel %vm80_vm1, %v904_v34, -inf  ;;  %v936_v32 = vrot.slane %v935_v63, 4  ;;  %v952_v52 = vmax.f32 %v950_v51, %v951_v37  ;;  %v967_v54 = vmax.f32 %v965_v46, %v966_v41 }
 0x21c   :  { %v982_v15 = vmax.f32 %v980_v22, %v981_v40  ;;  %v995_v11 = vmax.f32 %v993_v50, %v994_v10  ;;  %v1000_v8 = vsel %vm80_vm1, %v4230_v25, -inf  ;;  %v1002_v59 = vsel %vm80_vm1, %v4234_v7, -inf }
 0x21d   :  { %v1010_v38 = vsel %vm80_vm1, %v4238_v57, -inf  ;;  %v937_v18 = vmax.f32 %v935_v63, %v936_v32  ;;  %v953_v4 = vrot.slane %v952_v52, 4  ;;  %v969_v24 = vmax.f32 %v967_v54, %v968_v20 }
 0x21e   :  { %v984_v30 = vmax.f32 %v982_v15, %v983_v29  ;;  %v997_v36 = vmax.f32 %v995_v11, %v996_v14  ;;  %v1011_v34 = vsel %vm80_vm1, %v4244_v47, -inf  ;;  %v1013_v37 = vsel %vm80_vm1, %v4248_v21, -inf }
 0x21f   :  { %v1015_v25 = vsel %vm80_vm1, %v4252_v58, -inf  ;;  %v938_v6 = vrot.slane %v937_v18, 2  ;;  %v954_v7 = vmax.f32 %v952_v52, %v953_v4  ;;  %v970_v5 = vrot.slane %v969_v24, 4 }
 0x220   :  { %v986_v60 = vmax.f32 %v984_v30, %v985_v13  ;;  %v999_v57 = vmax.f32 %v997_v36, %v998_v44  ;;  %v1012_v61 = vmax.f32 %v1010_v38, %v1011_v34  ;;  %v1017_v39 = vsel %vm80_vm1, %v4258_v0, -inf }
 0x221   :  { %v1019_v47 = vsel %vm80_vm1, %v4262_v1, -inf  ;;  %v939_v41 = vmax.f32 %v937_v18, %v938_v6  ;;  %v955_v21 = vrot.slane %v954_v7, 2  ;;  %v971_v20 = vmax.f32 %v969_v24, %v970_v5 }
 0x222   :  { %v987_v9 = vrot.slane %v986_v60, 4  ;;  %v1001_v58 = vmax.f32 %v999_v57, %v1000_v8  ;;  %v1014_v19 = vmax.f32 %v1012_v61, %v1013_v37  ;;  %v1027_v62 = vsel %vm80_vm1, %v4266_v45, -inf }
 0x223   :  { %v1028_v49 = vsel %vm80_vm1, %v4271_v43, -inf  ;;  %v940_v27 = vrot.slane %v939_v41, 1  ;;  %v956_v0 = vmax.f32 %v954_v7, %v955_v21  ;;  %v972_v16 = vrot.slane %v971_v20, 2 }
 0x224   :  { %v988_v12 = vmax.f32 %v986_v60, %v987_v9  ;;  %v1003_v1 = vmax.f32 %v1001_v58, %v1002_v59  ;;  %v1016_v40 = vmax.f32 %v1014_v19, %v1015_v25  ;;  %v1029_v29 = vmax.f32 %v1027_v62, %v1028_v49 }
 0x225   :  { %v1030_v13 = vsel %vm80_vm1, %v4275_v35, -inf  ;;  %v941_v63 = vmax.f32 %v939_v41, %v940_v27  ;;  %v957_v51 = vrot.slane %v956_v0, 1  ;;  %v973_v46 = vmax.f32 %v971_v20, %v972_v16 }
 0x226   :  { %v989_v45 = vrot.slane %v988_v12, 2  ;;  %v1004_v22 = vrot.slane %v1003_v1, 4  ;;  %v1018_v50 = vmax.f32 %v1016_v40, %v1017_v39  ;;  %v1031_v43 = vmax.f32 %v1029_v29, %v1030_v13  ;;  %v3243_v29 = vld [vmem:[%s5421_s0 + $0x58] sm:$0xff]  }
 0x227   :  { %v1032_v10 = vsel %vm80_vm1, %v4279_v56, -inf  ;;  %v958_v14 = vmax.f32 %v956_v0, %v957_v51  ;;  %v974_v44 = vrot.slane %v973_v46, 1  ;;  %v1034_v52 = vsel %vm80_vm1, %v4283_v2, -inf }
 0x228   :  { %v990_v32 = vmax.f32 %v988_v12, %v989_v45  ;;  %v1005_v54 = vmax.f32 %v1003_v1, %v1004_v22  ;;  %v1020_v15 = vmax.f32 %v1018_v50, %v1019_v47  ;;  %v1033_v35 = vmax.f32 %v1031_v43, %v1032_v10 }
 0x229   :  { %v1036_v11 = vsel %vm80_vm1, %v4292_v23, -inf  ;;  %v975_v8 = vmax.f32 %v973_v46, %v974_v44  ;;  %v1070_v38 = vsel %vm1069_vm2, %v4154_v17, %v4143_v42  ;;  %v1092_v56 = vsel %vm1069_vm2, %v958_v14, %v941_v63 }
 0x22a   :  { %v991_v59 = vrot.slane %v990_v32, 1  ;;  %v1006_v18 = vrot.slane %v1005_v54, 2  ;;  %v1021_v4 = vrot.slane %v1020_v15, 4  ;;  %v1035_v24 = vmax.f32 %v1033_v35, %v1034_v52  ;;  %v4403_v52 = vld [vmem:[%s5421_s0 + $0x10] sm:$0xff]   ;;  %v3245_v35 = vld [vmem:[%s5421_s0 + $0x68] sm:$0xff]  }
 0x22b   :  { %v1072_v2 = vsel %vm1071_vm3, %v4159_v26, %v1070_v38  ;;  %v5743_v30 = vrot.slane %v4240_v3, 1  ;;  %v1093_v37 = vsel %vm1071_vm3, %v975_v8, %v1092_v56  ;;  %v1057_v7 = vrot.slane %v4118_v53, 2  ;;  %5747 = vst [vmem:[#allocation109_spill] sm:$0xff] %v4403_v52 }
 0x22c   :  { %v992_v34 = vmax.f32 %v990_v32, %v991_v59  ;;  %v1074_v23 = vsel %vm1073_vm4, %v4180_v48, %v1072_v2  ;;  %v1007_v25 = vmax.f32 %v1005_v54, %v1006_v18  ;;  %v1022_v42 = vmax.f32 %v1020_v15, %v1021_v4  ;;  %v4394_v32 = vld [vmem:[%s5421_s0 + $0x8] sm:$0xff]   ;;  %v4412_v54 = vld [vmem:[%s5421_s0 + $0x18] sm:$0xff]   ;;  %v3244_v15 = vld [vmem:[%s5421_s0 + $0x60] sm:$0xff]  }
 0x22d   :  { %v643_v36 = vmax.f32 %v4240_v3, %v5743_v30  ;;  %v1037_v17 = vmax.f32 %v1035_v24, %v1036_v11  ;;  %v1076_v6 = vsel %vm1075_vm5, %v4216_v31, %v1074_v23  ;;  %v5744_v26 = vrot.slane %v4104_v55, 1  ;;  %5746 = vst [vmem:[#allocation108_spill] sm:$0xff] %v4394_v32  ;;  %5748 = vst [vmem:[#allocation110_spill] sm:$0xff] %v4412_v54  ;;  %v1109_v11 = vld [vmem:[%s5423_s2 + $0x30] sm:$0xff]  ;;  %v1110_v59 = vld [vmem:[%s5423_s2 + $0x38] sm:$0xff] }
 0x22e   :  { %v1078_v3 = vsel %vm1077_vm6, %v4254_v28, %v1076_v6  ;;  %v1094_v60 = vsel %vm1073_vm4, %v992_v34, %v1093_v37  ;;  %v1008_v48 = vrot.slane %v1007_v25, 1  ;;  %v1023_v57 = vrot.slane %v1022_v42, 2  ;;  %3186 = vmatpush3.bf16.msra.mxu0 %v3244_v15  ;;  %v5749_v2 = vld [vmem:[#allocation13_spill] sm:$0xff] }
 0x22f   :  { %v660_v5 = vmax.f32 %v4104_v55, %v5744_v26  ;;  %v1038_v61 = vrot.slane %v1037_v17, 4  ;;  %v1080_v39 = vsel %vm1079_vm7, %v643_v36, %v1078_v3  ;;  %v1058_v20 = vmax.f32 %v4118_v53, %v1057_v7  ;;  %v3242_v53 = vld [vmem:[%s5421_s0 + $0x50] sm:$0xff]   ;;  %v5750_v36 = vld [vmem:[#allocation12_spill] sm:$0xff]  ;;  %v5755_v3 = vld [vmem:[#allocation27_spill] sm:$0xff] }
 0x230   :  { %v1009_v41 = vmax.f32 %v1007_v25, %v1008_v48  ;;  %v1024_v31 = vmax.f32 %v1022_v42, %v1023_v57  ;;  %v5745_v13 = vmov 0.0   ;;  %v5751_v23 = vld [vmem:[#allocation21_spill] sm:$0xff]  ;;  %v5752_v25 = vld [vmem:[#allocation15_spill] sm:$0xff]  ;;  %v5754_v7 = vld [vmem:[#allocation20_spill] sm:$0xff] }
 0x231   :  { %v1082_v47 = vsel %vm1081_vm8, %v660_v5, %v1080_v39  ;;  %v1039_v21 = vmax.f32 %v1037_v17, %v1038_v61  ;;  %v1059_v62 = vrot.slane %v1058_v20, 1  ;;  %3187 = vmatprep.subr.bf16.mxu0 %v5745_v13  ;;  %v5753_v17 = vld [vmem:[#allocation14_spill] sm:$0xff]  ;;  %v1111_v5 = vld [vmem:[%s5423_s2 + $0x40] sm:$0xff]  ;;  %v5765_v15 = vld [vmem:[#allocation25_spill] sm:$0xff] }
 0x232   :  { %v1025_v9 = vrot.slane %v1024_v31, 1  ;;  %v1095_v55 = vsel %vm1075_vm5, %v1009_v41, %v1094_v60  ;;  %3188 = vmatpush3.bf16.msra.mxu0 %v3245_v35  ;;  %v5756_v48 = vld [vmem:[#allocation26_spill] sm:$0xff]  ;;  %v5757_v61 = vld [vmem:[#allocation32_spill] sm:$0xff] }
 0x233   :  { %v1040_v58 = vrot.slane %v1039_v21, 2  ;;  %v1060_v16 = vmax.f32 %v1058_v20, %v1059_v62  ;;  %3193 = vmatprep.subr.bf16.mxu0 %v5745_v13 }
 0x234   :  { %v1026_v19 = vmax.f32 %v1024_v31, %v1025_v9  ;;  %v5759_v31 = vld [vmem:[#allocation35_spill] sm:$0xff] }
 0x235   :  { %v1041_v28 = vmax.f32 %v1039_v21, %v1040_v58 }
 0x236   :  { %v1096_v27 = vsel %vm1077_vm6, %v1026_v19, %v1095_v55  ;;  %v1112_v19 = vld [vmem:[%s5423_s2 + $0x48] sm:$0xff] }
 0x237   :  { %v1042_v49 = vrot.slane %v1041_v28, 1 }
 0x239   :  { %v1043_v0 = vmax.f32 %v1041_v28, %v1042_v49 }
 0x23b   :  { %v1097_v12 = vsel %vm1079_vm7, %v1043_v0, %v1096_v27 }
 0x23c   :  { %v1098_v1 = vsel %vm1081_vm8, %v1060_v16, %v1097_v12  ;;  %v5760_v12 = vld [vmem:[#allocation51_spill] sm:$0xff] }
 0x23d   :  { %v1100_v40 = vpack.c.bf16 %v1098_v1, %v1082_v47  ;;  %v5758_v47 = vld [vmem:[#allocation40_spill] sm:$0xff] }
 0x23f   :  { %3158 = vmatmul.mubr.msk.bf16.vlgmr.msra.gmra.mrb[4].mxu1 %vm80_vm1, %v1100_v40 }
 0x240   :  { %3162 = vmatpush3.bf16.msra.mxu1 %v3242_v53  ;;  %3165 = vmatprep.mubr.msk.bf16.mxu1 %vm3411_vm0, %v5745_v13 }
 0x241   :  { %3163 = vmatprep.subr.bf16.mxu1 %v5745_v13 }
 0x244   :  { %3164 = vmatpush3.bf16.msra.mxu1 %v3243_v29 }
 0x245   :  { %3169 = vmatprep.subr.bf16.mxu1 %v5745_v13 }
 0x247   :  { %3166 = vmatmul.mubr.msk.bf16.vlgmr.msra.gmra.mrb[8].mxu1 %vm80_vm1, %v1100_v40 }
 0x248   :  { %3173 = vmatprep.mubr.msk.bf16.mxu1 %vm3411_vm0, %v5745_v13 }
 0x312   :  { %v1164_v63 = vpop.f32.mrb[4].mxu1 }
 0x313   :  { %v3159_v51 = vpop.f32.mrb[5].mxu1 }
 0x314   :  { %v1167_v46 = vpop.f32.mrb[6].mxu1 }
 0x315   :  { %v1224_v45 = vpack.c.bf16 %v1167_v46, %v1164_v63  ;;  %v3160_v22 = vpop.f32.mrb[7].mxu1  ;;  %v5761_v63 = vld [vmem:[#allocation43_spill] sm:$0xff]  ;;  %v5762_v46 = vld [vmem:[#allocation50_spill] sm:$0xff] }
 0x316   :  { %v5763_v22 = vld [vmem:[#allocation61_spill] sm:$0xff] }
 0x317   :  { %3170 = vmatpush3.bf16.msra.mxu1 %v1224_v45 }
 0x318   :  { %3171 = vmatprep.subr.bf16.mxu1 %v5745_v13 }
 0x31a   :  { %v1217_v50 = vpop.f32.mrb[8].mxu1 }
 0x31b   :  { %v3167_v43 = vpop.f32.mrb[9].mxu1 }
 0x31c   :  { %v1220_v10 = vpop.f32.mrb[10].mxu1  ;;  %v5764_v43 = vld [vmem:[#allocation60_spill] sm:$0xff] }
 0x31d   :  { %v1225_v14 = vpack.c.bf16 %v1220_v10, %v1217_v50  ;;  %v3168_v44 = vpop.f32.mrb[11].mxu1 }
 0x31f   :  { %3172 = vmatpush3.bf16.msra.mxu1 %v1225_v14 }
 0x322   :  { %3174 = vmatmul.mubr.msk.bf16.vlgmr.msra.gmra.mrb[12].mxu1 %vm80_vm1, %v4394_v32 }
 0x323   :  { %3177 = vmatprep.mubr.msk.bf16.mxu1 %vm3411_vm0, %v5745_v13 }
 0x32a   :  { %3178 = vmatmul.mubr.msk.bf16.gmra.mrb[16].mxu1 %vm80_vm1, %v4403_v52 }
 0x32b   :  { %3181 = vmatprep.mubr.msk.bf16.mxu1 %vm3411_vm0, %v5745_v13  ;;  %v5844_v13 = vld [vmem:[#allocation82_spill] sm:$0xff] }
 0x332   :  { %3182 = vmatmul.mubr.msk.bf16.gmra.mrb[20].mxu1 %vm80_vm1, %v4412_v54 }
 0x3f5   :  { %v1260_v8 = vpop.f32.mrb[12].mxu1 }
 0x3f6   :  { %v4430_v38 = vadd.f32 %v1260_v8, %v1109_v11  ;;  %v3175_v56 = vpop.f32.mrb[13].mxu1  ;;  %v5766_v11 = vld [vmem:[#allocation24_spill] sm:$0xff] }
 0x3f7   :  { %v1263_v18 = vpop.f32.mrb[14].mxu1  ;;  %v5767_v56 = vld [vmem:[#allocation33_spill] sm:$0xff] }
 0x3f8   :  { %v4432_v4 = vadd.f32 %v1263_v18, %v1110_v59  ;;  %v3176_v24 = vpop.f32.mrb[15].mxu1  ;;  %v1283_v30 = vadd.f32 %v4430_v38, %v5749_v2  ;;  %v1289_v34 = vadd.f32 %v4430_v38, %v5750_v36  ;;  %v1295_v37 = vadd.f32 %v4430_v38, %v5751_v23  ;;  %v5837_v23 = vld [vmem:[#allocation54_spill] sm:$0xff] }
 0x3f9   :  { %v1301_v60 = vadd.f32 %v4430_v38, %v5755_v3  ;;  %v1307_v39 = vadd.f32 %v4430_v38, %v5757_v61  ;;  %v1313_v41 = vadd.f32 %v4430_v38, %v5758_v47  ;;  %v4472_v1 = vadd.f32 %v4430_v38, %v5760_v12 }
 0x3fa   :  { %v1284_v42 = vadd.f32 %v4432_v4, %v5752_v25  ;;  %v1290_v6 = vadd.f32 %v4432_v4, %v5753_v17  ;;  %v1296_v26 = vadd.f32 %v4432_v4, %v5754_v7  ;;  %v1302_v57 = vadd.f32 %v4432_v4, %v5756_v48  ;;  %v5835_v17 = vld [vmem:[#allocation103_spill] sm:$0xff] }
 0x3fb   :  { %v1308_v21 = vadd.f32 %v4432_v4, %v5759_v31  ;;  %v1331_v20 = vsel %vm80_vm1, %v1283_v30, -inf  ;;  %v1348_v58 = vsel %vm80_vm1, %v1289_v34, -inf  ;;  %v1365_v49 = vsel %vm80_vm1, %v1295_v37, -inf  ;;  %v5768_v37 = vld [vmem:[#allocation39_spill] sm:$0xff] }
 0x3fc   :  { %v1332_v9 = vsel %vm80_vm1, %v1284_v42, -inf  ;;  %v1349_v62 = vsel %vm80_vm1, %v1290_v6, -inf  ;;  %v1366_v27 = vsel %vm80_vm1, %v1296_v26, -inf  ;;  %v4476_v51 = vadd.f32 %v4432_v4, %v5761_v63  ;;  %v5769_v6 = vld [vmem:[#allocation38_spill] sm:$0xff]  ;;  %v5836_v25 = vld [vmem:[#allocation55_spill] sm:$0xff] }
 0x3fd   :  { %v1268_v55 = vpop.f32.mrb[16].mxu1  ;;  %v1333_v28 = vmax.f32 %v1331_v20, %v1332_v9  ;;  %v1350_v53 = vmax.f32 %v1348_v58, %v1349_v62  ;;  %v1367_v40 = vmax.f32 %v1365_v49, %v1366_v27  ;;  %v4480_v45 = vadd.f32 %v4432_v4, %v5762_v46  ;;  %v5772_v9 = vld [vmem:[#allocation48_spill] sm:$0xff]  ;;  %v5774_v62 = vld [vmem:[#allocation71_spill] sm:$0xff]  ;;  %v5790_v46 = vld [vmem:[#allocation101_spill] sm:$0xff] }
 0x3fe   :  { %v4468_v0 = vadd.f32 %v1268_v55, %v1111_v5  ;;  %v3179_v16 = vpop.f32.mrb[17].mxu1  ;;  %v4484_v50 = vadd.f32 %v4430_v38, %v5763_v22  ;;  %v4488_v10 = vadd.f32 %v4432_v4, %v5764_v43  ;;  %v1382_v59 = vsel %vm80_vm1, %v1301_v60, -inf  ;;  %v5770_v5 = vld [vmem:[#allocation41_spill] sm:$0xff]  ;;  %v5773_v55 = vld [vmem:[#allocation58_spill] sm:$0xff]  ;;  %v5776_v43 = vld [vmem:[#allocation68_spill] sm:$0xff] }
 0x3ff   :  { %v1271_v29 = vpop.f32.mrb[18].mxu1  ;;  %v1383_v24 = vsel %vm80_vm1, %v1302_v57, -inf  ;;  %v4501_v30 = vsel %vm80_vm1, %v1307_v39, -inf  ;;  %v4504_v34 = vsel %vm80_vm1, %v1308_v21, -inf  ;;  %v4513_v20 = vsel %vm80_vm1, %v1313_v41, -inf  ;;  %v1113_v57 = vld [vmem:[%s5423_s2 + $0x50] sm:$0xff] }
 0x400   :  { %v4490_v14 = vadd.f32 %v1271_v29, %v1112_v19  ;;  %v3180_v44 = vpop.f32.mrb[19].mxu1  ;;  %v1285_v35 = vadd.f32 %v4468_v0, %v5765_v15  ;;  %v1291_v8 = vadd.f32 %v4468_v0, %v5766_v11  ;;  %v1297_v18 = vadd.f32 %v4468_v0, %v5767_v56  ;;  %v5771_v39 = vld [vmem:[#allocation49_spill] sm:$0xff]  ;;  %v5775_v41 = vld [vmem:[#allocation59_spill] sm:$0xff]  ;;  %v5777_v11 = vld [vmem:[#allocation76_spill] sm:$0xff] }
 0x401   :  { %v1303_v60 = vadd.f32 %v4468_v0, %v5770_v5  ;;  %v1309_v58 = vadd.f32 %v4468_v0, %v5772_v9  ;;  %v4524_v19 = vadd.f32 %v4468_v0, %v5773_v55  ;;  %v4528_v49 = vadd.f32 %v4468_v0, %v5774_v62  ;;  %v1114_v9 = vld [vmem:[%s5423_s2 + $0x58] sm:$0xff] }
 0x402   :  { %v1286_v42 = vadd.f32 %v4490_v14, %v5768_v37  ;;  %v1292_v26 = vadd.f32 %v4490_v14, %v5769_v6  ;;  %v1298_v21 = vadd.f32 %v4490_v14, %v5771_v39  ;;  %v1304_v27 = vadd.f32 %v4490_v14, %v5775_v41  ;;  %v5778_v22 = vld [vmem:[#allocation87_spill] sm:$0xff] }
 0x403   :  { %v1334_v16 = vsel %vm80_vm1, %v1285_v35, -inf  ;;  %v1351_v44 = vsel %vm80_vm1, %v1291_v8, -inf  ;;  %v1368_v62 = vsel %vm80_vm1, %v1297_v18, -inf  ;;  %v1310_v35 = vadd.f32 %v4490_v14, %v5776_v43  ;;  %v5789_v43 = vld [vmem:[#allocation90_spill] sm:$0xff] }
 0x404   :  { %v1336_v29 = vsel %vm80_vm1, %v1286_v42, -inf  ;;  %v1335_v55 = vmax.f32 %v1333_v28, %v1334_v16  ;;  %v1352_v5 = vmax.f32 %v1350_v53, %v1351_v44  ;;  %v1353_v6 = vsel %vm80_vm1, %v1292_v26, -inf }
 0x405   :  { %v1276_v39 = vpop.f32.mrb[20].mxu1  ;;  %v1369_v42 = vmax.f32 %v1367_v40, %v1368_v62  ;;  %v1384_v56 = vmax.f32 %v1382_v59, %v1383_v24  ;;  %v1316_v15 = vadd.f32 %v4490_v14, %v5777_v11  ;;  %v4548_v28 = vadd.f32 %v4490_v14, %v5778_v22  ;;  %v5780_v59 = vld [vmem:[#allocation79_spill] sm:$0xff]  ;;  %v5781_v62 = vld [vmem:[#allocation69_spill] sm:$0xff] }
 0x406   :  { %v4540_v37 = vadd.f32 %v1276_v39, %v1113_v57  ;;  %v3183_v41 = vpop.f32.mrb[21].mxu1  ;;  %v1337_v53 = vmax.f32 %v1335_v55, %v1336_v29  ;;  %v1354_v26 = vmax.f32 %v1352_v5, %v1353_v6  ;;  %v5779_v39 = vld [vmem:[#allocation56_spill] sm:$0xff]  ;;  %v4558_v24 = vadd.f32 %v4468_v0, %v5780_v59  ;;  %v5783_v29 = vld [vmem:[#allocation74_spill] sm:$0xff]  ;;  %v5785_v59 = vld [vmem:[#allocation77_spill] sm:$0xff] }
 0x407   :  { %v1279_v8 = vpop.f32.mrb[22].mxu1  ;;  %v1370_v44 = vsel %vm80_vm1, %v1298_v21, -inf  ;;  %v1385_v6 = vsel %vm80_vm1, %v1303_v60, -inf  ;;  %v1387_v5 = vsel %vm80_vm1, %v1304_v27, -inf  ;;  %v5786_v22 = vld [vmem:[#allocation91_spill] sm:$0xff]  ;;  %v5787_v21 = vld [vmem:[#allocation84_spill] sm:$0xff] }
 0x408   :  { %v4550_v16 = vadd.f32 %v1279_v8, %v1114_v9  ;;  %v3184_v18 = vpop.f32.mrb[23].mxu1  ;;  %v1287_v57 = vadd.f32 %v4540_v37, %v3774_v33  ;;  %v1293_v40 = vadd.f32 %v4540_v37, %v5779_v39  ;;  %v1299_v41 = vadd.f32 %v4540_v37, %v5781_v62  ;;  %v5782_v9 = vld [vmem:[#allocation75_spill] sm:$0xff]  ;;  %v5788_v11 = vld [vmem:[#allocation97_spill] sm:$0xff] }
 0x409   :  { %v5784_v18 = vld [vmem:[#allocation85_spill] sm:$0xff]  ;;  %v1305_v33 = vadd.f32 %v4540_v37, %v5785_v59  ;;  %v1311_v60 = vadd.f32 %v4540_v37, %v5787_v21  ;;  %v1371_v21 = vmax.f32 %v1369_v42, %v1370_v44  ;;  %v1386_v61 = vmax.f32 %v1384_v56, %v1385_v6  ;;  %v5791_v44 = vld [vmem:[#allocation96_spill] sm:$0xff] }
 0x40a   :  { %v1288_v55 = vadd.f32 %v4550_v16, %v5782_v9  ;;  %v1294_v8 = vadd.f32 %v4550_v16, %v5783_v29  ;;  %v1300_v39 = vadd.f32 %v4550_v16, %v5784_v18  ;;  %v1306_v62 = vadd.f32 %v4550_v16, %v5786_v22 }
 0x40b   :  { %v1312_v27 = vadd.f32 %v4550_v16, %v5788_v11  ;;  %v1317_v9 = vadd.f32 %v4540_v37, %v5789_v43  ;;  %v1318_v29 = vadd.f32 %v4550_v16, %v5790_v46  ;;  %v1338_v18 = vsel %vm80_vm1, %v1287_v57, -inf }
 0x40c   :  { %v1340_v63 = vsel %vm80_vm1, %v1288_v55, -inf  ;;  %v1355_v59 = vsel %vm80_vm1, %v1293_v40, -inf  ;;  %v1339_v12 = vmax.f32 %v1337_v53, %v1338_v18  ;;  %v1357_v31 = vsel %vm80_vm1, %v1294_v8, -inf }
 0x40d   :  { %v1356_v22 = vmax.f32 %v1354_v26, %v1355_v59  ;;  %v1372_v47 = vsel %vm80_vm1, %v1299_v41, -inf  ;;  %v1374_v11 = vsel %vm80_vm1, %v1300_v39, -inf  ;;  %v1389_v43 = vsel %vm80_vm1, %v1305_v33, -inf }
 0x40e   :  { %v1341_v48 = vmax.f32 %v1339_v12, %v1340_v63  ;;  %v1373_v3 = vmax.f32 %v1371_v21, %v1372_v47  ;;  %v1391_v57 = vsel %vm80_vm1, %v1306_v62, -inf  ;;  %v1388_v55 = vmax.f32 %v1386_v61, %v1387_v5  ;;  %v5792_v5 = vld [vmem:[#allocation105_spill] sm:$0xff] }
 0x40f   :  { %v1358_v46 = vmax.f32 %v1356_v22, %v1357_v31  ;;  %v1401_v53 = vmax.f32 %v4501_v30, %v4504_v34  ;;  %v1402_v26 = vsel %vm80_vm1, %v1309_v58, -inf  ;;  %v1404_v42 = vsel %vm80_vm1, %v1310_v35, -inf }
 0x410   :  { %v1342_v40 = vrot.slane %v1341_v48, 4  ;;  %v1375_v41 = vmax.f32 %v1373_v3, %v1374_v11  ;;  %v1406_v56 = vsel %vm80_vm1, %v1311_v60, -inf  ;;  %v1390_v39 = vmax.f32 %v1388_v55, %v1389_v43 }
 0x411   :  { %v1359_v59 = vrot.slane %v1358_v46, 4  ;;  %v1403_v33 = vmax.f32 %v1401_v53, %v1402_v26  ;;  %v1408_v31 = vsel %vm80_vm1, %v1312_v27, -inf  ;;  %v1417_v47 = vsel %vm80_vm1, %v4476_v51, -inf }
 0x412   :  { %v1343_v61 = vmax.f32 %v1341_v48, %v1342_v40  ;;  %v1376_v63 = vrot.slane %v1375_v41, 4  ;;  %v1418_v22 = vmax.f32 %v4513_v20, %v1417_v47  ;;  %v1392_v30 = vmax.f32 %v1390_v39, %v1391_v57  ;;  %v5794_v39 = vld [vmem:[#allocation100_spill] sm:$0xff] }
 0x413   :  { %v1360_v12 = vmax.f32 %v1358_v46, %v1359_v59  ;;  %v1405_v34 = vmax.f32 %v1403_v33, %v1404_v42  ;;  %v1419_v58 = vsel %vm80_vm1, %v4524_v19, -inf  ;;  %v1421_v3 = vsel %vm80_vm1, %v1316_v15, -inf }
 0x414   :  { %v1344_v11 = vrot.slane %v1343_v61, 2  ;;  %v1377_v35 = vmax.f32 %v1375_v41, %v1376_v63  ;;  %v1420_v62 = vmax.f32 %v1418_v22, %v1419_v58  ;;  %v1323_v6 = vadd.f32 %v4540_v37, %v5791_v44  ;;  %v5793_v41 = vld [vmem:[#allocation93_spill] sm:$0xff] }
 0x415   :  { %v1361_v43 = vrot.slane %v1360_v12, 2  ;;  %v1393_v51 = vrot.slane %v1392_v30, 4  ;;  %v1407_v48 = vmax.f32 %v1405_v34, %v1406_v56  ;;  %v1423_v46 = vsel %vm80_vm1, %v1317_v9, -inf }
 0x416   :  { %v1324_v20 = vadd.f32 %v4550_v16, %v5792_v5  ;;  %v1345_v8 = vmax.f32 %v1343_v61, %v1344_v11  ;;  %v1378_v18 = vrot.slane %v1377_v35, 2  ;;  %v1422_v21 = vmax.f32 %v1420_v62, %v1421_v3  ;;  %v5795_v62 = vld [vmem:[#allocation107_spill] sm:$0xff]  ;;  %v5831_v5 = vld [vmem:[#allocation46_spill] sm:$0xff] }
 0x417   :  { %v1394_v19 = vmax.f32 %v1392_v30, %v1393_v51  ;;  %v1409_v60 = vmax.f32 %v1407_v48, %v1408_v31  ;;  %v1425_v15 = vsel %vm80_vm1, %v1318_v29, -inf  ;;  %v1434_v27 = vsel %vm80_vm1, %v4480_v45, -inf }
 0x418   :  { %v1362_v57 = vmax.f32 %v1360_v12, %v1361_v43  ;;  %v1379_v55 = vmax.f32 %v1377_v35, %v1378_v18  ;;  %v1424_v53 = vmax.f32 %v1422_v21, %v1423_v46  ;;  %v1433_v26 = vsel %vm80_vm1, %v4472_v1, -inf }
 0x419   :  { %v1395_v9 = vrot.slane %v1394_v19, 2  ;;  %v1410_v42 = vrot.slane %v1409_v60, 4  ;;  %v1435_v40 = vmax.f32 %v1433_v26, %v1434_v27  ;;  %v1436_v59 = vsel %vm80_vm1, %v4528_v49, -inf }
 0x41a   :  { %v1328_v56 = vadd.f32 %v4490_v14, %v5793_v41  ;;  %v1329_v29 = vadd.f32 %v4540_v37, %v5794_v39  ;;  %v1346_v33 = vrot.slane %v1345_v8, 1  ;;  %v1426_v45 = vmax.f32 %v1424_v53, %v1425_v15  ;;  %v5828_v39 = vld [vmem:[#allocation89_spill] sm:$0xff]  ;;  %v5829_v41 = vld [vmem:[#allocation99_spill] sm:$0xff] }
 0x41b   :  { %v1396_v31 = vmax.f32 %v1394_v19, %v1395_v9  ;;  %v1411_v47 = vmax.f32 %v1409_v60, %v1410_v42  ;;  %v1437_v61 = vmax.f32 %v1435_v40, %v1436_v59  ;;  %v1438_v1 = vsel %vm80_vm1, %v4548_v28, -inf  ;;  %v5798_v42 = vld [vmem:[#allocation17_spill] sm:$0xff] }
 0x41c   :  { %v1363_v12 = vrot.slane %v1362_v57, 1  ;;  %v1380_v63 = vrot.slane %v1379_v55, 1  ;;  %v1427_v22 = vrot.slane %v1426_v45, 4  ;;  %v1440_v30 = vsel %vm80_vm1, %v1323_v6, -inf }
 0x41d   :  { %v1397_v49 = vrot.slane %v1396_v31, 1  ;;  %v1412_v34 = vrot.slane %v1411_v47, 2  ;;  %v1439_v58 = vmax.f32 %v1437_v61, %v1438_v1  ;;  %v1442_v3 = vsel %vm80_vm1, %v1324_v20, -inf }
 0x41e   :  { %v1428_v11 = vmax.f32 %v1426_v45, %v1427_v22  ;;  %v1450_v43 = vsel %vm80_vm1, %v4484_v50, -inf  ;;  %v1451_v35 = vsel %vm80_vm1, %v4488_v10, -inf  ;;  %v1453_v28 = vsel %vm80_vm1, %v4558_v24, -inf }
 0x41f   :  { %v1330_v51 = vadd.f32 %v4550_v16, %v5795_v62  ;;  %v1413_v48 = vmax.f32 %v1411_v47, %v1412_v34  ;;  %v1441_v6 = vmax.f32 %v1439_v58, %v1440_v30  ;;  %v1452_v46 = vmax.f32 %v1450_v43, %v1451_v35  ;;  %v5805_v30 = vld [vmem:[#allocation19_spill] sm:$0xff]  ;;  %v5806_v34 = vld [vmem:[#allocation18_spill] sm:$0xff]  ;;  %v5826_v62 = vld [vmem:[#allocation52_spill] sm:$0xff] }
 0x420   :  { %v4631_v18 = vmax.f32 %v1345_v8, %v1346_v33  ;;  %v1429_v21 = vrot.slane %v1428_v11, 2  ;;  %v1455_v20 = vsel %vm80_vm1, %v1328_v56, -inf  ;;  %v4634_v19 = vmax.f32 %v1362_v57, %v1363_v12  ;;  %v5799_v57 = vld [vmem:[#allocation16_spill] sm:$0xff]  ;;  %v5800_v56 = vld [vmem:[#allocation29_spill] sm:$0xff]  ;;  %v5801_v33 = vld [vmem:[#allocation42_spill] sm:$0xff] }
 0x421   :  { %v1414_v50 = vrot.slane %v1413_v48, 1  ;;  %v1443_v60 = vmax.f32 %v1441_v6, %v1442_v3  ;;  %v1454_v15 = vmax.f32 %v1452_v46, %v1453_v28  ;;  %v4636_v10 = vmax.f32 %v1379_v55, %v1380_v63  ;;  %v5804_v12 = vld [vmem:[#allocation78_spill] sm:$0xff]  ;;  %v5807_v3 = vld [vmem:[#allocation28_spill] sm:$0xff]  ;;  %v5808_v28 = vld [vmem:[#allocation45_spill] sm:$0xff] }
 0x422   :  { %v4638_v27 = vmax.f32 %v1396_v31, %v1397_v49  ;;  %v4640_v24 = vmax.f32 %v1428_v11, %v1429_v21  ;;  %v1457_v53 = vsel %vm80_vm1, %v1329_v29, -inf  ;;  %v1459_v8 = vsel %vm80_vm1, %v1330_v51, -inf  ;;  %v5802_v31 = vld [vmem:[#allocation63_spill] sm:$0xff]  ;;  %v5810_v46 = vld [vmem:[#allocation81_spill] sm:$0xff] }
 0x423   :  { %v1444_v26 = vrot.slane %v1443_v60, 4  ;;  %v1456_v9 = vmax.f32 %v1454_v15, %v1455_v20  ;;  %v1467_v40 = vadd.f32 %v4430_v38, %v5798_v42  ;;  %v1468_v59 = vadd.f32 %v4432_v4, %v5799_v57  ;;  %v5811_v20 = vld [vmem:[#allocation23_spill] sm:$0xff]  ;;  %v5824_v57 = vld [vmem:[#allocation37_spill] sm:$0xff]  ;;  %v5825_v42 = vld [vmem:[#allocation36_spill] sm:$0xff] }
 0x424   :  { %5796 = vst [vmem:[#allocation111_spill] sm:$0xff] %v4638_v27  ;;  %5797 = vst [vmem:[#allocation112_spill] sm:$0xff] %v4640_v24  ;;  %v1469_v55 = vadd.f32 %v4468_v0, %v5800_v56  ;;  %v1470_v45 = vadd.f32 %v4490_v14, %v5801_v33  ;;  %v1471_v47 = vadd.f32 %v4540_v37, %v5802_v31 }
 0x425   :  { %v4654_v29 = vmax.f32 %v1413_v48, %v1414_v50  ;;  %v1445_v61 = vmax.f32 %v1443_v60, %v1444_v26  ;;  %v1458_v1 = vmax.f32 %v1456_v9, %v1457_v53  ;;  %v1472_v63 = vadd.f32 %v4550_v16, %v5804_v12  ;;  %v5809_v48 = vld [vmem:[#allocation62_spill] sm:$0xff]  ;;  %v5820_v12 = vld [vmem:[#allocation44_spill] sm:$0xff] }
 0x426   :  { %v1473_v49 = vadd.f32 %v4430_v38, %v5805_v30  ;;  %v1474_v58 = vadd.f32 %v4432_v4, %v5806_v34  ;;  %v1475_v11 = vadd.f32 %v4468_v0, %v5807_v3  ;;  %v1476_v51 = vadd.f32 %v4490_v14, %v5808_v28  ;;  %v5812_v60 = vld [vmem:[#allocation22_spill] sm:$0xff]  ;;  %v5818_v34 = vld [vmem:[#allocation31_spill] sm:$0xff] }
 0x427   :  { %5803 = vst [vmem:[#allocation113_spill] sm:$0xff] %v4654_v29  ;;  %v1446_v43 = vrot.slane %v1445_v61, 2  ;;  %v1460_v35 = vmax.f32 %v1458_v1, %v1459_v8  ;;  %v1477_v6 = vadd.f32 %v4540_v37, %v5809_v48  ;;  %v1478_v21 = vadd.f32 %v4550_v16, %v5810_v46  ;;  %v5813_v53 = vld [vmem:[#allocation34_spill] sm:$0xff]  ;;  %v5815_v1 = vld [vmem:[#allocation53_spill] sm:$0xff] }
 0x428   :  { %v1479_v50 = vadd.f32 %v4430_v38, %v5811_v20  ;;  %v1480_v15 = vadd.f32 %v4432_v4, %v5812_v60  ;;  %v1481_v26 = vadd.f32 %v4468_v0, %v5813_v53  ;;  %v1482_v22 = vadd.f32 %v4490_v14, %v5815_v1  ;;  %v5816_v28 = vld [vmem:[#allocation70_spill] sm:$0xff]  ;;  %v5821_v53 = vld [vmem:[#allocation65_spill] sm:$0xff]  ;;  %v5822_v1 = vld [vmem:[#allocation80_spill] sm:$0xff] }
 0x429   :  { %v4677_v9 = vmax.f32 %v1445_v61, %v1446_v43  ;;  %v1461_v8 = vrot.slane %v1460_v35, 4  ;;  %v1483_v48 = vadd.f32 %v4540_v37, %v5816_v28  ;;  %v5817_v3 = vld [vmem:[#allocation86_spill] sm:$0xff]  ;;  %v1485_v20 = vadd.f32 %v4430_v38, %v5818_v34  ;;  %v5823_v28 = vld [vmem:[#allocation92_spill] sm:$0xff] }
 0x42a   :  { %v1484_v46 = vadd.f32 %v4550_v16, %v5817_v3  ;;  %v5819_v30 = vld [vmem:[#allocation30_spill] sm:$0xff]  ;;  %v1487_v61 = vadd.f32 %v4468_v0, %v5820_v12  ;;  %v1488_v31 = vadd.f32 %v4490_v14, %v5821_v53  ;;  %v1489_v33 = vadd.f32 %v4540_v37, %v5822_v1  ;;  %v5827_v12 = vld [vmem:[#allocation73_spill] sm:$0xff]  ;;  %v5830_v3 = vld [vmem:[#allocation47_spill] sm:$0xff] }
 0x42b   :  { %5814 = vst [vmem:[#allocation114_spill] sm:$0xff] %v4677_v9  ;;  %v1486_v60 = vadd.f32 %v4432_v4, %v5819_v30  ;;  %v1462_v43 = vmax.f32 %v1460_v35, %v1461_v8  ;;  %v1490_v56 = vadd.f32 %v4550_v16, %v5823_v28  ;;  %v1491_v34 = vadd.f32 %v4430_v38, %v5824_v57  ;;  %v5845_v29 = vld [vmem:[#allocation94_spill] sm:$0xff] }
 0x42c   :  { %v1492_v30 = vadd.f32 %v4432_v4, %v5825_v42  ;;  %v1493_v35 = vadd.f32 %v4468_v0, %v5826_v62  ;;  %v1494_v53 = vadd.f32 %v4490_v14, %v5827_v12  ;;  %v1495_v1 = vadd.f32 %v4540_v37, %v5828_v39  ;;  %v5832_v62 = vld [vmem:[#allocation64_spill] sm:$0xff]  ;;  %v5833_v12 = vld [vmem:[#allocation83_spill] sm:$0xff] }
 0x42d   :  { %v1463_v8 = vrot.slane %v1462_v43, 2  ;;  %v4710_v28 = vadd.f32 %v4550_v16, %v5829_v41  ;;  %v4714_v57 = vadd.f32 %v4430_v38, %v5830_v3  ;;  %v4718_v42 = vadd.f32 %v4432_v4, %v5831_v5  ;;  %v5834_v39 = vld [vmem:[#allocation95_spill] sm:$0xff] }
 0x42e   :  { %v4722_v44 = vadd.f32 %v4468_v0, %v5832_v62  ;;  %v4726_v7 = vadd.f32 %v4490_v14, %v5833_v12  ;;  %v4730_v41 = vadd.f32 %v4540_v37, %v5834_v39  ;;  %v4734_v3 = vadd.f32 %v4550_v16, %v5835_v17  ;;  %v5838_v12 = vld [vmem:[#allocation72_spill] sm:$0xff]  ;;  %v5840_v17 = vld [vmem:[#allocation98_spill] sm:$0xff] }
 0x42f   :  { %v4738_v5 = vadd.f32 %v4430_v38, %v5836_v25  ;;  %v4742_v62 = vadd.f32 %v4432_v4, %v5837_v23  ;;  %v4744_v36 = vmax.f32 %v1462_v43, %v1463_v8  ;;  %v4748_v2 = vadd.f32 %v4468_v0, %v5838_v12  ;;  %v5839_v39 = vld [vmem:[#allocation88_spill] sm:$0xff]  ;;  %v5842_v23 = vld [vmem:[#allocation67_spill] sm:$0xff]  ;;  %v5843_v8 = vld [vmem:[#allocation66_spill] sm:$0xff] }
 0x430   :  { %v4752_v54 = vadd.f32 %v4490_v14, %v5839_v39  ;;  %v4756_v52 = vadd.f32 %v4540_v37, %v5840_v17  ;;  %v5841_v25 = vld [vmem:[#allocation104_spill] sm:$0xff]  ;;  %v4764_v43 = vadd.f32 %v4430_v38, %v5842_v23  ;;  %v4768_v12 = vadd.f32 %v4432_v4, %v5843_v8 }
 0x431   :  { %v4760_v32 = vadd.f32 %v4550_v16, %v5841_v25  ;;  %v4772_v39 = vadd.f32 %v4468_v0, %v5844_v13  ;;  %v4776_v17 = vadd.f32 %v4490_v14, %v5845_v29  ;;  %v1515_v27 = vsel %vm80_vm1, %v1467_v40, -inf }
 0x432   :  { %v1516_v25 = vsel %vm80_vm1, %v1468_v59, -inf  ;;  %v1518_v9 = vsel %vm80_vm1, %v1469_v55, -inf  ;;  %v1520_v23 = vsel %vm80_vm1, %v1470_v45, -inf  ;;  %v1522_v4 = vsel %vm80_vm1, %v1471_v47, -inf }
 0x433   :  { %v1517_v38 = vmax.f32 %v1515_v27, %v1516_v25  ;;  %v1524_v8 = vsel %vm80_vm1, %v1472_v63, -inf  ;;  %v1532_v0 = vsel %vm80_vm1, %v1473_v49, -inf  ;;  %v1533_v13 = vsel %vm80_vm1, %v1474_v58, -inf }
 0x434   :  { %v1535_v14 = vsel %vm80_vm1, %v1475_v11, -inf  ;;  %v1537_v29 = vsel %vm80_vm1, %v1476_v51, -inf  ;;  %v1534_v24 = vmax.f32 %v1532_v0, %v1533_v13  ;;  %v1539_v59 = vsel %vm80_vm1, %v1477_v6, -inf }
 0x435   :  { %v1519_v40 = vmax.f32 %v1517_v38, %v1518_v9  ;;  %v1541_v25 = vsel %vm80_vm1, %v1478_v21, -inf  ;;  %v1549_v27 = vsel %vm80_vm1, %v1479_v50, -inf  ;;  %v1550_v55 = vsel %vm80_vm1, %v1480_v15, -inf }
 0x436   :  { %v1552_v45 = vsel %vm80_vm1, %v1481_v26, -inf  ;;  %v1554_v47 = vsel %vm80_vm1, %v1482_v22, -inf  ;;  %v1536_v49 = vmax.f32 %v1534_v24, %v1535_v14  ;;  %v1551_v58 = vmax.f32 %v1549_v27, %v1550_v55 }
 0x437   :  { %v1521_v63 = vmax.f32 %v1519_v40, %v1520_v23  ;;  %v1556_v11 = vsel %vm80_vm1, %v1483_v48, -inf  ;;  %v1558_v51 = vsel %vm80_vm1, %v1484_v46, -inf  ;;  %v1566_v13 = vsel %vm80_vm1, %v1485_v20, -inf }
 0x438   :  { %v1567_v6 = vsel %vm80_vm1, %v1486_v60, -inf  ;;  %v1569_v21 = vsel %vm80_vm1, %v1487_v61, -inf  ;;  %v1538_v9 = vmax.f32 %v1536_v49, %v1537_v29  ;;  %v1553_v15 = vmax.f32 %v1551_v58, %v1552_v45 }
 0x439   :  { %v1523_v50 = vmax.f32 %v1521_v63, %v1522_v4  ;;  %v1568_v38 = vmax.f32 %v1566_v13, %v1567_v6  ;;  %v1571_v26 = vsel %vm80_vm1, %v1488_v31, -inf  ;;  %v1573_v23 = vsel %vm80_vm1, %v1489_v33, -inf }
 0x43a   :  { %v1575_v24 = vsel %vm80_vm1, %v1490_v56, -inf  ;;  %v1583_v22 = vsel %vm80_vm1, %v1491_v34, -inf  ;;  %v1540_v46 = vmax.f32 %v1538_v9, %v1539_v59  ;;  %v1555_v0 = vmax.f32 %v1553_v15, %v1554_v47 }
 0x43b   :  { %v1525_v48 = vmax.f32 %v1523_v50, %v1524_v8  ;;  %v1570_v20 = vmax.f32 %v1568_v38, %v1569_v21  ;;  %v1584_v60 = vsel %vm80_vm1, %v1492_v30, -inf  ;;  %v1586_v61 = vsel %vm80_vm1, %v1493_v35, -inf }
 0x43c   :  { %v1588_v29 = vsel %vm80_vm1, %v1494_v53, -inf  ;;  %v1590_v4 = vsel %vm80_vm1, %v1495_v1, -inf  ;;  %v1542_v31 = vmax.f32 %v1540_v46, %v1541_v25  ;;  %v1557_v40 = vmax.f32 %v1555_v0, %v1556_v11 }
 0x43d   :  { %v1526_v14 = vrot.slane %v1525_v48, 4  ;;  %v1572_v33 = vmax.f32 %v1570_v20, %v1571_v26  ;;  %v1585_v27 = vmax.f32 %v1583_v22, %v1584_v60  ;;  %v1592_v56 = vsel %vm80_vm1, %v4710_v28, -inf }
 0x43e   :  { %v1600_v34 = vsel %vm80_vm1, %v4714_v57, -inf  ;;  %v1601_v30 = vsel %vm80_vm1, %v4718_v42, -inf  ;;  %v1543_v35 = vrot.slane %v1542_v31, 4  ;;  %v1559_v59 = vmax.f32 %v1557_v40, %v1558_v51 }
 0x43f   :  { %v1527_v8 = vmax.f32 %v1525_v48, %v1526_v14  ;;  %v1574_v53 = vmax.f32 %v1572_v33, %v1573_v23  ;;  %v1587_v55 = vmax.f32 %v1585_v27, %v1586_v61  ;;  %v1602_v1 = vmax.f32 %v1600_v34, %v1601_v30  ;;  %v5846_v48 = vld [vmem:[#allocation102_spill] sm:$0xff] }
 0x440   :  { %v1603_v25 = vsel %vm80_vm1, %v4722_v44, -inf  ;;  %v1605_v45 = vsel %vm80_vm1, %v4726_v7, -inf  ;;  %v1544_v28 = vmax.f32 %v1542_v31, %v1543_v35  ;;  %v1560_v63 = vrot.slane %v1559_v59, 4 }
 0x441   :  { %v1528_v47 = vrot.slane %v1527_v8, 2  ;;  %v1576_v49 = vmax.f32 %v1574_v53, %v1575_v24  ;;  %v1589_v57 = vmax.f32 %v1587_v55, %v1588_v29  ;;  %v1604_v58 = vmax.f32 %v1602_v1, %v1603_v25 }
 0x442   :  { %v1607_v42 = vsel %vm80_vm1, %v4730_v41, -inf  ;;  %v1609_v11 = vsel %vm80_vm1, %v4734_v3, -inf  ;;  %v1545_v13 = vrot.slane %v1544_v28, 2  ;;  %v1561_v6 = vmax.f32 %v1559_v59, %v1560_v63 }
 0x443   :  { %v1529_v51 = vmax.f32 %v1527_v8, %v1528_v47  ;;  %v1577_v21 = vrot.slane %v1576_v49, 4  ;;  %v1591_v44 = vmax.f32 %v1589_v57, %v1590_v4  ;;  %v1606_v50 = vmax.f32 %v1604_v58, %v1605_v45  ;;  %v5847_v4 = vld [vmem:[#allocation106_spill] sm:$0xff] }
 0x444   :  { %v1617_v7 = vsel %vm80_vm1, %v4738_v5, -inf  ;;  %v1618_v9 = vsel %vm80_vm1, %v4742_v62, -inf  ;;  %v1546_v38 = vmax.f32 %v1544_v28, %v1545_v13  ;;  %v1562_v26 = vrot.slane %v1561_v6, 2 }
 0x445   :  { %v1530_v15 = vrot.slane %v1529_v51, 1  ;;  %v1578_v23 = vmax.f32 %v1576_v49, %v1577_v21  ;;  %v1593_v41 = vmax.f32 %v1591_v44, %v1592_v56  ;;  %v1608_v24 = vmax.f32 %v1606_v50, %v1607_v42 }
 0x446   :  { %v1619_v22 = vmax.f32 %v1617_v7, %v1618_v9  ;;  %v1620_v3 = vsel %vm80_vm1, %v4748_v2, -inf  ;;  %v1513_v46 = vadd.f32 %v4540_v37, %v5846_v48  ;;  %v1547_v0 = vrot.slane %v1546_v38, 1  ;;  %v5850_v7 = vld [vmem:[#allocation114_spill] sm:$0xff] }
 0x447   :  { %v1563_v20 = vmax.f32 %v1561_v6, %v1562_v26  ;;  %v1579_v60 = vrot.slane %v1578_v23, 2  ;;  %v1594_v5 = vrot.slane %v1593_v41, 4  ;;  %v1610_v61 = vmax.f32 %v1608_v24, %v1609_v11  ;;  %v5848_v6 = vld [vmem:[#allocation112_spill] sm:$0xff]  ;;  %v5852_v26 = vld [vmem:[#allocation111_spill] sm:$0xff] }
 0x448   :  { %v1621_v29 = vmax.f32 %v1619_v22, %v1620_v3  ;;  %v1622_v62 = vsel %vm80_vm1, %v4752_v54, -inf  ;;  %v1514_v14 = vadd.f32 %v4550_v16, %v5847_v4  ;;  %v1624_v2 = vsel %vm80_vm1, %v4756_v52, -inf  ;;  %v5853_v3 = vld [vmem:[#allocation113_spill] sm:$0xff] }
 0x449   :  { %v1564_v31 = vrot.slane %v1563_v20, 1  ;;  %v1580_v40 = vmax.f32 %v1578_v23, %v1579_v60  ;;  %v1531_v33 = vmax.f32 %v1529_v51, %v1530_v15  ;;  %v1595_v27 = vmax.f32 %v1593_v41, %v1594_v5 }
 0x44a   :  { %v1611_v37 = vrot.slane %v1610_v61, 4  ;;  %v1623_v56 = vmax.f32 %v1621_v29, %v1622_v62  ;;  %v1548_v34 = vmax.f32 %v1546_v38, %v1547_v0  ;;  %v1626_v30 = vsel %vm80_vm1, %v4760_v32, -inf }
 0x44b   :  { %v1634_v8 = vsel %vm80_vm1, %v4764_v43, -inf  ;;  %v1635_v54 = vsel %vm80_vm1, %v4768_v12, -inf  ;;  %v1596_v16 = vrot.slane %v1595_v27, 2  ;;  %v1565_v55 = vmax.f32 %v1563_v20, %v1564_v31 }
 0x44c   :  { %v1612_v35 = vmax.f32 %v1610_v61, %v1611_v37  ;;  %v1625_v59 = vmax.f32 %v1623_v56, %v1624_v2  ;;  %v1636_v53 = vmax.f32 %v1634_v8, %v1635_v54  ;;  %v1581_v52 = vrot.slane %v1580_v40, 1  ;;  %v3247_v54 = vld [vmem:[%s5421_s0 + $0x78] sm:$0xff]  }
 0x44d   :  { %v1637_v1 = vsel %vm80_vm1, %v4772_v39, -inf  ;;  %v1639_v25 = vsel %vm80_vm1, %v4776_v17, -inf  ;;  %v1597_v45 = vmax.f32 %v1595_v27, %v1596_v16  ;;  %v1465_v43 = vrot.slane %v4744_v36, 1 }
 0x44e   :  { %v1613_v32 = vrot.slane %v1612_v35, 2  ;;  %v1627_v47 = vmax.f32 %v1625_v59, %v1626_v30  ;;  %v1638_v28 = vmax.f32 %v1636_v53, %v1637_v1  ;;  %v1641_v12 = vsel %vm80_vm1, %v1513_v46, -inf  ;;  %v3246_v30 = vld [vmem:[%s5421_s0 + $0x70] sm:$0xff]  }
 0x44f   :  { %v1659_v63 = vsel %vm1069_vm2, %v4634_v19, %v4631_v18  ;;  %v1675_v49 = vsel %vm1069_vm2, %v1548_v34, %v1531_v33  ;;  %v1598_v57 = vrot.slane %v1597_v45, 1  ;;  %v1582_v11 = vmax.f32 %v1580_v40, %v1581_v52 }
 0x450   :  { %v1614_v58 = vmax.f32 %v1612_v35, %v1613_v32  ;;  %v1628_v39 = vrot.slane %v1627_v47, 4  ;;  %v1640_v42 = vmax.f32 %v1638_v28, %v1639_v25  ;;  %v1643_v17 = vsel %vm80_vm1, %v1514_v14, -inf  ;;  %v5855_v28 = vld [vmem:[#allocation108_spill] sm:$0xff] }
 0x451   :  { %v1660_v51 = vsel %vm1071_vm3, %v4636_v10, %v1659_v63  ;;  %v1676_v13 = vsel %vm1071_vm3, %v1565_v55, %v1675_v49  ;;  %v5849_v21 = vrot.slane %v5848_v6, 1  ;;  %v5851_v9 = vrot.slane %v5850_v7, 1  ;;  %v3248_v63 = vld [vmem:[%s5424_s3] ss:$16 sps:$4 sm:$0xff]   ;;  %v3250_v49 = vld [vmem:[%s5424_s3 + $0x4] ss:$16 sps:$4 sm:$0xff]  }
 0x452   :  { %v1615_v50 = vrot.slane %v1614_v58, 1  ;;  %v1629_v18 = vmax.f32 %v1627_v47, %v1628_v39  ;;  %v1642_v19 = vmax.f32 %v1640_v42, %v1641_v12  ;;  %v1599_v38 = vmax.f32 %v1597_v45, %v1598_v57  ;;  %v5857_v12 = vld [vmem:[#allocation110_spill] sm:$0xff]  ;;  %2340 = vmatprep.subr.bf16.mxu1 %v3250_v49  ;;  %v3256_v42 = vld [vmem:[%s5424_s3 + $0xc] ss:$16 sps:$4 sm:$0xff]  }
 0x453   :  { %v1432_v44 = vmax.f32 %v5848_v6, %v5849_v21  ;;  %v1449_v15 = vmax.f32 %v5850_v7, %v5851_v9  ;;  %v1661_v23 = vsel %vm1073_vm4, %v5852_v26, %v1660_v51  ;;  %v1677_v41 = vsel %vm1073_vm4, %v1582_v11, %v1676_v13  ;;  %v3253_v57 = vld [vmem:[%s5424_s3 + $0x24] ss:$16 sps:$4 sm:$0xff]   ;;  %2341 = vmatpush1.bf16.msra.mxu1 %v3248_v63  ;;  %v3251_v39 = vld [vmem:[%s5424_s3 + $0x20] ss:$16 sps:$4 sm:$0xff]   ;;  %v1693_v6 = vld [vmem:[%s5423_s2 + $0x68] sm:$0xff] }
 0x454   :  { %v1616_v10 = vmax.f32 %v1614_v58, %v1615_v50  ;;  %v1630_v24 = vrot.slane %v1629_v18, 2  ;;  %v1644_v22 = vmax.f32 %v1642_v19, %v1643_v17  ;;  %v1662_v46 = vsel %vm1075_vm5, %v5853_v3, %v1661_v23  ;;  %2342 = vmatprep.subr.bf16.mxu1 %v3253_v57  ;;  %v1692_v11 = vld [vmem:[%s5423_s2 + $0x60] sm:$0xff]  ;;  %v5858_v7 = vld [vmem:[#allocation13_spill] sm:$0xff]  ;;  %v3277_v23 = vld [vmem:[#allocation2 + $0x114] ss:$8 sps:$4 sm:$0xff]  }
 0x455   :  { %v1466_v0 = vmax.f32 %v4744_v36, %v1465_v43  ;;  %v1663_v20 = vsel %vm1077_vm6, %v1432_v44, %v1662_v46  ;;  %v1678_v60 = vsel %vm1075_vm5, %v1599_v38, %v1677_v41  ;;  %v5854_v16 = vmov 0.0   ;;  %v5856_v43 = vld [vmem:[#allocation109_spill] sm:$0xff]  ;;  %v5862_v3 = vld [vmem:[#allocation14_spill] sm:$0xff] }
 0x456   :  { %v1631_v5 = vmax.f32 %v1629_v18, %v1630_v24  ;;  %v1645_v61 = vrot.slane %v1644_v22, 4  ;;  %v1664_v29 = vsel %vm1079_vm7, %v1449_v15, %v1663_v20  ;;  %v1679_v62 = vsel %vm1077_vm6, %v1616_v10, %v1678_v60  ;;  %v3269_v17 = vld [vmem:[#allocation2 + $0x100] ss:$8 sps:$4 sm:$0xff]   ;;  %v3271_v51 = vld [vmem:[#allocation2 + $0x104] ss:$8 sps:$4 sm:$0xff]   ;;  %v1694_v60 = vld [vmem:[%s5423_s2 + $0x70] sm:$0xff] }
 0x457   :  { %v1665_v14 = vsel %vm1081_vm8, %v1466_v0, %v1664_v29  ;;  %v5594_v58 = vmov 0   ;;  %2343 = vmatpush1.bf16.msra.mxu1 %v3251_v39  ;;  %v5859_v15 = vld [vmem:[#allocation12_spill] sm:$0xff]  ;;  %v3275_v26 = vld [vmem:[#allocation2 + $0x110] ss:$8 sps:$4 sm:$0xff]  }
 0x458   :  { %v1632_v31 = vrot.slane %v1631_v5, 1  ;;  %v1646_v40 = vmax.f32 %v1644_v22, %v1645_v61  ;;  %2372 = vmatprep.mubr.bf16.mxu1 %v5594_v58  ;;  %2383 = vmatprep.subr.bf16.mxu1 %v3256_v42  ;;  %v5860_v41 = vld [vmem:[#allocation21_spill] sm:$0xff]  ;;  %v5861_v24 = vld [vmem:[#allocation15_spill] sm:$0xff]  ;;  %v5863_v0 = vld [vmem:[#allocation20_spill] sm:$0xff] }
 0x459   :  { %v5865_v29 = vld [vmem:[#allocation26_spill] sm:$0xff]  ;;  %v5872_v49 = vld [vmem:[#allocation61_spill] sm:$0xff] }
 0x45a   :  { %v1633_v2 = vmax.f32 %v1631_v5, %v1632_v31  ;;  %v1647_v33 = vrot.slane %v1646_v40, 2  ;;  %v5864_v5 = vld [vmem:[#allocation27_spill] sm:$0xff] }
 0x45c   :  { %v1648_v27 = vmax.f32 %v1646_v40, %v1647_v33  ;;  %v1680_v37 = vsel %vm1079_vm7, %v1633_v2, %v1679_v62  ;;  %v5867_v40 = vld [vmem:[#allocation40_spill] sm:$0xff]  ;;  %v1695_v33 = vld [vmem:[%s5423_s2 + $0x78] sm:$0xff] }
 0x45e   :  { %v1649_v36 = vrot.slane %v1648_v27, 1 }
 0x460   :  { %v1650_v56 = vmax.f32 %v1648_v27, %v1649_v36  ;;  %v5868_v27 = vld [vmem:[#allocation35_spill] sm:$0xff] }
 0x462   :  { %v1681_v34 = vsel %vm1081_vm8, %v1650_v56, %v1680_v37 }
 0x463   :  { %v1683_v8 = vpack.c.bf16 %v1681_v34, %v1665_v14  ;;  %v5866_v14 = vld [vmem:[#allocation32_spill] sm:$0xff] }
 0x465   :  { %3190 = vmatmul.mubr.msk.bf16.vlgmr.msra.gmra.mrb[16].mxu0 %vm80_vm1, %v1683_v8 }
 0x466   :  { %3194 = vmatpush3.bf16.msra.mxu0 %v3246_v30  ;;  %3197 = vmatprep.mubr.msk.bf16.mxu0 %vm3411_vm0, %v5854_v16  ;;  %v3281_v30 = vld [vmem:[#allocation2 + $0x120] ss:$8 sps:$4 sm:$0xff]  }
 0x467   :  { %3195 = vmatprep.subr.bf16.mxu0 %v5854_v16 }
 0x46a   :  { %3196 = vmatpush3.bf16.msra.mxu0 %v3247_v54 }
 0x46b   :  { %3201 = vmatprep.subr.bf16.mxu0 %v5854_v16 }
 0x46d   :  { %3198 = vmatmul.mubr.msk.bf16.vlgmr.msra.gmra.mrb[20].mxu0 %vm80_vm1, %v1683_v8 }
 0x46e   :  { %3205 = vmatprep.mubr.msk.bf16.mxu0 %vm3411_vm0, %v5854_v16 }
 0x538   :  { %v1747_v35 = vpop.f32.mrb[16].mxu0 }
 0x539   :  { %v3191_v59 = vpop.f32.mrb[17].mxu0 }
 0x53a   :  { %v1750_v53 = vpop.f32.mrb[18].mxu0 }
 0x53b   :  { %v1807_v55 = vpack.c.bf16 %v1750_v53, %v1747_v35  ;;  %v3192_v52 = vpop.f32.mrb[19].mxu0  ;;  %v3283_v53 = vld [vmem:[#allocation2 + $0x124] ss:$8 sps:$4 sm:$0xff]  }
 0x53d   :  { %3202 = vmatpush3.bf16.msra.mxu0 %v1807_v55 }
 0x53e   :  { %3203 = vmatprep.subr.bf16.mxu0 %v5854_v16 }
 0x540   :  { %v1800_v1 = vpop.f32.mrb[20].mxu0 }
 0x541   :  { %v3199_v25 = vpop.f32.mrb[21].mxu0 }
 0x542   :  { %v1803_v45 = vpop.f32.mrb[22].mxu0 }
 0x543   :  { %v1808_v32 = vpack.c.bf16 %v1803_v45, %v1800_v1  ;;  %v3200_v47 = vpop.f32.mrb[23].mxu0  ;;  %v5869_v1 = vld [vmem:[#allocation51_spill] sm:$0xff] }
 0x545   :  { %3204 = vmatpush3.bf16.msra.mxu0 %v1808_v32 }
 0x546   :  { %2878 = vmatprep.subr.bf16.mxu0 %v3271_v51 }
 0x548   :  { %3206 = vmatmul.mubr.msk.bf16.vlgmr.msra.gmra.mrb[24].mxu0 %vm80_vm1, %v5855_v28  ;;  %v5870_v28 = vld [vmem:[#allocation43_spill] sm:$0xff] }
 0x549   :  { %3209 = vmatprep.mubr.msk.bf16.mxu0 %vm3411_vm0, %v5854_v16  ;;  %2879 = vmatpush1.bf16.msra.mxu0 %v3269_v17  ;;  %v5873_v17 = vld [vmem:[#allocation25_spill] sm:$0xff] }
 0x54a   :  { %2880 = vmatprep.subr.bf16.mxu0 %v3277_v23  ;;  %v3289_v23 = vld [vmem:[#allocation2 + $0x134] ss:$8 sps:$4 sm:$0xff]  }
 0x54d   :  { %2881 = vmatpush1.bf16.msra.mxu0 %v3275_v26  ;;  %v3287_v26 = vld [vmem:[#allocation2 + $0x130] ss:$8 sps:$4 sm:$0xff]  }
 0x54e   :  { %2882 = vmatprep.subr.bf16.mxu0 %v3283_v53  ;;  %v3295_v53 = vld [vmem:[#allocation2 + $0x144] ss:$8 sps:$4 sm:$0xff]  }
 0x550   :  { %3210 = vmatmul.mubr.msk.bf16.gmra.mrb[28].mxu0 %vm80_vm1, %v5856_v43 }
 0x551   :  { %3213 = vmatprep.mubr.msk.bf16.mxu0 %vm3411_vm0, %v5854_v16  ;;  %2883 = vmatpush1.bf16.msra.mxu0 %v3281_v30  ;;  %v1697_v30 = vld [vmem:[%s5423_s2 + $0x88] sm:$0xff] }
 0x552   :  { %2884 = vmatprep.subr.bf16.mxu0 %v3289_v23 }
 0x555   :  { %2885 = vmatpush1.bf16.msra.mxu0 %v3287_v26  ;;  %v5889_v26 = vld [vmem:[#allocation56_spill] sm:$0xff] }
 0x556   :  { %2886 = vmatprep.subr.bf16.mxu0 %v3295_v53 }
 0x558   :  { %3214 = vmatmul.mubr.msk.bf16.gmra.mrb[32].mxu0 %vm80_vm1, %v5857_v12  ;;  %v5871_v12 = vld [vmem:[#allocation50_spill] sm:$0xff] }
 0x61b   :  { %v1843_v13 = vpop.f32.mrb[24].mxu0 }
 0x61c   :  { %v4921_v21 = vadd.f32 %v1843_v13, %v1692_v11  ;;  %v3207_v44 = vpop.f32.mrb[25].mxu0  ;;  %v5874_v13 = vld [vmem:[#allocation24_spill] sm:$0xff] }
 0x61d   :  { %v1846_v50 = vpop.f32.mrb[26].mxu0 }
 0x61e   :  { %v4923_v18 = vadd.f32 %v1846_v50, %v1693_v6  ;;  %v3208_v19 = vpop.f32.mrb[27].mxu0  ;;  %v1866_v9 = vadd.f32 %v4921_v21, %v5858_v7  ;;  %v1872_v38 = vadd.f32 %v4921_v21, %v5859_v15  ;;  %v1878_v10 = vadd.f32 %v4921_v21, %v5860_v41  ;;  %v5875_v50 = vld [vmem:[#allocation33_spill] sm:$0xff]  ;;  %v5876_v7 = vld [vmem:[#allocation60_spill] sm:$0xff]  ;;  %v5877_v41 = vld [vmem:[#allocation39_spill] sm:$0xff] }
 0x61f   :  { %v1884_v61 = vadd.f32 %v4921_v21, %v5864_v5  ;;  %v1890_v31 = vadd.f32 %v4921_v21, %v5866_v14  ;;  %v1896_v2 = vadd.f32 %v4921_v21, %v5867_v40  ;;  %v4963_v25 = vadd.f32 %v4921_v21, %v5869_v1 }
 0x620   :  { %v1867_v22 = vadd.f32 %v4923_v18, %v5861_v24  ;;  %v1873_v46 = vadd.f32 %v4923_v18, %v5862_v3  ;;  %v1879_v20 = vadd.f32 %v4923_v18, %v5863_v0  ;;  %v1885_v62 = vadd.f32 %v4923_v18, %v5865_v29  ;;  %v5878_v24 = vld [vmem:[#allocation38_spill] sm:$0xff]  ;;  %v5879_v3 = vld [vmem:[#allocation41_spill] sm:$0xff] }
 0x621   :  { %v1891_v37 = vadd.f32 %v4923_v18, %v5868_v27  ;;  %v1914_v36 = vsel %vm80_vm1, %v1866_v9, -inf  ;;  %v1931_v34 = vsel %vm80_vm1, %v1872_v38, -inf  ;;  %v1948_v35 = vsel %vm80_vm1, %v1878_v10, -inf }
 0x622   :  { %v1915_v56 = vsel %vm80_vm1, %v1867_v22, -inf  ;;  %v1932_v16 = vsel %vm80_vm1, %v1873_v46, -inf  ;;  %v1949_v59 = vsel %vm80_vm1, %v1879_v20, -inf  ;;  %v4967_v43 = vadd.f32 %v4923_v18, %v5870_v28  ;;  %v1696_v20 = vld [vmem:[%s5423_s2 + $0x80] sm:$0xff] }
 0x623   :  { %v1851_v8 = vpop.f32.mrb[28].mxu0  ;;  %v1916_v54 = vmax.f32 %v1914_v36, %v1915_v56  ;;  %v1933_v45 = vmax.f32 %v1931_v34, %v1932_v16  ;;  %v1950_v32 = vmax.f32 %v1948_v35, %v1949_v59  ;;  %v4971_v63 = vadd.f32 %v4923_v18, %v5871_v12  ;;  %v3293_v56 = vld [vmem:[#allocation2 + $0x140] ss:$8 sps:$4 sm:$0xff]  }
 0x624   :  { %v4959_v55 = vadd.f32 %v1851_v8, %v1694_v60  ;;  %v3211_v52 = vpop.f32.mrb[29].mxu0  ;;  %v4975_v57 = vadd.f32 %v4921_v21, %v5872_v49  ;;  %v4978_v39 = vsel %vm80_vm1, %v1884_v61, -inf  ;;  %v4987_v44 = vsel %vm80_vm1, %v1885_v62, -inf  ;;  %v5880_v60 = vld [vmem:[#allocation49_spill] sm:$0xff]  ;;  %v5881_v61 = vld [vmem:[#allocation48_spill] sm:$0xff]  ;;  %v5882_v62 = vld [vmem:[#allocation58_spill] sm:$0xff]  ;;  %2887 = vmatpush1.bf16.msra.mxu0 %v3293_v56 }
 0x625   :  { %v1854_v47 = vpop.f32.mrb[30].mxu0  ;;  %v4993_v9 = vadd.f32 %v4923_v18, %v5876_v7  ;;  %v4996_v15 = vsel %vm80_vm1, %v1890_v31, -inf  ;;  %v4999_v38 = vsel %vm80_vm1, %v1891_v37, -inf  ;;  %v5008_v0 = vsel %vm80_vm1, %v1896_v2, -inf  ;;  %v5883_v31 = vld [vmem:[#allocation71_spill] sm:$0xff]  ;;  %v5888_v7 = vld [vmem:[#allocation57_spill] sm:$0xff] }
 0x626   :  { %v4980_v42 = vadd.f32 %v1854_v47, %v1695_v33  ;;  %v3212_v11 = vpop.f32.mrb[31].mxu0  ;;  %v1868_v51 = vadd.f32 %v4959_v55, %v5873_v17  ;;  %v1874_v6 = vadd.f32 %v4959_v55, %v5874_v13  ;;  %v1880_v19 = vadd.f32 %v4959_v55, %v5875_v50  ;;  %v5884_v2 = vld [vmem:[#allocation59_spill] sm:$0xff]  ;;  %v5885_v47 = vld [vmem:[#allocation68_spill] sm:$0xff] }
 0x627   :  { %v1886_v46 = vadd.f32 %v4959_v55, %v5879_v3  ;;  %v5017_v29 = vadd.f32 %v4959_v55, %v5881_v61  ;;  %v5021_v14 = vadd.f32 %v4959_v55, %v5882_v62  ;;  %v5025_v40 = vadd.f32 %v4959_v55, %v5883_v31  ;;  %v5886_v17 = vld [vmem:[#allocation76_spill] sm:$0xff]  ;;  %v5892_v61 = vld [vmem:[#allocation75_spill] sm:$0xff]  ;;  %v5893_v31 = vld [vmem:[#allocation74_spill] sm:$0xff] }
 0x628   :  { %v1869_v10 = vadd.f32 %v4980_v42, %v5877_v41  ;;  %v1875_v22 = vadd.f32 %v4980_v42, %v5878_v24  ;;  %v1881_v5 = vadd.f32 %v4980_v42, %v5880_v60  ;;  %v1887_v33 = vadd.f32 %v4980_v42, %v5884_v2  ;;  %v3299_v41 = vld [vmem:[#allocation2 + $0x150] ss:$8 sps:$4 sm:$0xff]   ;;  %v3301_v60 = vld [vmem:[#allocation2 + $0x154] ss:$8 sps:$4 sm:$0xff]  }
 0x629   :  { %v1917_v27 = vsel %vm80_vm1, %v1868_v51, -inf  ;;  %v1934_v36 = vsel %vm80_vm1, %v1874_v6, -inf  ;;  %v1951_v59 = vsel %vm80_vm1, %v1880_v19, -inf  ;;  %v1893_v28 = vadd.f32 %v4980_v42, %v5885_v47  ;;  %2888 = vmatprep.subr.bf16.mxu0 %v3301_v60 }
 0x62a   :  { %v1919_v37 = vsel %vm80_vm1, %v1869_v10, -inf  ;;  %v1918_v8 = vmax.f32 %v1916_v54, %v1917_v27  ;;  %v1935_v16 = vmax.f32 %v1933_v45, %v1934_v36  ;;  %v1936_v35 = vsel %vm80_vm1, %v1875_v22, -inf  ;;  %v5887_v45 = vld [vmem:[#allocation87_spill] sm:$0xff]  ;;  %v5891_v10 = vld [vmem:[#allocation69_spill] sm:$0xff]  ;;  %2889 = vmatpush1.bf16.msra.mxu0 %v3299_v41 }
 0x62b   :  { %v1859_v34 = vpop.f32.mrb[32].mxu0  ;;  %v1952_v12 = vmax.f32 %v1950_v32, %v1951_v59  ;;  %v1967_v49 = vmax.f32 %v4978_v39, %v4987_v44  ;;  %v5045_v54 = vadd.f32 %v4980_v42, %v5886_v17  ;;  %v5049_v51 = vadd.f32 %v4980_v42, %v5887_v45  ;;  %v5890_v44 = vld [vmem:[#allocation79_spill] sm:$0xff]  ;;  %v5894_v27 = vld [vmem:[#allocation85_spill] sm:$0xff] }
 0x62c   :  { %v5037_v52 = vadd.f32 %v1859_v34, %v1696_v20  ;;  %v3215_v1 = vpop.f32.mrb[33].mxu0  ;;  %v1920_v13 = vmax.f32 %v1918_v8, %v1919_v37  ;;  %v1937_v6 = vmax.f32 %v1935_v16, %v1936_v35  ;;  %v5059_v23 = vadd.f32 %v4959_v55, %v5890_v44  ;;  %v5895_v36 = vld [vmem:[#allocation77_spill] sm:$0xff]  ;;  %v5896_v34 = vld [vmem:[#allocation91_spill] sm:$0xff]  ;;  %v5899_v16 = vld [vmem:[#allocation90_spill] sm:$0xff] }
 0x62d   :  { %v1862_v11 = vpop.f32.mrb[34].mxu0  ;;  %v1953_v22 = vsel %vm80_vm1, %v1881_v5, -inf  ;;  %v1968_v3 = vsel %vm80_vm1, %v1886_v46, -inf  ;;  %v1970_v20 = vsel %vm80_vm1, %v1887_v33, -inf  ;;  %v5898_v33 = vld [vmem:[#allocation97_spill] sm:$0xff] }
 0x62e   :  { %v5051_v50 = vadd.f32 %v1862_v11, %v1697_v30  ;;  %v3216_v19 = vpop.f32.mrb[35].mxu0  ;;  %v1870_v32 = vadd.f32 %v5037_v52, %v5888_v7  ;;  %v1876_v39 = vadd.f32 %v5037_v52, %v5889_v26  ;;  %v1882_v24 = vadd.f32 %v5037_v52, %v5891_v10  ;;  %v5897_v30 = vld [vmem:[#allocation84_spill] sm:$0xff]  ;;  %v5900_v59 = vld [vmem:[#allocation101_spill] sm:$0xff] }
 0x62f   :  { %v1888_v56 = vadd.f32 %v5037_v52, %v5895_v36  ;;  %v1894_v46 = vadd.f32 %v5037_v52, %v5897_v30  ;;  %v1900_v35 = vadd.f32 %v5037_v52, %v5899_v16  ;;  %v3305_v17 = vld [vmem:[#allocation2 + $0x160] ss:$8 sps:$4 sm:$0xff]   ;;  %v1954_v26 = vmax.f32 %v1952_v12, %v1953_v22  ;;  %v3307_v44 = vld [vmem:[#allocation2 + $0x164] ss:$8 sps:$4 sm:$0xff]  }
 0x630   :  { %v1871_v62 = vadd.f32 %v5051_v50, %v5892_v61  ;;  %v1877_v2 = vadd.f32 %v5051_v50, %v5893_v31  ;;  %v1883_v37 = vadd.f32 %v5051_v50, %v5894_v27  ;;  %v1889_v5 = vadd.f32 %v5051_v50, %v5896_v34  ;;  %2890 = vmatprep.subr.bf16.mxu0 %v3307_v44  ;;  %v3317_v16 = vld [vmem:[#allocation2 + $0x180] ss:$8 sps:$4 sm:$0xff]  }
 0x631   :  { %v1895_v8 = vadd.f32 %v5051_v50, %v5898_v33  ;;  %v1901_v53 = vadd.f32 %v5051_v50, %v5900_v59  ;;  %v1921_v1 = vsel %vm80_vm1, %v1870_v32, -inf  ;;  %v1938_v11 = vsel %vm80_vm1, %v1876_v39, -inf  ;;  %2891 = vmatpush1.bf16.msra.mxu0 %v3305_v17 }
 0x632   :  { %v1923_v47 = vsel %vm80_vm1, %v1871_v62, -inf  ;;  %v1922_v45 = vmax.f32 %v1920_v13, %v1921_v1  ;;  %v1939_v19 = vmax.f32 %v1937_v6, %v1938_v11  ;;  %v1940_v7 = vsel %vm80_vm1, %v1877_v2, -inf  ;;  %v5901_v11 = vld [vmem:[#allocation96_spill] sm:$0xff] }
 0x633   :  { %v1955_v10 = vsel %vm80_vm1, %v1882_v24, -inf  ;;  %v1957_v60 = vsel %vm80_vm1, %v1883_v37, -inf  ;;  %v1969_v61 = vmax.f32 %v1967_v49, %v1968_v3  ;;  %v1972_v31 = vsel %vm80_vm1, %v1888_v56, -inf  ;;  %v3311_v24 = vld [vmem:[#allocation2 + $0x170] ss:$8 sps:$4 sm:$0xff]  }
 0x634   :  { %v1924_v32 = vmax.f32 %v1922_v45, %v1923_v47  ;;  %v1941_v27 = vmax.f32 %v1939_v19, %v1940_v7  ;;  %v1956_v62 = vmax.f32 %v1954_v26, %v1955_v10  ;;  %v1974_v39 = vsel %vm80_vm1, %v1889_v5, -inf  ;;  %v3313_v49 = vld [vmem:[#allocation2 + $0x174] ss:$8 sps:$4 sm:$0xff]   ;;  %v5902_v7 = vld [vmem:[#allocation105_spill] sm:$0xff] }
 0x635   :  { %v1971_v41 = vmax.f32 %v1969_v61, %v1970_v20  ;;  %v1984_v13 = vmax.f32 %v4996_v15, %v4999_v38  ;;  %v1985_v12 = vsel %vm80_vm1, %v5017_v29, -inf  ;;  %v1987_v6 = vsel %vm80_vm1, %v1893_v28, -inf  ;;  %2892 = vmatprep.subr.bf16.mxu0 %v3313_v49 }
 0x636   :  { %v1925_v22 = vrot.slane %v1924_v32, 4  ;;  %v1942_v3 = vrot.slane %v1941_v27, 4  ;;  %v1958_v2 = vmax.f32 %v1956_v62, %v1957_v60  ;;  %v1989_v37 = vsel %vm80_vm1, %v1894_v46, -inf  ;;  %2893 = vmatpush1.bf16.msra.mxu0 %v3311_v24 }
 0x637   :  { %v1973_v36 = vmax.f32 %v1971_v41, %v1972_v31  ;;  %v1986_v56 = vmax.f32 %v1984_v13, %v1985_v12  ;;  %v1991_v20 = vsel %vm80_vm1, %v1895_v8, -inf  ;;  %v2000_v15 = vsel %vm80_vm1, %v4967_v43, -inf  ;;  %v3319_v8 = vld [vmem:[#allocation2 + $0x184] ss:$8 sps:$4 sm:$0xff]  }
 0x638   :  { %v1926_v38 = vmax.f32 %v1924_v32, %v1925_v22  ;;  %v1943_v29 = vmax.f32 %v1941_v27, %v1942_v3  ;;  %v1959_v34 = vrot.slane %v1958_v2, 4  ;;  %v2001_v28 = vmax.f32 %v5008_v0, %v2000_v15  ;;  %2894 = vmatprep.subr.bf16.mxu0 %v3319_v8  ;;  %v3323_v32 = vld [vmem:[#allocation2 + $0x190] ss:$8 sps:$4 sm:$0xff]   ;;  %v3325_v27 = vld [vmem:[#allocation2 + $0x194] ss:$8 sps:$4 sm:$0xff]  }
 0x639   :  { %v1975_v5 = vmax.f32 %v1973_v36, %v1974_v39  ;;  %v1988_v30 = vmax.f32 %v1986_v56, %v1987_v6  ;;  %v2002_v33 = vsel %vm80_vm1, %v5021_v14, -inf  ;;  %v2004_v46 = vsel %vm80_vm1, %v5045_v54, -inf  ;;  %v3331_v15 = vld [vmem:[#allocation2 + $0x1a4] ss:$8 sps:$4 sm:$0xff]  }
 0x63a   :  { %v1927_v59 = vrot.slane %v1926_v38, 2  ;;  %v1944_v1 = vrot.slane %v1943_v29, 2  ;;  %v1960_v43 = vmax.f32 %v1958_v2, %v1959_v34  ;;  %v2003_v47 = vmax.f32 %v2001_v28, %v2002_v33  ;;  %2895 = vmatpush1.bf16.msra.mxu0 %v3317_v16 }
 0x63b   :  { %v1906_v17 = vadd.f32 %v5037_v52, %v5901_v11  ;;  %v1976_v45 = vrot.slane %v1975_v5, 4  ;;  %v1990_v0 = vmax.f32 %v1988_v30, %v1989_v37  ;;  %v2006_v19 = vsel %vm80_vm1, %v1900_v35, -inf  ;;  %2896 = vmatprep.subr.bf16.mxu0 %v3325_v27 }
 0x63c   :  { %v1907_v14 = vadd.f32 %v5051_v50, %v5902_v7  ;;  %v1928_v26 = vmax.f32 %v1926_v38, %v1927_v59  ;;  %v1961_v54 = vrot.slane %v1960_v43, 2  ;;  %v2005_v44 = vmax.f32 %v2003_v47, %v2004_v46  ;;  %v5905_v59 = vld [vmem:[#allocation107_spill] sm:$0xff] }
 0x63d   :  { %v1977_v10 = vmax.f32 %v1975_v5, %v1976_v45  ;;  %v1992_v60 = vmax.f32 %v1990_v0, %v1991_v20  ;;  %v2008_v61 = vsel %vm80_vm1, %v1901_v53, -inf  ;;  %v2017_v31 = vsel %vm80_vm1, %v4971_v63, -inf  ;;  %v5903_v53 = vld [vmem:[#allocation93_spill] sm:$0xff]  ;;  %v5904_v63 = vld [vmem:[#allocation100_spill] sm:$0xff]  ;;  %v3337_v45 = vld [vmem:[#allocation2 + $0x1b4] ss:$8 sps:$4 sm:$0xff]  }
 0x63e   :  { %v1945_v62 = vmax.f32 %v1943_v29, %v1944_v1  ;;  %v1962_v39 = vmax.f32 %v1960_v43, %v1961_v54  ;;  %v2007_v35 = vmax.f32 %v2005_v44, %v2006_v19  ;;  %v2016_v41 = vsel %vm80_vm1, %v4963_v25, -inf  ;;  %2897 = vmatpush1.bf16.msra.mxu0 %v3323_v32  ;;  %v3329_v20 = vld [vmem:[#allocation2 + $0x1a0] ss:$8 sps:$4 sm:$0xff]  }
 0x63f   :  { %v1978_v13 = vrot.slane %v1977_v10, 2  ;;  %v1993_v12 = vrot.slane %v1992_v60, 4  ;;  %v2018_v6 = vmax.f32 %v2016_v41, %v2017_v31  ;;  %v2019_v24 = vsel %vm80_vm1, %v5025_v40, -inf  ;;  %2898 = vmatprep.subr.bf16.mxu0 %v3331_v15  ;;  %v5910_v32 = vld [vmem:[#allocation17_spill] sm:$0xff] }
 0x640   :  { %v1911_v49 = vadd.f32 %v4980_v42, %v5903_v53  ;;  %v1912_v22 = vadd.f32 %v5037_v52, %v5904_v63  ;;  %v1929_v3 = vrot.slane %v1928_v26, 1  ;;  %v2009_v2 = vmax.f32 %v2007_v35, %v2008_v61  ;;  %v5912_v41 = vld [vmem:[#allocation29_spill] sm:$0xff] }
 0x641   :  { %v1979_v37 = vmax.f32 %v1977_v10, %v1978_v13  ;;  %v1994_v36 = vmax.f32 %v1992_v60, %v1993_v12  ;;  %v2020_v56 = vmax.f32 %v2018_v6, %v2019_v24  ;;  %v2021_v25 = vsel %vm80_vm1, %v5049_v51, -inf  ;;  %v5913_v13 = vld [vmem:[#allocation42_spill] sm:$0xff]  ;;  %v5914_v6 = vld [vmem:[#allocation63_spill] sm:$0xff] }
 0x642   :  { %v1946_v38 = vrot.slane %v1945_v62, 1  ;;  %v1963_v40 = vrot.slane %v1962_v39, 1  ;;  %v2010_v29 = vrot.slane %v2009_v2, 4  ;;  %v2023_v34 = vsel %vm80_vm1, %v1906_v17, -inf  ;;  %2899 = vmatpush1.bf16.msra.mxu0 %v3329_v20  ;;  %v3335_v17 = vld [vmem:[#allocation2 + $0x1b0] ss:$8 sps:$4 sm:$0xff]  }
 0x643   :  { %v1980_v28 = vrot.slane %v1979_v37, 1  ;;  %v1995_v5 = vrot.slane %v1994_v36, 2  ;;  %v2022_v30 = vmax.f32 %v2020_v56, %v2021_v25  ;;  %v2025_v33 = vsel %vm80_vm1, %v1907_v14, -inf  ;;  %2900 = vmatprep.subr.bf16.mxu0 %v3337_v45  ;;  %v5918_v56 = vld [vmem:[#allocation18_spill] sm:$0xff]  ;;  %v5919_v20 = vld [vmem:[#allocation28_spill] sm:$0xff] }
 0x644   :  { %v2011_v46 = vmax.f32 %v2009_v2, %v2010_v29  ;;  %v2033_v16 = vsel %vm80_vm1, %v4975_v57, -inf  ;;  %v2034_v51 = vsel %vm80_vm1, %v4993_v9, -inf  ;;  %v2036_v8 = vsel %vm80_vm1, %v5059_v23, -inf  ;;  %v5920_v29 = vld [vmem:[#allocation45_spill] sm:$0xff]  ;;  %v5928_v45 = vld [vmem:[#allocation70_spill] sm:$0xff] }
 0x645   :  { %v1913_v1 = vadd.f32 %v5051_v50, %v5905_v59  ;;  %v1996_v43 = vmax.f32 %v1994_v36, %v1995_v5  ;;  %v2024_v47 = vmax.f32 %v2022_v30, %v2023_v34  ;;  %v2035_v11 = vmax.f32 %v2033_v16, %v2034_v51  ;;  %v5922_v30 = vld [vmem:[#allocation81_spill] sm:$0xff]  ;;  %v5924_v51 = vld [vmem:[#allocation22_spill] sm:$0xff] }
 0x646   :  { %v5134_v0 = vmax.f32 %v1928_v26, %v1929_v3  ;;  %v2012_v19 = vrot.slane %v2011_v46, 2  ;;  %v2038_v57 = vsel %vm80_vm1, %v1911_v49, -inf  ;;  %v5137_v7 = vmax.f32 %v1945_v62, %v1946_v38  ;;  %2901 = vmatpush1.bf16.msra.mxu0 %v3335_v17  ;;  %v5911_v62 = vld [vmem:[#allocation16_spill] sm:$0xff]  ;;  %v5925_v59 = vld [vmem:[#allocation34_spill] sm:$0xff] }
 0x647   :  { %v1997_v9 = vrot.slane %v1996_v43, 1  ;;  %v2026_v14 = vmax.f32 %v2024_v47, %v2025_v33  ;;  %v2037_v54 = vmax.f32 %v2035_v11, %v2036_v8  ;;  %v5139_v23 = vmax.f32 %v1962_v39, %v1963_v40  ;;  %v5927_v11 = vld [vmem:[#allocation53_spill] sm:$0xff] }
 0x648   :  { %5906 = vst [vmem:[#allocation102_spill] sm:$0xff] %v5137_v7  ;;  %v5141_v44 = vmax.f32 %v1979_v37, %v1980_v28  ;;  %v5143_v10 = vmax.f32 %v2011_v46, %v2012_v19  ;;  %v2040_v60 = vsel %vm80_vm1, %v1912_v22, -inf  ;;  %v2042_v31 = vsel %vm80_vm1, %v1913_v1, -inf  ;;  %v5916_v22 = vld [vmem:[#allocation78_spill] sm:$0xff]  ;;  %v5917_v37 = vld [vmem:[#allocation19_spill] sm:$0xff] }
 0x649   :  { %5907 = vst [vmem:[#allocation106_spill] sm:$0xff] %v5139_v23  ;;  %v2027_v61 = vrot.slane %v2026_v14, 4  ;;  %v2039_v26 = vmax.f32 %v2037_v54, %v2038_v57  ;;  %v2050_v27 = vadd.f32 %v4921_v21, %v5910_v32  ;;  %v2051_v35 = vadd.f32 %v4923_v18, %v5911_v62  ;;  %v5921_v28 = vld [vmem:[#allocation62_spill] sm:$0xff]  ;;  %v5923_v46 = vld [vmem:[#allocation23_spill] sm:$0xff]  ;;  %v5933_v62 = vld [vmem:[#allocation65_spill] sm:$0xff] }
 0x64a   :  { %5908 = vst [vmem:[#allocation112_spill] sm:$0xff] %v5141_v44  ;;  %5909 = vst [vmem:[#allocation114_spill] sm:$0xff] %v5143_v10  ;;  %v2052_v39 = vadd.f32 %v4959_v55, %v5912_v41  ;;  %v2053_v12 = vadd.f32 %v4980_v42, %v5913_v13  ;;  %v2054_v24 = vadd.f32 %v5037_v52, %v5914_v6  ;;  %v5929_v57 = vld [vmem:[#allocation86_spill] sm:$0xff]  ;;  %v5934_v13 = vld [vmem:[#allocation80_spill] sm:$0xff] }
 0x64b   :  { %v5157_v53 = vmax.f32 %v1996_v43, %v1997_v9  ;;  %v2028_v49 = vmax.f32 %v2026_v14, %v2027_v61  ;;  %v2041_v63 = vmax.f32 %v2039_v26, %v2040_v60  ;;  %v2055_v3 = vadd.f32 %v5051_v50, %v5916_v22  ;;  %v5930_v14 = vld [vmem:[#allocation31_spill] sm:$0xff]  ;;  %v5931_v60 = vld [vmem:[#allocation30_spill] sm:$0xff]  ;;  %v5932_v26 = vld [vmem:[#allocation44_spill] sm:$0xff] }
 0x64c   :  { %v2056_v36 = vadd.f32 %v4921_v21, %v5917_v37  ;;  %v2057_v25 = vadd.f32 %v4923_v18, %v5918_v56  ;;  %v2058_v15 = vadd.f32 %v4959_v55, %v5919_v20  ;;  %v2059_v34 = vadd.f32 %v4980_v42, %v5920_v29  ;;  %v5936_v37 = vld [vmem:[#allocation37_spill] sm:$0xff]  ;;  %v5937_v20 = vld [vmem:[#allocation36_spill] sm:$0xff]  ;;  %v5956_v44 = vld [vmem:[#allocation82_spill] sm:$0xff] }
 0x64d   :  { %5915 = vst [vmem:[#allocation111_spill] sm:$0xff] %v5157_v53  ;;  %v2029_v38 = vrot.slane %v2028_v49, 2  ;;  %v2043_v40 = vmax.f32 %v2041_v63, %v2042_v31  ;;  %v2060_v5 = vadd.f32 %v5037_v52, %v5921_v28  ;;  %v2061_v33 = vadd.f32 %v5051_v50, %v5922_v30  ;;  %v5938_v29 = vld [vmem:[#allocation52_spill] sm:$0xff]  ;;  %v5939_v30 = vld [vmem:[#allocation73_spill] sm:$0xff] }
 0x64e   :  { %v2062_v16 = vadd.f32 %v4921_v21, %v5923_v46  ;;  %v2063_v8 = vadd.f32 %v4923_v18, %v5924_v51  ;;  %v2064_v1 = vadd.f32 %v4959_v55, %v5925_v59  ;;  %v2065_v17 = vadd.f32 %v4980_v42, %v5927_v11  ;;  %v5940_v51 = vld [vmem:[#allocation89_spill] sm:$0xff] }
 0x64f   :  { %v5180_v43 = vmax.f32 %v2028_v49, %v2029_v38  ;;  %v2044_v47 = vrot.slane %v2043_v40, 4  ;;  %v2066_v19 = vadd.f32 %v5037_v52, %v5928_v45  ;;  %v2067_v9 = vadd.f32 %v5051_v50, %v5929_v57  ;;  %v5935_v49 = vld [vmem:[#allocation92_spill] sm:$0xff]  ;;  %v5942_v45 = vld [vmem:[#allocation47_spill] sm:$0xff] }
 0x650   :  { %v2068_v54 = vadd.f32 %v4921_v21, %v5930_v14  ;;  %v2069_v61 = vadd.f32 %v4923_v18, %v5931_v60  ;;  %v2070_v31 = vadd.f32 %v4959_v55, %v5932_v26  ;;  %v2071_v41 = vadd.f32 %v4980_v42, %v5933_v62  ;;  %v5943_v14 = vld [vmem:[#allocation46_spill] sm:$0xff]  ;;  %v5944_v26 = vld [vmem:[#allocation64_spill] sm:$0xff] }
 0x651   :  { %5926 = vst [vmem:[#allocation113_spill] sm:$0xff] %v5180_v43  ;;  %v2045_v32 = vmax.f32 %v2043_v40, %v2044_v47  ;;  %v2072_v6 = vadd.f32 %v5037_v52, %v5934_v13  ;;  %v2073_v63 = vadd.f32 %v5051_v50, %v5935_v49  ;;  %v2074_v56 = vadd.f32 %v4921_v21, %v5936_v37  ;;  %v5941_v47 = vld [vmem:[#allocation99_spill] sm:$0xff]  ;;  %v5957_v43 = vld [vmem:[#allocation94_spill] sm:$0xff] }
 0x652   :  { %v2075_v38 = vadd.f32 %v4923_v18, %v5937_v20  ;;  %v2076_v40 = vadd.f32 %v4959_v55, %v5938_v29  ;;  %v2077_v46 = vadd.f32 %v4980_v42, %v5939_v30  ;;  %v2078_v59 = vadd.f32 %v5037_v52, %v5940_v51  ;;  %v5945_v13 = vld [vmem:[#allocation83_spill] sm:$0xff] }
 0x653   :  { %v2046_v28 = vrot.slane %v2045_v32, 2  ;;  %v5213_v11 = vadd.f32 %v5051_v50, %v5941_v47  ;;  %v5217_v57 = vadd.f32 %v4921_v21, %v5942_v45  ;;  %v5221_v60 = vadd.f32 %v4923_v18, %v5943_v14  ;;  %v5946_v37 = vld [vmem:[#allocation95_spill] sm:$0xff]  ;;  %v5949_v45 = vld [vmem:[#allocation54_spill] sm:$0xff] }
 0x654   :  { %v5225_v62 = vadd.f32 %v4959_v55, %v5944_v26  ;;  %v5229_v49 = vadd.f32 %v4980_v42, %v5945_v13  ;;  %v5233_v20 = vadd.f32 %v5037_v52, %v5946_v37  ;;  %v5947_v29 = vld [vmem:[#allocation103_spill] sm:$0xff]  ;;  %v5245_v14 = vadd.f32 %v4923_v18, %v5949_v45  ;;  %v5950_v13 = vld [vmem:[#allocation72_spill] sm:$0xff] }
 0x655   :  { %v5237_v30 = vadd.f32 %v5051_v50, %v5947_v29  ;;  %v5948_v51 = vld [vmem:[#allocation55_spill] sm:$0xff]  ;;  %v5247_v26 = vmax.f32 %v2045_v32, %v2046_v28  ;;  %v5251_v58 = vadd.f32 %v4959_v55, %v5950_v13  ;;  %v5951_v37 = vld [vmem:[#allocation88_spill] sm:$0xff]  ;;  %v5952_v29 = vld [vmem:[#allocation98_spill] sm:$0xff]  ;;  %v2098_v10 = vsel %vm80_vm1, %v2050_v27, -inf }
 0x656   :  { %v5241_v47 = vadd.f32 %v4921_v21, %v5948_v51  ;;  %v5255_v22 = vadd.f32 %v4980_v42, %v5951_v37  ;;  %v5259_v2 = vadd.f32 %v5037_v52, %v5952_v29  ;;  %v5953_v51 = vld [vmem:[#allocation104_spill] sm:$0xff]  ;;  %v5954_v45 = vld [vmem:[#allocation67_spill] sm:$0xff]  ;;  %v5955_v28 = vld [vmem:[#allocation66_spill] sm:$0xff]  ;;  %v5275_v37 = vadd.f32 %v4959_v55, %v5956_v44 }
 0x657   :  { %v5263_v53 = vadd.f32 %v5051_v50, %v5953_v51  ;;  %v5267_v32 = vadd.f32 %v4921_v21, %v5954_v45  ;;  %v5271_v13 = vadd.f32 %v4923_v18, %v5955_v28  ;;  %v5279_v29 = vadd.f32 %v4980_v42, %v5957_v43 }
 0x658   :  { %v2099_v51 = vsel %vm80_vm1, %v2051_v35, -inf  ;;  %v2101_v23 = vsel %vm80_vm1, %v2052_v39, -inf  ;;  %v2103_v45 = vsel %vm80_vm1, %v2053_v12, -inf  ;;  %v2105_v18 = vsel %vm80_vm1, %v2054_v24, -inf }
 0x659   :  { %v2100_v21 = vmax.f32 %v2098_v10, %v2099_v51  ;;  %v2107_v28 = vsel %vm80_vm1, %v2055_v3, -inf  ;;  %v2115_v55 = vsel %vm80_vm1, %v2056_v36, -inf  ;;  %v2116_v44 = vsel %vm80_vm1, %v2057_v25, -inf }
 0x65a   :  { %v2118_v42 = vsel %vm80_vm1, %v2058_v15, -inf  ;;  %v2120_v43 = vsel %vm80_vm1, %v2059_v34, -inf  ;;  %v2117_v7 = vmax.f32 %v2115_v55, %v2116_v44  ;;  %v2122_v35 = vsel %vm80_vm1, %v2060_v5, -inf }
 0x65b   :  { %v2102_v27 = vmax.f32 %v2100_v21, %v2101_v23  ;;  %v2124_v10 = vsel %vm80_vm1, %v2061_v33, -inf  ;;  %v2132_v39 = vsel %vm80_vm1, %v2062_v16, -inf  ;;  %v2133_v12 = vsel %vm80_vm1, %v2063_v8, -inf }
 0x65c   :  { %v2135_v24 = vsel %vm80_vm1, %v2064_v1, -inf  ;;  %v2137_v3 = vsel %vm80_vm1, %v2065_v17, -inf  ;;  %v2119_v25 = vmax.f32 %v2117_v7, %v2118_v42  ;;  %v2134_v51 = vmax.f32 %v2132_v39, %v2133_v12 }
 0x65d   :  { %v2104_v36 = vmax.f32 %v2102_v27, %v2103_v45  ;;  %v2139_v15 = vsel %vm80_vm1, %v2066_v19, -inf  ;;  %v2141_v23 = vsel %vm80_vm1, %v2067_v9, -inf  ;;  %v2149_v34 = vsel %vm80_vm1, %v2068_v54, -inf }
 0x65e   :  { %v2150_v5 = vsel %vm80_vm1, %v2069_v61, -inf  ;;  %v2152_v33 = vsel %vm80_vm1, %v2070_v31, -inf  ;;  %v2121_v21 = vmax.f32 %v2119_v25, %v2120_v43  ;;  %v2136_v8 = vmax.f32 %v2134_v51, %v2135_v24 }
 0x65f   :  { %v2106_v16 = vmax.f32 %v2104_v36, %v2105_v18  ;;  %v2151_v55 = vmax.f32 %v2149_v34, %v2150_v5  ;;  %v2154_v1 = vsel %vm80_vm1, %v2071_v41, -inf  ;;  %v2156_v17 = vsel %vm80_vm1, %v2072_v6, -inf }
 0x660   :  { %v2158_v7 = vsel %vm80_vm1, %v2073_v63, -inf  ;;  %v2166_v19 = vsel %vm80_vm1, %v2074_v56, -inf  ;;  %v2123_v9 = vmax.f32 %v2121_v21, %v2122_v35  ;;  %v2138_v44 = vmax.f32 %v2136_v8, %v2137_v3 }
 0x661   :  { %v2108_v45 = vmax.f32 %v2106_v16, %v2107_v28  ;;  %v2153_v54 = vmax.f32 %v2151_v55, %v2152_v33  ;;  %v2167_v61 = vsel %vm80_vm1, %v2075_v38, -inf  ;;  %v2169_v31 = vsel %vm80_vm1, %v2076_v40, -inf }
 0x662   :  { %v2171_v18 = vsel %vm80_vm1, %v2077_v46, -inf  ;;  %v2173_v42 = vsel %vm80_vm1, %v2078_v59, -inf  ;;  %v2125_v41 = vmax.f32 %v2123_v9, %v2124_v10  ;;  %v2140_v27 = vmax.f32 %v2138_v44, %v2139_v15 }
 0x663   :  { %v2109_v43 = vrot.slane %v2108_v45, 4  ;;  %v2155_v6 = vmax.f32 %v2153_v54, %v2154_v1  ;;  %v2168_v39 = vmax.f32 %v2166_v19, %v2167_v61  ;;  %v2175_v63 = vsel %vm80_vm1, %v5213_v11, -inf }
 0x664   :  { %v2183_v56 = vsel %vm80_vm1, %v5217_v57, -inf  ;;  %v2184_v38 = vsel %vm80_vm1, %v5221_v60, -inf  ;;  %v2126_v40 = vrot.slane %v2125_v41, 4  ;;  %v2142_v35 = vmax.f32 %v2140_v27, %v2141_v23 }
 0x665   :  { %v2110_v28 = vmax.f32 %v2108_v45, %v2109_v43  ;;  %v2157_v46 = vmax.f32 %v2155_v6, %v2156_v17  ;;  %v2170_v12 = vmax.f32 %v2168_v39, %v2169_v31  ;;  %v2185_v59 = vmax.f32 %v2183_v56, %v2184_v38 }
 0x666   :  { %v2186_v10 = vsel %vm80_vm1, %v5225_v62, -inf  ;;  %v2188_v24 = vsel %vm80_vm1, %v5229_v49, -inf  ;;  %v2127_v11 = vmax.f32 %v2125_v41, %v2126_v40  ;;  %v2143_v36 = vrot.slane %v2142_v35, 4 }
 0x667   :  { %v2111_v3 = vrot.slane %v2110_v28, 2  ;;  %v2159_v25 = vmax.f32 %v2157_v46, %v2158_v7  ;;  %v2172_v57 = vmax.f32 %v2170_v12, %v2171_v18  ;;  %v2187_v51 = vmax.f32 %v2185_v59, %v2186_v10  ;;  %v5958_v10 = vld [vmem:[#allocation102_spill] sm:$0xff] }
 0x668   :  { %v2190_v60 = vsel %vm80_vm1, %v5233_v20, -inf  ;;  %v2192_v15 = vsel %vm80_vm1, %v5237_v30, -inf  ;;  %v2128_v34 = vrot.slane %v2127_v11, 2  ;;  %v2144_v5 = vmax.f32 %v2142_v35, %v2143_v36 }
 0x669   :  { %v2112_v23 = vmax.f32 %v2110_v28, %v2111_v3  ;;  %v2160_v33 = vrot.slane %v2159_v25, 4  ;;  %v2174_v62 = vmax.f32 %v2172_v57, %v2173_v42  ;;  %v2189_v16 = vmax.f32 %v2187_v51, %v2188_v24  ;;  %v5959_v51 = vld [vmem:[#allocation106_spill] sm:$0xff] }
 0x66a   :  { %v2200_v49 = vsel %vm80_vm1, %v5241_v47, -inf  ;;  %v2201_v21 = vsel %vm80_vm1, %v5245_v14, -inf  ;;  %v2129_v55 = vmax.f32 %v2127_v11, %v2128_v34  ;;  %v2145_v1 = vrot.slane %v2144_v5, 2 }
 0x66b   :  { %v2113_v8 = vrot.slane %v2112_v23, 1  ;;  %v2161_v17 = vmax.f32 %v2159_v25, %v2160_v33  ;;  %v2176_v20 = vmax.f32 %v2174_v62, %v2175_v63  ;;  %v2191_v7 = vmax.f32 %v2189_v16, %v2190_v60  ;;  %v5962_v16 = vld [vmem:[#allocation113_spill] sm:$0xff] }
 0x66c   :  { %v2202_v19 = vmax.f32 %v2200_v49, %v2201_v21  ;;  %v2203_v30 = vsel %vm80_vm1, %v5251_v58, -inf  ;;  %v2096_v45 = vadd.f32 %v5037_v52, %v5846_v48  ;;  %v2130_v9 = vrot.slane %v2129_v55, 1 }
 0x66d   :  { %v2146_v44 = vmax.f32 %v2144_v5, %v2145_v1  ;;  %v2162_v54 = vrot.slane %v2161_v17, 2  ;;  %v2177_v47 = vrot.slane %v2176_v20, 4  ;;  %v2193_v61 = vmax.f32 %v2191_v7, %v2192_v15 }
 0x66e   :  { %v2204_v31 = vmax.f32 %v2202_v19, %v2203_v30  ;;  %v2205_v14 = vsel %vm80_vm1, %v5255_v22, -inf  ;;  %v2097_v18 = vadd.f32 %v5051_v50, %v5847_v4  ;;  %v2207_v58 = vsel %vm80_vm1, %v5259_v2, -inf  ;;  %v5965_v30 = vld [vmem:[#allocation111_spill] sm:$0xff] }
 0x66f   :  { %v2147_v42 = vrot.slane %v2146_v44, 1  ;;  %v2163_v43 = vmax.f32 %v2161_v17, %v2162_v54  ;;  %v2114_v41 = vmax.f32 %v2112_v23, %v2113_v8  ;;  %v2178_v27 = vmax.f32 %v2176_v20, %v2177_v47  ;;  %v5960_v23 = vld [vmem:[#allocation114_spill] sm:$0xff] }
 0x670   :  { %v2194_v48 = vrot.slane %v2193_v61, 4  ;;  %v2206_v52 = vmax.f32 %v2204_v31, %v2205_v14  ;;  %v2131_v6 = vmax.f32 %v2129_v55, %v2130_v9  ;;  %v2209_v39 = vsel %vm80_vm1, %v5263_v53, -inf  ;;  %v5964_v55 = vld [vmem:[#allocation112_spill] sm:$0xff] }
 0x671   :  { %v2217_v63 = vsel %vm80_vm1, %v5267_v32, -inf  ;;  %v2218_v22 = vsel %vm80_vm1, %v5271_v13, -inf  ;;  %v2179_v4 = vrot.slane %v2178_v27, 2  ;;  %v2148_v28 = vmax.f32 %v2146_v44, %v2147_v42 }
 0x672   :  { %v2195_v50 = vmax.f32 %v2193_v61, %v2194_v48  ;;  %v2208_v56 = vmax.f32 %v2206_v52, %v2207_v58  ;;  %v2219_v38 = vmax.f32 %v2217_v63, %v2218_v22  ;;  %v2164_v2 = vrot.slane %v2163_v43, 1  ;;  %v3259_v22 = vld [vmem:[%s5424_s3 + $0x2c] ss:$16 sps:$4 sm:$0xff]  }
 0x673   :  { %v2220_v40 = vsel %vm80_vm1, %v5275_v37, -inf  ;;  %v2222_v35 = vsel %vm80_vm1, %v5279_v29, -inf  ;;  %v2180_v46 = vmax.f32 %v2178_v27, %v2179_v4  ;;  %v2048_v32 = vrot.slane %v5247_v26, 1  ;;  %v3257_v4 = vld [vmem:[%s5424_s3 + $0x28] ss:$16 sps:$4 sm:$0xff]  }
 0x674   :  { %v2196_v53 = vrot.slane %v2195_v50, 2  ;;  %v2210_v12 = vmax.f32 %v2208_v56, %v2209_v39  ;;  %v2221_v59 = vmax.f32 %v2219_v38, %v2220_v40  ;;  %v2224_v13 = vsel %vm80_vm1, %v2096_v45, -inf  ;;  %v3254_v39 = vld [vmem:[%s5424_s3 + $0x8] ss:$16 sps:$4 sm:$0xff]   ;;  %v3262_v56 = vld [vmem:[#allocation2 + $0x4] ss:$8 sps:$4 sm:$0xff]  }
 0x675   :  { %v2242_v24 = vsel %vm1069_vm2, %v5958_v10, %v5134_v0  ;;  %v2258_v3 = vsel %vm1069_vm2, %v2131_v6, %v2114_v41  ;;  %v2181_v11 = vrot.slane %v2180_v46, 1  ;;  %v2165_v57 = vmax.f32 %v2163_v43, %v2164_v2  ;;  %v3260_v38 = vld [vmem:[#allocation2] ss:$8 sps:$4 sm:$0xff]   ;;  %v3263_v2 = vld [vmem:[#allocation2 + $0x10] ss:$8 sps:$4 sm:$0xff]  }
 0x676   :  { %v2197_v36 = vmax.f32 %v2195_v50, %v2196_v53  ;;  %v2211_v37 = vrot.slane %v2210_v12, 4  ;;  %v2223_v25 = vmax.f32 %v2221_v59, %v2222_v35  ;;  %v2226_v29 = vsel %vm80_vm1, %v2097_v18, -inf  ;;  %v3268_v40 = vld [vmem:[#allocation2 + $0x24] ss:$8 sps:$4 sm:$0xff]   ;;  %v3266_v35 = vld [vmem:[#allocation2 + $0x20] ss:$8 sps:$4 sm:$0xff]  }
 0x677   :  { %v2243_v60 = vsel %vm1071_vm3, %v5959_v51, %v2242_v24  ;;  %v2259_v15 = vsel %vm1071_vm3, %v2148_v28, %v2258_v3  ;;  %v5961_v34 = vrot.slane %v5960_v23, 1  ;;  %v5963_v49 = vrot.slane %v5962_v16, 1  ;;  %v3265_v28 = vld [vmem:[#allocation2 + $0x14] ss:$8 sps:$4 sm:$0xff]   ;;  %v3272_v53 = vld [vmem:[#allocation2 + $0x30] ss:$8 sps:$4 sm:$0xff]  }
 0x678   :  { %v2198_v33 = vrot.slane %v2197_v36, 1  ;;  %v2212_v0 = vmax.f32 %v2210_v12, %v2211_v37  ;;  %v2225_v62 = vmax.f32 %v2223_v25, %v2224_v13  ;;  %v2182_v8 = vmax.f32 %v2180_v46, %v2181_v11  ;;  %v3274_v46 = vld [vmem:[#allocation2 + $0x34] ss:$8 sps:$4 sm:$0xff]   ;;  %v3280_v12 = vld [vmem:[#allocation2 + $0x44] ss:$8 sps:$4 sm:$0xff]  }
 0x679   :  { %v2015_v5 = vmax.f32 %v5960_v23, %v5961_v34  ;;  %v2032_v21 = vmax.f32 %v5962_v16, %v5963_v49  ;;  %v2244_v1 = vsel %vm1073_vm4, %v5964_v55, %v2243_v60  ;;  %v2260_v17 = vsel %vm1073_vm4, %v2165_v57, %v2259_v15  ;;  %v3278_v59 = vld [vmem:[#allocation2 + $0x40] ss:$8 sps:$4 sm:$0xff]   ;;  %v3284_v13 = vld [vmem:[#allocation2 + $0x50] ss:$8 sps:$4 sm:$0xff]   ;;  %v3292_v10 = vld [vmem:[#allocation2 + $0x64] ss:$8 sps:$4 sm:$0xff]  }
 0x67a   :  { %v2199_v20 = vmax.f32 %v2197_v36, %v2198_v33  ;;  %v2213_v7 = vrot.slane %v2212_v0, 2  ;;  %v2227_v19 = vmax.f32 %v2225_v62, %v2226_v29  ;;  %v2245_v45 = vsel %vm1075_vm5, %v5965_v30, %v2244_v1  ;;  %v3290_v24 = vld [vmem:[#allocation2 + $0x60] ss:$8 sps:$4 sm:$0xff]   ;;  %v3298_v3 = vld [vmem:[#allocation2 + $0x74] ss:$8 sps:$4 sm:$0xff]  }
 0x67b   :  { %v2049_v9 = vmax.f32 %v5247_v26, %v2048_v32  ;;  %v2246_v44 = vsel %vm1077_vm6, %v2015_v5, %v2245_v45  ;;  %v2261_v54 = vsel %vm1075_vm5, %v2182_v8, %v2260_v17  ;;  %v5966_v50 = vmov 0   ;;  %v3286_v32 = vld [vmem:[#allocation2 + $0x54] ss:$8 sps:$4 sm:$0xff]   ;;  %v3296_v11 = vld [vmem:[#allocation2 + $0x70] ss:$8 sps:$4 sm:$0xff]  }
 0x67c   :  { %v2214_v47 = vmax.f32 %v2212_v0, %v2213_v7  ;;  %v2228_v61 = vrot.slane %v2227_v19, 4  ;;  %v2247_v31 = vsel %vm1079_vm7, %v2032_v21, %v2246_v44  ;;  %v2262_v14 = vsel %vm1077_vm6, %v2199_v20, %v2261_v54  ;;  %v3304_v36 = vld [vmem:[#allocation2 + $0x84] ss:$8 sps:$4 sm:$0xff]   ;;  %v3302_v37 = vld [vmem:[#allocation2 + $0x80] ss:$8 sps:$4 sm:$0xff]  }
 0x67d   :  { %v2248_v18 = vsel %vm1081_vm8, %v2049_v9, %v2247_v31  ;;  %v3310_v25 = vld [vmem:[#allocation2 + $0x94] ss:$8 sps:$4 sm:$0xff]   ;;  %v3308_v57 = vld [vmem:[#allocation2 + $0x90] ss:$8 sps:$4 sm:$0xff]   ;;  %v3316_v29 = vld [vmem:[#allocation2 + $0xa4] ss:$8 sps:$4 sm:$0xff]  }
 0x67e   :  { %v2215_v42 = vrot.slane %v2214_v47, 1  ;;  %v2229_v43 = vmax.f32 %v2227_v19, %v2228_v61  ;;  %v3314_v51 = vld [vmem:[#allocation2 + $0xa0] ss:$8 sps:$4 sm:$0xff]   ;;  %v3322_v60 = vld [vmem:[#allocation2 + $0xb4] ss:$8 sps:$4 sm:$0xff]  }
 0x67f   :  { %v3320_v15 = vld [vmem:[#allocation2 + $0xb0] ss:$8 sps:$4 sm:$0xff]   ;;  %v3328_v23 = vld [vmem:[#allocation2 + $0xc4] ss:$8 sps:$4 sm:$0xff]   ;;  %v3326_v34 = vld [vmem:[#allocation2 + $0xc0] ss:$8 sps:$4 sm:$0xff]  }
 0x680   :  { %v2216_v58 = vmax.f32 %v2214_v47, %v2215_v42  ;;  %v2230_v41 = vrot.slane %v2229_v43, 2  ;;  %v3334_v5 = vld [vmem:[#allocation2 + $0xd4] ss:$8 sps:$4 sm:$0xff]   ;;  %v3332_v33 = vld [vmem:[#allocation2 + $0xd0] ss:$8 sps:$4 sm:$0xff]   ;;  %v5968_v44 = vld [vmem:[#allocation8_spill] sm:$0xff] }
 0x681   :  { %v3338_v0 = vld [vmem:[#allocation2 + $0xe0] ss:$8 sps:$4 sm:$0xff]   ;;  %v3340_v62 = vld [vmem:[#allocation2 + $0xe4] ss:$8 sps:$4 sm:$0xff]   ;;  %v3346_v21 = vld [vmem:[#allocation2 + $0xf4] ss:$8 sps:$4 sm:$0xff]  }
 0x682   :  { %v2231_v27 = vmax.f32 %v2229_v43, %v2230_v41  ;;  %v2263_v48 = vsel %vm1079_vm7, %v2216_v58, %v2262_v14  ;;  %v3341_v16 = vld [vmem:[#allocation2 + $0x1c0] ss:$8 sps:$4 sm:$0xff]   ;;  %v3343_v49 = vld [vmem:[#allocation2 + $0x1c4] ss:$8 sps:$4 sm:$0xff]   ;;  %v3349_v8 = vld [vmem:[#allocation2 + $0x1d4] ss:$8 sps:$4 sm:$0xff]  }
 0x683   :  { %2902 = vmatprep.subr.bf16.mxu0 %v3343_v49  ;;  %v3344_v55 = vld [vmem:[#allocation2 + $0xf0] ss:$8 sps:$4 sm:$0xff]   ;;  %v3350_v17 = vld [vmem:[#allocation2 + $0x1e0] ss:$8 sps:$4 sm:$0xff]   ;;  %v3352_v20 = vld [vmem:[#allocation2 + $0x1e4] ss:$8 sps:$4 sm:$0xff]  }
 0x684   :  { %v2232_v26 = vrot.slane %v2231_v27, 1  ;;  %2903 = vmatpush1.bf16.msra.mxu0 %v3341_v16  ;;  %v3347_v1 = vld [vmem:[#allocation2 + $0x1d0] ss:$8 sps:$4 sm:$0xff]   ;;  %v3355_v7 = vld [vmem:[#allocation2 + $0x1f4] ss:$8 sps:$4 sm:$0xff]  }
 0x685   :  { %2904 = vmatprep.subr.bf16.mxu0 %v3349_v8  ;;  %v3353_v19 = vld [vmem:[#allocation2 + $0x1f0] ss:$8 sps:$4 sm:$0xff]   ;;  %v2275_v30 = vld [vmem:[%s5426_s5] ss:$4 sm:$0xf] }
 0x686   :  { %v2233_v52 = vmax.f32 %v2231_v27, %v2232_v26  ;;  %v5967_v45 = vld [vmem:[#allocation9_spill] sm:$0xff]  ;;  %v2284_v54 = vrot.slane %v2275_v30, %v5968_v44 }
 0x687   :  { %v2280_v9 = vrot.slane %v2275_v30, %v5967_v45 }
 0x688   :  { %v2264_v6 = vsel %vm1081_vm8, %v2233_v52, %v2263_v48  ;;  %2905 = vmatpush1.bf16.msra.mxu0 %v3347_v1  ;;  %v5969_v48 = vld [vmem:[#allocation10_spill] sm:$0xff] }
 0x689   :  { %v2266_v63 = vpack.c.bf16 %v2264_v6, %v2248_v18  ;;  %2906 = vmatprep.subr.bf16.mxu0 %v3352_v20  ;;  %v2288_v26 = vrot.slane %v2275_v30, %v5969_v48 }
 0x68b   :  { %3020 = vmatmul.mubr.msk.bf16.vlgmr.msra.gmra.mrb[24].mxu1 %vm80_vm1, %v2266_v63 }
 0x68c   :  { %2384 = vmatpush1.bf16.msra.mxu1 %v3254_v39  ;;  %2415 = vmatprep.mubr.bf16.mxu1 %v5966_v50  ;;  %v5970_v39 = vld [vmem:[#allocation11_spill] sm:$0xff] }
 0x68d   :  { %2385 = vmatprep.subr.bf16.mxu1 %v3259_v22  ;;  %2907 = vmatpush1.bf16.msra.mxu0 %v3350_v17 }
 0x68e   :  { %2908 = vmatprep.subr.bf16.mxu0 %v3355_v7 }
 0x690   :  { %2386 = vmatpush1.bf16.msra.mxu1 %v3257_v4 }
 0x691   :  { %2835 = vmatprep.subr.bf16.mxu1 %v3262_v56  ;;  %2909 = vmatpush1.bf16.msra.mxu0 %v3353_v19 }
 0x693   :  { %3021 = vmatmul.mubr.msk.bf16.vlgmr.msra.gmra.mrb[28].mxu1 %vm80_vm1, %v2266_v63  ;;  %v2292_v63 = vrot.slane %v2275_v30, %v5970_v39 }
 0x694   :  { %2836 = vmatpush1.bf16.msra.mxu1 %v3260_v38 }
 0x695   :  { %2837 = vmatprep.subr.bf16.mxu1 %v3265_v28 }
 0x698   :  { %2838 = vmatpush1.bf16.msra.mxu1 %v3263_v2 }
 0x699   :  { %2839 = vmatprep.subr.bf16.mxu1 %v3268_v40 }
 0x69c   :  { %2840 = vmatpush1.bf16.msra.mxu1 %v3266_v35 }
 0x69d   :  { %2841 = vmatprep.subr.bf16.mxu1 %v3274_v46 }
 0x6a0   :  { %2842 = vmatpush1.bf16.msra.mxu1 %v3272_v53 }
 0x6a1   :  { %2843 = vmatprep.subr.bf16.mxu1 %v3280_v12 }
 0x6a4   :  { %2844 = vmatpush1.bf16.msra.mxu1 %v3278_v59 }
 0x6a5   :  { %2845 = vmatprep.subr.bf16.mxu1 %v3286_v32 }
 0x6a8   :  { %2846 = vmatpush1.bf16.msra.mxu1 %v3284_v13 }
 0x6a9   :  { %2847 = vmatprep.subr.bf16.mxu1 %v3292_v10 }
 0x6ac   :  { %2848 = vmatpush1.bf16.msra.mxu1 %v3290_v24  ;;  %v3022_v24 = vld [vmem:[%s5426_s5 + $0x1] ss:$4 sm:$0x3] }
 0x6ad   :  { %2849 = vmatprep.subr.bf16.mxu1 %v3298_v3 }
 0x6b0   :  { %2850 = vmatpush1.bf16.msra.mxu1 %v3296_v11 }
 0x6b1   :  { %2851 = vmatprep.subr.bf16.mxu1 %v3304_v36 }
 0x6b4   :  { %2852 = vmatpush1.bf16.msra.mxu1 %v3302_v37  ;;  %v2508_v37 = vrot.slane %v3022_v24, %v5967_v45 }
 0x6b5   :  { %2853 = vmatprep.subr.bf16.mxu1 %v3310_v25 }
 0x6b8   :  { %2854 = vmatpush1.bf16.msra.mxu1 %v3308_v57  ;;  %v2512_v57 = vrot.slane %v3022_v24, %v5968_v44 }
 0x6b9   :  { %2855 = vmatprep.subr.bf16.mxu1 %v3316_v29 }
 0x6bc   :  { %2856 = vmatpush1.bf16.msra.mxu1 %v3314_v51 }
 0x6bd   :  { %2857 = vmatprep.subr.bf16.mxu1 %v3322_v60 }
 0x6c0   :  { %2858 = vmatpush1.bf16.msra.mxu1 %v3320_v15 }
 0x6c1   :  { %2859 = vmatprep.subr.bf16.mxu1 %v3328_v23 }
 0x6c4   :  { %2860 = vmatpush1.bf16.msra.mxu1 %v3326_v34 }
 0x6c5   :  { %2861 = vmatprep.subr.bf16.mxu1 %v3334_v5 }
 0x6c8   :  { %2862 = vmatpush1.bf16.msra.mxu1 %v3332_v33 }
 0x6c9   :  { %2863 = vmatprep.subr.bf16.mxu1 %v3340_v62 }
 0x6cc   :  { %2864 = vmatpush1.bf16.msra.mxu1 %v3338_v0 }
 0x6cd   :  { %2865 = vmatprep.subr.bf16.mxu1 %v3346_v21 }
 0x6d0   :  { %2866 = vmatpush1.bf16.msra.mxu1 %v3344_v55 }
 0x75e   :  { %v2374_v47 = vpop.f32.mrb[24].mxu1 }
 0x75f   :  { %v2375_v61 = vadd.f32 %v2374_v47, %v2280_v9  ;;  %v2376_v31 = vpop.f32.mrb[25].mxu1 }
 0x760   :  { %v2377_v14 = vadd.f32 %v2376_v31, %v2284_v54  ;;  %v2378_v18 = vpop.f32.mrb[26].mxu1 }
 0x761   :  { %v2379_v42 = vadd.f32 %v2378_v18, %v2280_v9  ;;  %v2380_v43 = vpop.f32.mrb[27].mxu1  ;;  %v2426_v41 = vmax.f32 %v2375_v61, 0.0 }
 0x762   :  { %v2381_v58 = vadd.f32 %v2380_v43, %v2284_v54  ;;  %v2427_v52 = vmax.f32 %v2377_v14, 0.0  ;;  %v3087_v14 = vld [vmem:[%s5426_s5 + $0x2] ss:$4 sm:$0x3] }
 0x763   :  { %v2430_v27 = vmax.f32 %v2379_v42, 0.0 }
 0x764   :  { %v2431_v6 = vmax.f32 %v2381_v58, 0.0  ;;  %v2947_v58 = vrot.slane %v3087_v14, %v5967_v45 }
 0x765   :  { %v2434_v22 = vpack.c.bf16 %v2430_v27, %v2426_v41  ;;  %v2951_v27 = vrot.slane %v3087_v14, %v5968_v44 }
 0x766   :  { %v2435_v4 = vpack.c.bf16 %v2431_v6, %v2427_v52  ;;  %v2417_v50 = vpop.f32.mrb[28].mxu1 }
 0x767   :  { %v2418_v56 = vadd.f32 %v2417_v50, %v2288_v26  ;;  %v2419_v38 = vpop.f32.mrb[29].mxu1 }
 0x768   :  { %v2420_v28 = vadd.f32 %v2419_v38, %v2292_v63  ;;  %v2421_v2 = vpop.f32.mrb[30].mxu1  ;;  %2867 = vmatprep.mubr.bf16.mxu1 %v2435_v4  ;;  %v2962_v4 = vld [vmem:[%s5426_s5 + $0x3] sm:$0x1] }
 0x769   :  { %v2422_v40 = vadd.f32 %v2421_v2, %v2288_v26  ;;  %v2423_v35 = vpop.f32.mrb[31].mxu1  ;;  %2868 = vmatmul.mubr.bf16.vlgmr.msra.gmra.mrb[32].mxu1 %v2434_v22  ;;  %v2428_v53 = vmax.f32 %v2418_v56, 0.0 }
 0x76a   :  { %v2424_v46 = vadd.f32 %v2423_v35, %v2292_v63  ;;  %v2429_v59 = vmax.f32 %v2420_v28, 0.0 }
 0x76b   :  { %v2432_v12 = vmax.f32 %v2422_v40, 0.0 }
 0x76c   :  { %v2433_v32 = vmax.f32 %v2424_v46, 0.0 }
 0x76d   :  { %v2436_v13 = vpack.c.bf16 %v2432_v12, %v2428_v53 }
 0x76e   :  { %v2437_v10 = vpack.c.bf16 %v2433_v32, %v2429_v59 }
 0x770   :  { %2910 = vmatprep.mubr.bf16.mxu0 %v2437_v10 }
 0x771   :  { %2911 = vmatmul.mubr.bf16.vlgmr.msra.gmra.mrb[36].mxu0 %v2436_v13 }
 0x83c   :  { %v2869_v3 = vpop.f32.mrb[32].mxu1 }
 0x83d   :  { %v2871_v11 = vpop.f32.mrb[33].mxu1  ;;  %v2870_v29 = vadd.f32 %v2869_v3, %v2508_v37 }
 0x83e   :  { %v2873_v36 = vpop.f32.mrb[34].mxu1  ;;  %v2872_v51 = vadd.f32 %v2871_v11, %v2512_v57 }
 0x83f   :  { %v2875_v25 = vpop.f32.mrb[35].mxu1  ;;  %v2874_v15 = vadd.f32 %v2873_v36, %v2508_v37 }
 0x840   :  { %v2876_v5 = vadd.f32 %v2875_v25, %v2512_v57 }
 0x844   :  { %v2912_v60 = vpop.f32.mrb[36].mxu0 }
 0x845   :  { %v2913_v23 = vadd.f32 %v2912_v60, %v2870_v29  ;;  %v2914_v34 = vpop.f32.mrb[37].mxu0 }
 0x846   :  { %v2915_v33 = vadd.f32 %v2914_v34, %v2872_v51  ;;  %v2916_v0 = vpop.f32.mrb[38].mxu0 }
 0x847   :  { %v2917_v62 = vadd.f32 %v2916_v0, %v2874_v15  ;;  %v2918_v16 = vpop.f32.mrb[39].mxu0  ;;  %v2921_v21 = vmax.f32 %v2913_v23, 0.0 }
 0x848   :  { %v2919_v49 = vadd.f32 %v2918_v16, %v2876_v5  ;;  %v2922_v55 = vmax.f32 %v2915_v33, 0.0 }
 0x849   :  { %v2923_v8 = vmax.f32 %v2917_v62, 0.0 }
 0x84a   :  { %v2924_v1 = vmax.f32 %v2919_v49, 0.0 }
 0x84b   :  { %v2925_v17 = vadd.f32 %v2923_v8, %v2921_v21 }
 0x84c   :  { %v2932_v20 = vadd.f32 %v2924_v1, %v2922_v55 }
 0x84d   :  { %v2926_v7 = vrot.slane %v2925_v17, 4 }
 0x84e   :  { %v2933_v19 = vrot.slane %v2932_v20, 4 }
 0x84f   :  { %v2927_v30 = vadd.f32 %v2926_v7, %v2925_v17 }
 0x850   :  { %v2934_v9 = vadd.f32 %v2933_v19, %v2932_v20 }
 0x851   :  { %v2928_v54 = vrot.slane %v2927_v30, 2 }
 0x852   :  { %v2935_v47 = vrot.slane %v2934_v9, 2 }
 0x853   :  { %v2929_v61 = vadd.f32 %v2928_v54, %v2927_v30 }
 0x854   :  { %v2936_v31 = vadd.f32 %v2935_v47, %v2934_v9 }
 0x855   :  { %v2930_v18 = vrot.slane %v2929_v61, 1 }
 0x856   :  { %v2937_v42 = vrot.slane %v2936_v31, 1 }
 0x857   :  { %v2931_v43 = vadd.f32 %v2930_v18, %v2929_v61 }
 0x858   :  { %v2938_v41 = vadd.f32 %v2937_v42, %v2936_v31 }
 0x859   :  { %v2939_v48 = vmul.f32 0.0625, %v2931_v43 }
 0x85a   :  { %v2940_v26 = vmul.f32 0.0625, %v2938_v41 }
 0x85b   :  { %v2954_v52 = vmul.f32 %v2947_v58, %v2939_v48 }
 0x85c   :  { %v2955_v6 = vmul.f32 %v2951_v27, %v2940_v26 }
 0x85d   :  { %v2957_v39 = vsel %vm2956_vm9, %v2954_v52, 0.0 }
 0x85e   :  { %v2958_v63 = vsel %vm2956_vm9, %v2955_v6, 0.0 }
 0x85f   :  { %v2959_v22 = vadd.f32 %v2958_v63, %v2957_v39 }
 0x861   :  { %2960 = vadd.xlane.f32.xlu0 %v2959_v22 }
 0x8ee   :  { %v2961_v50 = vpop.xlane.xlu0 %2960 }
 0x8ef   :  { %v2963_v45 = vadd.f32 %v2962_v4, %v2961_v50 }
 0x8f1   :  { %2965 = vst.msk [vmem:[#allocation5] sm:$0x1] %vm2964_vm10, %v2963_v45 }
 0x8f2   :  { %3392 = shalt.err (!%p3389_p12)
}
 0x8f3   :  { %s3393_s11 = scalar_lea.hbm %s5427_s6, 16 }
 0x8f4   :  { %p3394_p13 = scmp.ne.s32.totalorder %s5427_s6, %s3393_s11  ;;  %p3397_p0 = scmp.lt.u32.totalorder %s3393_s11, %s5427_s6 }
 0x8f6   :  { %p3399_p1 = pnand %p3397_p0, %p3394_p13 }
 0x8f8   :  { %3402 = shalt.err (!%p3399_p1)
}
 0x8f9   :  { %2975 = dma.vmem_to_hbm [thread:$0]  %s2973_s30, 16, %s5427_s6, [#allocation4]  }
 0x8fa   :  { %3405 = dma.done.wait [#allocation4], 16  }
 0x8fb   :  { %3406 = vsyncadd [#allocation4], 4294967280 }
 0x8fc   :  { %2979 = vsyncpa [#allocation3], 1 }
 0x8fd   :  { %2980 = vsyncpa [#allocation4], 1 }

</bundles_post_ra>
